<compile_context>
chip_gen: v6e
topology: v6e:2x2x1
jax: 0.10.0
libtpu: 0.0.40
codegen_flags: <defaults>
</compile_context>

<pallas_src>
import functools

import jax
import jax.numpy as jnp
from jax import lax
from jax.experimental import pallas as pl
from jax.experimental.pallas import tpu as pltpu


def _infersent_kernel(
    x_ref,        # (T, 2, TB, E)   prem/hypo stacked on axis 1, zero padded in time
    mask_ref,     # (T, 2, TB, H)   1.0 for valid steps, pre-broadcast to H lanes
    invlen_ref,   # (2, TB, 1)      1 / sentence_length
    onehot_ref,   # (TB, C)
    wih_ref,      # (E, 8H)         [W_ih_fwd | W_ih_bwd]
    bih_ref,      # (1, 8H)         b_ih + b_hh per direction
    whhf_ref,     # (H, 4H)         forward recurrent weights
    whhb_ref,     # (H, 4H)         backward recurrent weights
    w1_ref,       # (4H, 4H)        head Linear #1 (stored in x out)
    b1_ref,       # (1, 4H)
    w2_ref,       # (4H, C)         head Linear #2
    b2_ref,       # (1, C)
    out_ref,      # out (TB, 128)   logits in lanes [0, C), nll in lane C
    xpf_ref,      # scratch VMEM (T, R, 4H): forward input projections
    xpb_ref,      # scratch VMEM (T, R, 4H): backward input projections
):
    f32 = jnp.float32
    T, _, TB, E = x_ref.shape
    H4 = whhf_ref.shape[1]
    H = H4 // 4
    C = w2_ref.shape[1]
    LANES = out_ref.shape[1]
    R = 2 * TB                      # prem rows followed by hypo rows

    # ---- one fused input-projection matmul for both sentences & directions
    # (T*R, E) @ (E, 8H); split at the 128-lane boundary into two scratches so
    # per-step loads fetch exactly the lanes they need.
    x_flat = x_ref[...].reshape(T * R, E)
    xp = jnp.dot(x_flat, wih_ref[...], preferred_element_type=f32) + bih_ref[...]
    xpf_ref[...] = xp[:, :H4].reshape(T, R, H4)
    xpb_ref[...] = xp[:, H4:].reshape(T, R, H4)

    whh_f = whhf_ref[...]           # (H, 4H)
    whh_b = whhb_ref[...]           # (H, 4H)

    def sigmoid(v):
        # tanh identity -> EUP slot, no VALU divide on the serial path
        return 0.5 * jnp.tanh(0.5 * v) + 0.5

    def cell(gates, c_prev):
        i = sigmoid(gates[:, 0 * H:1 * H])
        f = sigmoid(gates[:, 1 * H:2 * H])
        g = jnp.tanh(gates[:, 2 * H:3 * H])
        o = sigmoid(gates[:, 3 * H:4 * H])
        c_new = f * c_prev + i * g
        h_new = o * jnp.tanh(c_new)
        return h_new, c_new

    def step(t, carry):
        hf, cf, sf, hb, cb, sb = carry          # each (R, H)
        tb = T - 1 - t                          # backward walks time in reverse

        gates_f = xpf_ref[t] + jnp.dot(hf, whh_f, preferred_element_type=f32)
        gates_b = xpb_ref[tb] + jnp.dot(hb, whh_b, preferred_element_type=f32)

        m_f = mask_ref[t].reshape(R, H)
        m_b = mask_ref[tb].reshape(R, H)

        hf_new, cf_new = cell(gates_f, cf)
        hb_new, cb_new = cell(gates_b, cb)

        # pack_padded_sequence semantics: the backward state stays zero over
        # the padded suffix (prefix of the reverse walk), so it starts from a
        # zero state exactly at t = len-1.
        hb_new = m_b * hb_new
        cb_new = m_b * cb_new

        # forward outputs at padded steps are masked out of the pooled sum.
        sf_new = sf + m_f * hf_new
        sb_new = sb + hb_new
        return hf_new, cf_new, sf_new, hb_new, cb_new, sb_new

    z = jnp.zeros((R, H), f32)
    # TODO(synk): for long sequences, bound the trip count with a
    # scalar-prefetched per-tile max length and a partial unroll.
    _, _, sf, _, _, sb = lax.fori_loop(0, T, step, (z, z, z, z, z, z),
                                       unroll=True)

    # mean pooling over valid time steps
    inv = invlen_ref[...].reshape(R, 1)
    pf = sf * inv                                # (R, H) forward half
    pb = sb * inv                                # (R, H) backward half

    # head: concat([prem_f, prem_b, hypo_f, hypo_b]) @ W1 written as four
    # row-block matmuls -> no in-kernel lane concatenation of the features.
    a1 = (jnp.dot(pf[:TB], w1_ref[0 * H:1 * H, :], preferred_element_type=f32)
          + jnp.dot(pb[:TB], w1_ref[1 * H:2 * H, :], preferred_element_type=f32)
          + jnp.dot(pf[TB:], w1_ref[2 * H:3 * H, :], preferred_element_type=f32)
          + jnp.dot(pb[TB:], w1_ref[3 * H:4 * H, :], preferred_element_type=f32)
          + b1_ref[...])
    a1 = jnp.maximum(a1, 0.0)                    # ReLU; Dropout = identity (eval)
    logits = jnp.dot(a1, w2_ref[...], preferred_element_type=f32) + b2_ref[...]

    # per-example cross-entropy (mean over batch done in the wrapper)
    m = jnp.max(logits, axis=-1, keepdims=True)
    lse = jnp.log(jnp.sum(jnp.exp(logits - m), axis=-1, keepdims=True)) + m
    nll = lse - jnp.sum(logits * onehot_ref[...], axis=-1, keepdims=True)

    # lane-dense output slab: logits lanes [0, C), nll lane C, zeros after.
    pad = jnp.zeros((TB, LANES - C - 1), f32)
    out_ref[...] = jnp.concatenate([logits, nll, pad], axis=1)


def make_params(key, embed_size, hidden_size, num_classes):
    E, H, C = embed_size, hidden_size, num_classes
    ks = jax.random.split(key, 10)

    def init(k, shape, scale=0.1):
        return scale * jax.random.normal(k, shape, dtype=jnp.float32)

    return {
        # LSTM weights stored transposed (in_features, out_features); gate
        # order [i, f, g, o] like PyTorch; b = b_ih + b_hh folded together.
        'w_ih_f': init(ks[0], (E, 4 * H)), 'w_hh_f': init(ks[1], (H, 4 * H)),
        'b_f':    init(ks[2], (1, 4 * H)),
        'w_ih_b': init(ks[3], (E, 4 * H)), 'w_hh_b': init(ks[4], (H, 4 * H)),
        'b_b':    init(ks[5], (1, 4 * H)),
        'w1': init(ks[6], (4 * H, 4 * H)), 'b1': init(ks[7], (1, 4 * H)),
        'w2': init(ks[8], (4 * H, C)),     'b2': init(ks[9], (1, C)),
    }


@functools.partial(jax.jit, static_argnames=("batch_tile",))
def infersent_forward(params, x1, len1, x2, len2, labels, *, batch_tile=None):
    f32 = jnp.float32
    T1, B, E = x1.shape
    T2 = x2.shape[0]
    T = max(T1, T2)
    H = params['w_hh_f'].shape[0]
    C = params['w2'].shape[1]
    LANES = 128
    assert C + 1 <= LANES

    # Batch-tile heuristic: keep >= 2 grid steps when possible so v7x's two
    # TensorCores are both busy ("parallel" grid axis); single-TC chips only
    # pay ~0.35us extra grid overhead.  Override via batch_tile (e.g. =B).
    if batch_tile is None:
        if B % 2 == 0 and (B // 2) % 8 == 0:
            TB = min(B // 2, 128)
        else:
            TB = B
    else:
        TB = min(batch_tile, B)
    assert B % TB == 0 and (TB % 8 == 0 or TB == B), "batch tile must tile B"
    nb = B // TB

    # ---- layout prep (cheap glue): pad to common T, stack prem/hypo
    x1p = jnp.pad(x1.astype(f32), ((0, T - T1), (0, 0), (0, 0)))
    x2p = jnp.pad(x2.astype(f32), ((0, T - T2), (0, 0), (0, 0)))
    x_all = jnp.stack([x1p, x2p], axis=1)                       # (T, 2, B, E)

    t_idx = jnp.arange(T)[:, None]
    m1 = (t_idx < len1[None, :]).astype(f32)                    # (T, B)
    m2 = (t_idx < len2[None, :]).astype(f32)
    # pre-broadcast masks to H lanes -> in-loop mask use is a plain multiply
    m1b = jnp.broadcast_to(m1[:, :, None], (T, B, H))
    m2b = jnp.broadcast_to(m2[:, :, None], (T, B, H))
    mask_all = jnp.stack([m1b, m2b], axis=1)                    # (T, 2, B, H)

    inv_len = jnp.stack([1.0 / len1.astype(f32),
                         1.0 / len2.astype(f32)], axis=0)[..., None]  # (2, B, 1)
    onehot = jax.nn.one_hot(labels, C, dtype=f32)               # (B, C)

    # fuse the two directions' input projections into one matmul operand
    wih = jnp.concatenate([params['w_ih_f'], params['w_ih_b']], axis=1)   # (E, 8H)
    bih = jnp.concatenate([params['b_f'], params['b_b']], axis=1)         # (1, 8H)

    grid_spec = pltpu.PrefetchScalarGridSpec(
        num_scalar_prefetch=0,
        grid=(nb,),
        in_specs=[
            pl.BlockSpec((T, 2, TB, E), lambda b: (0, 0, b, 0)),   # x_all
            pl.BlockSpec((T, 2, TB, H), lambda b: (0, 0, b, 0)),   # mask_all
            pl.BlockSpec((2, TB, 1),    lambda b: (0, b, 0)),      # inv_len
            pl.BlockSpec((TB, C),       lambda b: (b, 0)),         # onehot
            pl.BlockSpec((E, 8 * H),    lambda b: (0, 0)),         # wih
            pl.BlockSpec((1, 8 * H),    lambda b: (0, 0)),         # bih
            pl.BlockSpec((H, 4 * H),    lambda b: (0, 0)),         # whh_f
            pl.BlockSpec((H, 4 * H),    lambda b: (0, 0)),         # whh_b
            pl.BlockSpec((4 * H, 4 * H), lambda b: (0, 0)),        # w1
            pl.BlockSpec((1, 4 * H),    lambda b: (0, 0)),         # b1
            pl.BlockSpec((4 * H, C),    lambda b: (0, 0)),         # w2
            pl.BlockSpec((1, C),        lambda b: (0, 0)),         # b2
        ],
        out_specs=pl.BlockSpec((TB, LANES), lambda b: (b, 0)),
        scratch_shapes=[pltpu.VMEM((T, 2 * TB, 4 * H), f32),
                        pltpu.VMEM((T, 2 * TB, 4 * H), f32)],
    )

    out = pl.pallas_call(
        _infersent_kernel,
        out_shape=jax.ShapeDtypeStruct((B, LANES), f32),
        grid_spec=grid_spec,
        compiler_params=pltpu.CompilerParams(
            dimension_semantics=("parallel",),
            vmem_limit_bytes=48 * 1024 * 1024),
    )(x_all, mask_all, inv_len, onehot, wih, bih,
      params['w_hh_f'], params['w_hh_b'],
      params['w1'], params['b1'], params['w2'], params['b2'])

    logits = out[:, :C]
    nll = out[:, C]
    loss = jnp.mean(nll)
    return loss, logits


def reference_forward(params, x1, len1, x2, len2, labels):
    """Pure-JAX mirror of the PyTorch forward (packed BiLSTM + mean pool,
    dropout = identity), computed at full f32 matmul precision as ground
    truth.  The length sort/unsort around pack_padded_sequence is a no-op on
    the math and is replaced by explicit masking."""
    f32 = jnp.float32
    H = params['w_hh_f'].shape[0]

    with jax.default_matmul_precision("highest"):
        def bilstm_mean(x, lengths):
            T, B, _ = x.shape
            mask = (jnp.arange(T)[:, None] < lengths[None, :]).astype(f32)  # (T, B)

            def run(w_ih, w_hh, b, reverse):
                xp = jnp.einsum('tbe,eh->tbh', x, w_ih) + b                 # (T,B,4H)

                def step(carry, inp):
                    h, c = carry
                    gx, m = inp
                    gates = gx + h @ w_hh
                    i = jax.nn.sigmoid(gates[:, 0 * H:1 * H])
                    f = jax.nn.sigmoid(gates[:, 1 * H:2 * H])
                    g = jnp.tanh(gates[:, 2 * H:3 * H])
                    o = jax.nn.sigmoid(gates[:, 3 * H:4 * H])
                    c_new = f * c + i * g
                    h_new = o * jnp.tanh(c_new)
                    m = m[:, None]
                    c = m * c_new + (1.0 - m) * c
                    h = m * h_new + (1.0 - m) * h
                    return (h, c), h * m

                init = (jnp.zeros((B, H), f32), jnp.zeros((B, H), f32))
                _, out = lax.scan(step, init, (xp, mask), reverse=reverse)
                return out                                                   # (T,B,H)

            out_f = run(params['w_ih_f'], params['w_hh_f'], params['b_f'], False)
            out_b = run(params['w_ih_b'], params['w_hh_b'], params['b_b'], True)
            out = jnp.concatenate([out_f, out_b], axis=-1)                   # (T,B,2H)
            return jnp.sum(out, axis=0) / lengths[:, None].astype(f32)       # (B,2H)

        prem = bilstm_mean(x1.astype(f32), len1)
        hypo = bilstm_mean(x2.astype(f32), len2)
        feats = jnp.concatenate([prem, hypo], axis=-1)
        a1 = jax.nn.relu(feats @ params['w1'] + params['b1'])
        logits = a1 @ params['w2'] + params['b2']
        onehot = jax.nn.one_hot(labels, logits.shape[-1], dtype=f32)
        lse = jax.scipy.special.logsumexp(logits, axis=-1)
        loss = jnp.mean(lse - jnp.sum(logits * onehot, axis=-1))
    return loss, logits


if __name__ == "__main__":
    B, T1, T2, E, H, C = 16, 12, 10, 32, 32, 3

    key = jax.random.PRNGKey(0)
    kp, kx1, kx2, kl1, kl2, ky = jax.random.split(key, 6)
    params = make_params(kp, E, H, C)

    x1 = jax.random.normal(kx1, (T1, B, E), dtype=jnp.float32)
    x2 = jax.random.normal(kx2, (T2, B, E), dtype=jnp.float32)
    len1 = jax.random.randint(kl1, (B,), 3, T1 + 1, dtype=jnp.int32)
    len2 = jax.random.randint(kl2, (B,), 3, T2 + 1, dtype=jnp.int32)
    labels = jax.random.randint(ky, (B,), 0, C, dtype=jnp.int32)

    loss, logits = infersent_forward(params, x1, len1, x2, len2, labels)
    jax.block_until_ready((loss, logits))

    ref_loss, ref_logits = reference_forward(params, x1, len1, x2, len2, labels)
    # Kernel matmuls use native bf16 MXU passes (f32 accumulation) per the
    # perf review; the reference is full f32, so the tolerance is relaxed
    # accordingly.
    assert jnp.allclose(logits, ref_logits, atol=2e-2, rtol=2e-2), (logits, ref_logits)
    assert jnp.allclose(loss, ref_loss, atol=2e-2, rtol=2e-2), (loss, ref_loss)
    print("KERNEL_OK")
</pallas_src>

<mosaic_0001>
module attributes {stable_mosaic.version = 11 : i64} {
  func.func @_infersent_kernel(%arg0: i32, %arg1: memref<12x2x8x32xf32, #tpu.memory_space<vmem>>, %arg2: memref<12x2x8x32xf32, #tpu.memory_space<vmem>>, %arg3: memref<2x8x1xf32, #tpu.memory_space<vmem>>, %arg4: memref<8x3xf32, #tpu.memory_space<vmem>>, %arg5: memref<32x256xf32, #tpu.memory_space<vmem>>, %arg6: memref<1x256xf32, #tpu.memory_space<vmem>>, %arg7: memref<32x128xf32, #tpu.memory_space<vmem>>, %arg8: memref<32x128xf32, #tpu.memory_space<vmem>>, %arg9: memref<128x128xf32, #tpu.memory_space<vmem>>, %arg10: memref<1x128xf32, #tpu.memory_space<vmem>>, %arg11: memref<128x3xf32, #tpu.memory_space<vmem>>, %arg12: memref<1x3xf32, #tpu.memory_space<vmem>>, %arg13: memref<8x128xf32, #tpu.memory_space<vmem>>, %arg14: memref<12x16x128xf32, #tpu.memory_space<vmem>>, %arg15: memref<12x16x128xf32, #tpu.memory_space<vmem>>) attributes {dimension_semantics = [#tpu.dimension_semantics<parallel>], iteration_bounds = array<i64: 2>, scalar_prefetch = 0 : i64, scratch_operands = 2 : i64, tpu.core_type = #tpu.core_type<tc>, window_params = [{transform_indices = @transform_0, window_bounds = array<i64: 12, 2, 8, 32>}, {transform_indices = @transform_1, window_bounds = array<i64: 12, 2, 8, 32>}, {transform_indices = @transform_2, window_bounds = array<i64: 2, 8, 1>}, {transform_indices = @transform_3, window_bounds = array<i64: 8, 3>}, {pipeline_mode = #tpu.pipeline_mode<synchronous>, transform_indices = @transform_4, window_bounds = array<i64: 32, 256>}, {pipeline_mode = #tpu.pipeline_mode<synchronous>, transform_indices = @transform_5, window_bounds = array<i64: 1, 256>}, {pipeline_mode = #tpu.pipeline_mode<synchronous>, transform_indices = @transform_6, window_bounds = array<i64: 32, 128>}, {pipeline_mode = #tpu.pipeline_mode<synchronous>, transform_indices = @transform_7, window_bounds = array<i64: 32, 128>}, {pipeline_mode = #tpu.pipeline_mode<synchronous>, transform_indices = @transform_8, window_bounds = array<i64: 128, 128>}, {pipeline_mode = #tpu.pipeline_mode<synchronous>, transform_indices = @transform_9, window_bounds = array<i64: 1, 128>}, {pipeline_mode = #tpu.pipeline_mode<synchronous>, transform_indices = @transform_10, window_bounds = array<i64: 128, 3>}, {pipeline_mode = #tpu.pipeline_mode<synchronous>, transform_indices = @transform_11, window_bounds = array<i64: 1, 3>}, {transform_indices = @transform_12, window_bounds = array<i64: 8, 128>}]} {
    %c0 = arith.constant 0 : index
    %c0_0 = arith.constant 0 : index
    %c0_1 = arith.constant 0 : index
    %c0_2 = arith.constant 0 : index
    %0 = vector.load %arg1[%c0, %c0_0, %c0_1, %c0_2] : memref<12x2x8x32xf32, #tpu.memory_space<vmem>>, vector<12x2x8x32xf32>
    %1 = vector.shape_cast %0 : vector<12x2x8x32xf32> to vector<192x32xf32>
    %c0_3 = arith.constant 0 : index
    %c0_4 = arith.constant 0 : index
    %2 = vector.load %arg5[%c0_3, %c0_4] : memref<32x256xf32, #tpu.memory_space<vmem>>, vector<32x256xf32>
    %cst = arith.constant dense<0.000000e+00> : vector<192x256xf32>
    %3 = tpu.matmul %1, %2, %cst {dimension_numbers = #tpu.dot_dimension_numbers<[1], [0], [0], [1], [0, 0, 1, 1], [], []>} : vector<192x32xf32>, vector<32x256xf32>, vector<192x256xf32> -> vector<192x256xf32>
    %c0_5 = arith.constant 0 : index
    %c0_6 = arith.constant 0 : index
    %4 = vector.load %arg6[%c0_5, %c0_6] : memref<1x256xf32, #tpu.memory_space<vmem>>, vector<1x256xf32>
    %5 = vector.broadcast %4 : vector<1x256xf32> to vector<192x256xf32>
    %6 = arith.addf %3, %5 : vector<192x256xf32>
    %7 = vector.extract_strided_slice %6 {offsets = [0, 0], sizes = [192, 128], strides = [1, 1]} : vector<192x256xf32> to vector<192x128xf32>
    %8 = vector.shape_cast %7 : vector<192x128xf32> to vector<12x16x128xf32>
    %c0_7 = arith.constant 0 : index
    %c0_8 = arith.constant 0 : index
    %c0_9 = arith.constant 0 : index
    %9 = vector.load %arg14[%c0_7, %c0_8, %c0_9] : memref<12x16x128xf32, #tpu.memory_space<vmem>>, vector<12x16x128xf32>
    tpu.vector_store %arg14[%c0_7, %c0_8, %c0_9], %8 {strides = array<i32>} : memref<12x16x128xf32, #tpu.memory_space<vmem>>, vector<12x16x128xf32>,
    %10 = vector.extract_strided_slice %6 {offsets = [0, 128], sizes = [192, 128], strides = [1, 1]} : vector<192x256xf32> to vector<192x128xf32>
    %11 = vector.shape_cast %10 : vector<192x128xf32> to vector<12x16x128xf32>
    %c0_10 = arith.constant 0 : index
    %c0_11 = arith.constant 0 : index
    %c0_12 = arith.constant 0 : index
    %12 = vector.load %arg15[%c0_10, %c0_11, %c0_12] : memref<12x16x128xf32, #tpu.memory_space<vmem>>, vector<12x16x128xf32>
    tpu.vector_store %arg15[%c0_10, %c0_11, %c0_12], %11 {strides = array<i32>} : memref<12x16x128xf32, #tpu.memory_space<vmem>>, vector<12x16x128xf32>,
    %c0_13 = arith.constant 0 : index
    %c0_14 = arith.constant 0 : index
    %13 = vector.load %arg7[%c0_13, %c0_14] : memref<32x128xf32, #tpu.memory_space<vmem>>, vector<32x128xf32>
    %c0_15 = arith.constant 0 : index
    %c0_16 = arith.constant 0 : index
    %14 = vector.load %arg8[%c0_15, %c0_16] : memref<32x128xf32, #tpu.memory_space<vmem>>, vector<32x128xf32>
    %cst_17 = arith.constant 0.000000e+00 : f32
    %15 = vector.broadcast %cst_17 : f32 to vector<16x32xf32>
    %c0_i32 = arith.constant 0 : i32
    %c11_i32 = arith.constant 11 : i32
    %16 = arith.subi %c11_i32, %c0_i32 : i32
    %17 = arith.index_cast %c0_i32 : i32 to index
    %c0_18 = arith.constant 0 : index
    %c0_19 = arith.constant 0 : index
    %18 = vector.load %arg14[%17, %c0_18, %c0_19] : memref<12x16x128xf32, #tpu.memory_space<vmem>>, vector<1x16x128xf32>
    %19 = vector.shape_cast %18 : vector<1x16x128xf32> to vector<16x128xf32>
    %cst_20 = arith.constant dense<0.000000e+00> : vector<16x128xf32>
    %20 = tpu.matmul %15, %13, %cst_20 {dimension_numbers = #tpu.dot_dimension_numbers<[1], [0], [0], [1], [0, 0, 1, 1], [], []>} : vector<16x32xf32>, vector<32x128xf32>, vector<16x128xf32> -> vector<16x128xf32>
    %21 = arith.addf %19, %20 : vector<16x128xf32>
    %22 = arith.index_cast %16 : i32 to index
    %c0_21 = arith.constant 0 : index
    %c0_22 = arith.constant 0 : index
    %23 = vector.load %arg15[%22, %c0_21, %c0_22] : memref<12x16x128xf32, #tpu.memory_space<vmem>>, vector<1x16x128xf32>
    %24 = vector.shape_cast %23 : vector<1x16x128xf32> to vector<16x128xf32>
    %cst_23 = arith.constant dense<0.000000e+00> : vector<16x128xf32>
    %25 = tpu.matmul %15, %14, %cst_23 {dimension_numbers = #tpu.dot_dimension_numbers<[1], [0], [0], [1], [0, 0, 1, 1], [], []>} : vector<16x32xf32>, vector<32x128xf32>, vector<16x128xf32> -> vector<16x128xf32>
    %26 = arith.addf %24, %25 : vector<16x128xf32>
    %27 = arith.index_cast %c0_i32 : i32 to index
    %c0_24 = arith.constant 0 : index
    %c0_25 = arith.constant 0 : index
    %c0_26 = arith.constant 0 : index
    %28 = vector.load %arg2[%27, %c0_24, %c0_25, %c0_26] : memref<12x2x8x32xf32, #tpu.memory_space<vmem>>, vector<1x2x8x32xf32>
    %29 = vector.shape_cast %28 : vector<1x2x8x32xf32> to vector<2x8x32xf32>
    %30 = vector.shape_cast %29 : vector<2x8x32xf32> to vector<16x32xf32>
    %31 = arith.index_cast %16 : i32 to index
    %c0_27 = arith.constant 0 : index
    %c0_28 = arith.constant 0 : index
    %c0_29 = arith.constant 0 : index
    %32 = vector.load %arg2[%31, %c0_27, %c0_28, %c0_29] : memref<12x2x8x32xf32, #tpu.memory_space<vmem>>, vector<1x2x8x32xf32>
    %33 = vector.shape_cast %32 : vector<1x2x8x32xf32> to vector<2x8x32xf32>
    %34 = vector.shape_cast %33 : vector<2x8x32xf32> to vector<16x32xf32>
    %35 = vector.extract_strided_slice %21 {offsets = [0, 0], sizes = [16, 32], strides = [1, 1]} : vector<16x128xf32> to vector<16x32xf32>
    %cst_30 = arith.constant 5.000000e-01 : f32
    %36 = vector.broadcast %cst_30 : f32 to vector<16x32xf32>
    %37 = arith.mulf %36, %35 : vector<16x32xf32>
    %38 = math.tanh %37 : vector<16x32xf32>
    %cst_31 = arith.constant 5.000000e-01 : f32
    %39 = vector.broadcast %cst_31 : f32 to vector<16x32xf32>
    %40 = arith.mulf %39, %38 : vector<16x32xf32>
    %cst_32 = arith.constant 5.000000e-01 : f32
    %41 = vector.broadcast %cst_32 : f32 to vector<16x32xf32>
    %42 = arith.addf %40, %41 : vector<16x32xf32>
    %43 = vector.extract_strided_slice %21 {offsets = [0, 32], sizes = [16, 32], strides = [1, 1]} : vector<16x128xf32> to vector<16x32xf32>
    %cst_33 = arith.constant 5.000000e-01 : f32
    %44 = vector.broadcast %cst_33 : f32 to vector<16x32xf32>
    %45 = arith.mulf %44, %43 : vector<16x32xf32>
    %46 = math.tanh %45 : vector<16x32xf32>
    %cst_34 = arith.constant 5.000000e-01 : f32
    %47 = vector.broadcast %cst_34 : f32 to vector<16x32xf32>
    %48 = arith.mulf %47, %46 : vector<16x32xf32>
    %cst_35 = arith.constant 5.000000e-01 : f32
    %49 = vector.broadcast %cst_35 : f32 to vector<16x32xf32>
    %50 = arith.addf %48, %49 : vector<16x32xf32>
    %51 = vector.extract_strided_slice %21 {offsets = [0, 64], sizes = [16, 32], strides = [1, 1]} : vector<16x128xf32> to vector<16x32xf32>
    %52 = math.tanh %51 : vector<16x32xf32>
    %53 = vector.extract_strided_slice %21 {offsets = [0, 96], sizes = [16, 32], strides = [1, 1]} : vector<16x128xf32> to vector<16x32xf32>
    %cst_36 = arith.constant 5.000000e-01 : f32
    %54 = vector.broadcast %cst_36 : f32 to vector<16x32xf32>
    %55 = arith.mulf %54, %53 : vector<16x32xf32>
    %56 = math.tanh %55 : vector<16x32xf32>
    %cst_37 = arith.constant 5.000000e-01 : f32
    %57 = vector.broadcast %cst_37 : f32 to vector<16x32xf32>
    %58 = arith.mulf %57, %56 : vector<16x32xf32>
    %cst_38 = arith.constant 5.000000e-01 : f32
    %59 = vector.broadcast %cst_38 : f32 to vector<16x32xf32>
    %60 = arith.addf %58, %59 : vector<16x32xf32>
    %61 = arith.mulf %50, %15 : vector<16x32xf32>
    %62 = arith.mulf %42, %52 : vector<16x32xf32>
    %63 = arith.addf %61, %62 : vector<16x32xf32>
    %64 = math.tanh %63 : vector<16x32xf32>
    %65 = arith.mulf %60, %64 : vector<16x32xf32>
    %66 = vector.extract_strided_slice %26 {offsets = [0, 0], sizes = [16, 32], strides = [1, 1]} : vector<16x128xf32> to vector<16x32xf32>
    %cst_39 = arith.constant 5.000000e-01 : f32
    %67 = vector.broadcast %cst_39 : f32 to vector<16x32xf32>
    %68 = arith.mulf %67, %66 : vector<16x32xf32>
    %69 = math.tanh %68 : vector<16x32xf32>
    %cst_40 = arith.constant 5.000000e-01 : f32
    %70 = vector.broadcast %cst_40 : f32 to vector<16x32xf32>
    %71 = arith.mulf %70, %69 : vector<16x32xf32>
    %cst_41 = arith.constant 5.000000e-01 : f32
    %72 = vector.broadcast %cst_41 : f32 to vector<16x32xf32>
    %73 = arith.addf %71, %72 : vector<16x32xf32>
    %74 = vector.extract_strided_slice %26 {offsets = [0, 32], sizes = [16, 32], strides = [1, 1]} : vector<16x128xf32> to vector<16x32xf32>
    %cst_42 = arith.constant 5.000000e-01 : f32
    %75 = vector.broadcast %cst_42 : f32 to vector<16x32xf32>
    %76 = arith.mulf %75, %74 : vector<16x32xf32>
    %77 = math.tanh %76 : vector<16x32xf32>
    %cst_43 = arith.constant 5.000000e-01 : f32
    %78 = vector.broadcast %cst_43 : f32 to vector<16x32xf32>
    %79 = arith.mulf %78, %77 : vector<16x32xf32>
    %cst_44 = arith.constant 5.000000e-01 : f32
    %80 = vector.broadcast %cst_44 : f32 to vector<16x32xf32>
    %81 = arith.addf %79, %80 : vector<16x32xf32>
    %82 = vector.extract_strided_slice %26 {offsets = [0, 64], sizes = [16, 32], strides = [1, 1]} : vector<16x128xf32> to vector<16x32xf32>
    %83 = math.tanh %82 : vector<16x32xf32>
    %84 = vector.extract_strided_slice %26 {offsets = [0, 96], sizes = [16, 32], strides = [1, 1]} : vector<16x128xf32> to vector<16x32xf32>
    %cst_45 = arith.constant 5.000000e-01 : f32
    %85 = vector.broadcast %cst_45 : f32 to vector<16x32xf32>
    %86 = arith.mulf %85, %84 : vector<16x32xf32>
    %87 = math.tanh %86 : vector<16x32xf32>
    %cst_46 = arith.constant 5.000000e-01 : f32
    %88 = vector.broadcast %cst_46 : f32 to vector<16x32xf32>
    %89 = arith.mulf %88, %87 : vector<16x32xf32>
    %cst_47 = arith.constant 5.000000e-01 : f32
    %90 = vector.broadcast %cst_47 : f32 to vector<16x32xf32>
    %91 = arith.addf %89, %90 : vector<16x32xf32>
    %92 = arith.mulf %81, %15 : vector<16x32xf32>
    %93 = arith.mulf %73, %83 : vector<16x32xf32>
    %94 = arith.addf %92, %93 : vector<16x32xf32>
    %95 = math.tanh %94 : vector<16x32xf32>
    %96 = arith.mulf %91, %95 : vector<16x32xf32>
    %97 = arith.mulf %34, %96 : vector<16x32xf32>
    %98 = arith.mulf %34, %94 : vector<16x32xf32>
    %99 = arith.mulf %30, %65 : vector<16x32xf32>
    %100 = arith.addf %15, %99 : vector<16x32xf32>
    %101 = arith.addf %15, %97 : vector<16x32xf32>
    %c1_i32 = arith.constant 1 : i32
    %c11_i32_48 = arith.constant 11 : i32
    %102 = arith.subi %c11_i32_48, %c1_i32 : i32
    %103 = arith.index_cast %c1_i32 : i32 to index
    %c0_49 = arith.constant 0 : index
    %c0_50 = arith.constant 0 : index
    %104 = vector.load %arg14[%103, %c0_49, %c0_50] : memref<12x16x128xf32, #tpu.memory_space<vmem>>, vector<1x16x128xf32>
    %105 = vector.shape_cast %104 : vector<1x16x128xf32> to vector<16x128xf32>
    %cst_51 = arith.constant dense<0.000000e+00> : vector<16x128xf32>
    %106 = tpu.matmul %65, %13, %cst_51 {dimension_numbers = #tpu.dot_dimension_numbers<[1], [0], [0], [1], [0, 0, 1, 1], [], []>} : vector<16x32xf32>, vector<32x128xf32>, vector<16x128xf32> -> vector<16x128xf32>
    %107 = arith.addf %105, %106 : vector<16x128xf32>
    %108 = arith.index_cast %102 : i32 to index
    %c0_52 = arith.constant 0 : index
    %c0_53 = arith.constant 0 : index
    %109 = vector.load %arg15[%108, %c0_52, %c0_53] : memref<12x16x128xf32, #tpu.memory_space<vmem>>, vector<1x16x128xf32>
    %110 = vector.shape_cast %109 : vector<1x16x128xf32> to vector<16x128xf32>
    %cst_54 = arith.constant dense<0.000000e+00> : vector<16x128xf32>
    %111 = tpu.matmul %97, %14, %cst_54 {dimension_numbers = #tpu.dot_dimension_numbers<[1], [0], [0], [1], [0, 0, 1, 1], [], []>} : vector<16x32xf32>, vector<32x128xf32>, vector<16x128xf32> -> vector<16x128xf32>
    %112 = arith.addf %110, %111 : vector<16x128xf32>
    %113 = arith.index_cast %c1_i32 : i32 to index
    %c0_55 = arith.constant 0 : index
    %c0_56 = arith.constant 0 : index
    %c0_57 = arith.constant 0 : index
    %114 = vector.load %arg2[%113, %c0_55, %c0_56, %c0_57] : memref<12x2x8x32xf32, #tpu.memory_space<vmem>>, vector<1x2x8x32xf32>
    %115 = vector.shape_cast %114 : vector<1x2x8x32xf32> to vector<2x8x32xf32>
    %116 = vector.shape_cast %115 : vector<2x8x32xf32> to vector<16x32xf32>
    %117 = arith.index_cast %102 : i32 to index
    %c0_58 = arith.constant 0 : index
    %c0_59 = arith.constant 0 : index
    %c0_60 = arith.constant 0 : index
    %118 = vector.load %arg2[%117, %c0_58, %c0_59, %c0_60] : memref<12x2x8x32xf32, #tpu.memory_space<vmem>>, vector<1x2x8x32xf32>
    %119 = vector.shape_cast %118 : vector<1x2x8x32xf32> to vector<2x8x32xf32>
    %120 = vector.shape_cast %119 : vector<2x8x32xf32> to vector<16x32xf32>
    %121 = vector.extract_strided_slice %107 {offsets = [0, 0], sizes = [16, 32], strides = [1, 1]} : vector<16x128xf32> to vector<16x32xf32>
    %cst_61 = arith.constant 5.000000e-01 : f32
    %122 = vector.broadcast %cst_61 : f32 to vector<16x32xf32>
    %123 = arith.mulf %122, %121 : vector<16x32xf32>
    %124 = math.tanh %123 : vector<16x32xf32>
    %cst_62 = arith.constant 5.000000e-01 : f32
    %125 = vector.broadcast %cst_62 : f32 to vector<16x32xf32>
    %126 = arith.mulf %125, %124 : vector<16x32xf32>
    %cst_63 = arith.constant 5.000000e-01 : f32
    %127 = vector.broadcast %cst_63 : f32 to vector<16x32xf32>
    %128 = arith.addf %126, %127 : vector<16x32xf32>
    %129 = vector.extract_strided_slice %107 {offsets = [0, 32], sizes = [16, 32], strides = [1, 1]} : vector<16x128xf32> to vector<16x32xf32>
    %cst_64 = arith.constant 5.000000e-01 : f32
    %130 = vector.broadcast %cst_64 : f32 to vector<16x32xf32>
    %131 = arith.mulf %130, %129 : vector<16x32xf32>
    %132 = math.tanh %131 : vector<16x32xf32>
    %cst_65 = arith.constant 5.000000e-01 : f32
    %133 = vector.broadcast %cst_65 : f32 to vector<16x32xf32>
    %134 = arith.mulf %133, %132 : vector<16x32xf32>
    %cst_66 = arith.constant 5.000000e-01 : f32
    %135 = vector.broadcast %cst_66 : f32 to vector<16x32xf32>
    %136 = arith.addf %134, %135 : vector<16x32xf32>
    %137 = vector.extract_strided_slice %107 {offsets = [0, 64], sizes = [16, 32], strides = [1, 1]} : vector<16x128xf32> to vector<16x32xf32>
    %138 = math.tanh %137 : vector<16x32xf32>
    %139 = vector.extract_strided_slice %107 {offsets = [0, 96], sizes = [16, 32], strides = [1, 1]} : vector<16x128xf32> to vector<16x32xf32>
    %cst_67 = arith.constant 5.000000e-01 : f32
    %140 = vector.broadcast %cst_67 : f32 to vector<16x32xf32>
    %141 = arith.mulf %140, %139 : vector<16x32xf32>
    %142 = math.tanh %141 : vector<16x32xf32>
    %cst_68 = arith.constant 5.000000e-01 : f32
    %143 = vector.broadcast %cst_68 : f32 to vector<16x32xf32>
    %144 = arith.mulf %143, %142 : vector<16x32xf32>
    %cst_69 = arith.constant 5.000000e-01 : f32
    %145 = vector.broadcast %cst_69 : f32 to vector<16x32xf32>
    %146 = arith.addf %144, %145 : vector<16x32xf32>
    %147 = arith.mulf %136, %63 : vector<16x32xf32>
    %148 = arith.mulf %128, %138 : vector<16x32xf32>
    %149 = arith.addf %147, %148 : vector<16x32xf32>
    %150 = math.tanh %149 : vector<16x32xf32>
    %151 = arith.mulf %146, %150 : vector<16x32xf32>
    %152 = vector.extract_strided_slice %112 {offsets = [0, 0], sizes = [16, 32], strides = [1, 1]} : vector<16x128xf32> to vector<16x32xf32>
    %cst_70 = arith.constant 5.000000e-01 : f32
    %153 = vector.broadcast %cst_70 : f32 to vector<16x32xf32>
    %154 = arith.mulf %153, %152 : vector<16x32xf32>
    %155 = math.tanh %154 : vector<16x32xf32>
    %cst_71 = arith.constant 5.000000e-01 : f32
    %156 = vector.broadcast %cst_71 : f32 to vector<16x32xf32>
    %157 = arith.mulf %156, %155 : vector<16x32xf32>
    %cst_72 = arith.constant 5.000000e-01 : f32
    %158 = vector.broadcast %cst_72 : f32 to vector<16x32xf32>
    %159 = arith.addf %157, %158 : vector<16x32xf32>
    %160 = vector.extract_strided_slice %112 {offsets = [0, 32], sizes = [16, 32], strides = [1, 1]} : vector<16x128xf32> to vector<16x32xf32>
    %cst_73 = arith.constant 5.000000e-01 : f32
    %161 = vector.broadcast %cst_73 : f32 to vector<16x32xf32>
    %162 = arith.mulf %161, %160 : vector<16x32xf32>
    %163 = math.tanh %162 : vector<16x32xf32>
    %cst_74 = arith.constant 5.000000e-01 : f32
    %164 = vector.broadcast %cst_74 : f32 to vector<16x32xf32>
    %165 = arith.mulf %164, %163 : vector<16x32xf32>
    %cst_75 = arith.constant 5.000000e-01 : f32
    %166 = vector.broadcast %cst_75 : f32 to vector<16x32xf32>
    %167 = arith.addf %165, %166 : vector<16x32xf32>
    %168 = vector.extract_strided_slice %112 {offsets = [0, 64], sizes = [16, 32], strides = [1, 1]} : vector<16x128xf32> to vector<16x32xf32>
    %169 = math.tanh %168 : vector<16x32xf32>
    %170 = vector.extract_strided_slice %112 {offsets = [0, 96], sizes = [16, 32], strides = [1, 1]} : vector<16x128xf32> to vector<16x32xf32>
    %cst_76 = arith.constant 5.000000e-01 : f32
    %171 = vector.broadcast %cst_76 : f32 to vector<16x32xf32>
    %172 = arith.mulf %171, %170 : vector<16x32xf32>
    %173 = math.tanh %172 : vector<16x32xf32>
    %cst_77 = arith.constant 5.000000e-01 : f32
    %174 = vector.broadcast %cst_77 : f32 to vector<16x32xf32>
    %175 = arith.mulf %174, %173 : vector<16x32xf32>
    %cst_78 = arith.constant 5.000000e-01 : f32
    %176 = vector.broadcast %cst_78 : f32 to vector<16x32xf32>
    %177 = arith.addf %175, %176 : vector<16x32xf32>
    %178 = arith.mulf %167, %98 : vector<16x32xf32>
    %179 = arith.mulf %159, %169 : vector<16x32xf32>
    %180 = arith.addf %178, %179 : vector<16x32xf32>
    %181 = math.tanh %180 : vector<16x32xf32>
    %182 = arith.mulf %177, %181 : vector<16x32xf32>
    %183 = arith.mulf %120, %182 : vector<16x32xf32>
    %184 = arith.mulf %120, %180 : vector<16x32xf32>
    %185 = arith.mulf %116, %151 : vector<16x32xf32>
    %186 = arith.addf %100, %185 : vector<16x32xf32>
    %187 = arith.addf %101, %183 : vector<16x32xf32>
    %c2_i32 = arith.constant 2 : i32
    %c11_i32_79 = arith.constant 11 : i32
    %188 = arith.subi %c11_i32_79, %c2_i32 : i32
    %189 = arith.index_cast %c2_i32 : i32 to index
    %c0_80 = arith.constant 0 : index
    %c0_81 = arith.constant 0 : index
    %190 = vector.load %arg14[%189, %c0_80, %c0_81] : memref<12x16x128xf32, #tpu.memory_space<vmem>>, vector<1x16x128xf32>
    %191 = vector.shape_cast %190 : vector<1x16x128xf32> to vector<16x128xf32>
    %cst_82 = arith.constant dense<0.000000e+00> : vector<16x128xf32>
    %192 = tpu.matmul %151, %13, %cst_82 {dimension_numbers = #tpu.dot_dimension_numbers<[1], [0], [0], [1], [0, 0, 1, 1], [], []>} : vector<16x32xf32>, vector<32x128xf32>, vector<16x128xf32> -> vector<16x128xf32>
    %193 = arith.addf %191, %192 : vector<16x128xf32>
    %194 = arith.index_cast %188 : i32 to index
    %c0_83 = arith.constant 0 : index
    %c0_84 = arith.constant 0 : index
    %195 = vector.load %arg15[%194, %c0_83, %c0_84] : memref<12x16x128xf32, #tpu.memory_space<vmem>>, vector<1x16x128xf32>
    %196 = vector.shape_cast %195 : vector<1x16x128xf32> to vector<16x128xf32>
    %cst_85 = arith.constant dense<0.000000e+00> : vector<16x128xf32>
    %197 = tpu.matmul %183, %14, %cst_85 {dimension_numbers = #tpu.dot_dimension_numbers<[1], [0], [0], [1], [0, 0, 1, 1], [], []>} : vector<16x32xf32>, vector<32x128xf32>, vector<16x128xf32> -> vector<16x128xf32>
    %198 = arith.addf %196, %197 : vector<16x128xf32>
    %199 = arith.index_cast %c2_i32 : i32 to index
    %c0_86 = arith.constant 0 : index
    %c0_87 = arith.constant 0 : index
    %c0_88 = arith.constant 0 : index
    %200 = vector.load %arg2[%199, %c0_86, %c0_87, %c0_88] : memref<12x2x8x32xf32, #tpu.memory_space<vmem>>, vector<1x2x8x32xf32>
    %201 = vector.shape_cast %200 : vector<1x2x8x32xf32> to vector<2x8x32xf32>
    %202 = vector.shape_cast %201 : vector<2x8x32xf32> to vector<16x32xf32>
    %203 = arith.index_cast %188 : i32 to index
    %c0_89 = arith.constant 0 : index
    %c0_90 = arith.constant 0 : index
    %c0_91 = arith.constant 0 : index
    %204 = vector.load %arg2[%203, %c0_89, %c0_90, %c0_91] : memref<12x2x8x32xf32, #tpu.memory_space<vmem>>, vector<1x2x8x32xf32>
    %205 = vector.shape_cast %204 : vector<1x2x8x32xf32> to vector<2x8x32xf32>
    %206 = vector.shape_cast %205 : vector<2x8x32xf32> to vector<16x32xf32>
    %207 = vector.extract_strided_slice %193 {offsets = [0, 0], sizes = [16, 32], strides = [1, 1]} : vector<16x128xf32> to vector<16x32xf32>
    %cst_92 = arith.constant 5.000000e-01 : f32
    %208 = vector.broadcast %cst_92 : f32 to vector<16x32xf32>
    %209 = arith.mulf %208, %207 : vector<16x32xf32>
    %210 = math.tanh %209 : vector<16x32xf32>
    %cst_93 = arith.constant 5.000000e-01 : f32
    %211 = vector.broadcast %cst_93 : f32 to vector<16x32xf32>
    %212 = arith.mulf %211, %210 : vector<16x32xf32>
    %cst_94 = arith.constant 5.000000e-01 : f32
    %213 = vector.broadcast %cst_94 : f32 to vector<16x32xf32>
    %214 = arith.addf %212, %213 : vector<16x32xf32>
    %215 = vector.extract_strided_slice %193 {offsets = [0, 32], sizes = [16, 32], strides = [1, 1]} : vector<16x128xf32> to vector<16x32xf32>
    %cst_95 = arith.constant 5.000000e-01 : f32
    %216 = vector.broadcast %cst_95 : f32 to vector<16x32xf32>
    %217 = arith.mulf %216, %215 : vector<16x32xf32>
    %218 = math.tanh %217 : vector<16x32xf32>
    %cst_96 = arith.constant 5.000000e-01 : f32
    %219 = vector.broadcast %cst_96 : f32 to vector<16x32xf32>
    %220 = arith.mulf %219, %218 : vector<16x32xf32>
    %cst_97 = arith.constant 5.000000e-01 : f32
    %221 = vector.broadcast %cst_97 : f32 to vector<16x32xf32>
    %222 = arith.addf %220, %221 : vector<16x32xf32>
    %223 = vector.extract_strided_slice %193 {offsets = [0, 64], sizes = [16, 32], strides = [1, 1]} : vector<16x128xf32> to vector<16x32xf32>
    %224 = math.tanh %223 : vector<16x32xf32>
    %225 = vector.extract_strided_slice %193 {offsets = [0, 96], sizes = [16, 32], strides = [1, 1]} : vector<16x128xf32> to vector<16x32xf32>
    %cst_98 = arith.constant 5.000000e-01 : f32
    %226 = vector.broadcast %cst_98 : f32 to vector<16x32xf32>
    %227 = arith.mulf %226, %225 : vector<16x32xf32>
    %228 = math.tanh %227 : vector<16x32xf32>
    %cst_99 = arith.constant 5.000000e-01 : f32
    %229 = vector.broadcast %cst_99 : f32 to vector<16x32xf32>
    %230 = arith.mulf %229, %228 : vector<16x32xf32>
    %cst_100 = arith.constant 5.000000e-01 : f32
    %231 = vector.broadcast %cst_100 : f32 to vector<16x32xf32>
    %232 = arith.addf %230, %231 : vector<16x32xf32>
    %233 = arith.mulf %222, %149 : vector<16x32xf32>
    %234 = arith.mulf %214, %224 : vector<16x32xf32>
    %235 = arith.addf %233, %234 : vector<16x32xf32>
    %236 = math.tanh %235 : vector<16x32xf32>
    %237 = arith.mulf %232, %236 : vector<16x32xf32>
    %238 = vector.extract_strided_slice %198 {offsets = [0, 0], sizes = [16, 32], strides = [1, 1]} : vector<16x128xf32> to vector<16x32xf32>
    %cst_101 = arith.constant 5.000000e-01 : f32
    %239 = vector.broadcast %cst_101 : f32 to vector<16x32xf32>
    %240 = arith.mulf %239, %238 : vector<16x32xf32>
    %241 = math.tanh %240 : vector<16x32xf32>
    %cst_102 = arith.constant 5.000000e-01 : f32
    %242 = vector.broadcast %cst_102 : f32 to vector<16x32xf32>
    %243 = arith.mulf %242, %241 : vector<16x32xf32>
    %cst_103 = arith.constant 5.000000e-01 : f32
    %244 = vector.broadcast %cst_103 : f32 to vector<16x32xf32>
    %245 = arith.addf %243, %244 : vector<16x32xf32>
    %246 = vector.extract_strided_slice %198 {offsets = [0, 32], sizes = [16, 32], strides = [1, 1]} : vector<16x128xf32> to vector<16x32xf32>
    %cst_104 = arith.constant 5.000000e-01 : f32
    %247 = vector.broadcast %cst_104 : f32 to vector<16x32xf32>
    %248 = arith.mulf %247, %246 : vector<16x32xf32>
    %249 = math.tanh %248 : vector<16x32xf32>
    %cst_105 = arith.constant 5.000000e-01 : f32
    %250 = vector.broadcast %cst_105 : f32 to vector<16x32xf32>
    %251 = arith.mulf %250, %249 : vector<16x32xf32>
    %cst_106 = arith.constant 5.000000e-01 : f32
    %252 = vector.broadcast %cst_106 : f32 to vector<16x32xf32>
    %253 = arith.addf %251, %252 : vector<16x32xf32>
    %254 = vector.extract_strided_slice %198 {offsets = [0, 64], sizes = [16, 32], strides = [1, 1]} : vector<16x128xf32> to vector<16x32xf32>
    %255 = math.tanh %254 : vector<16x32xf32>
    %256 = vector.extract_strided_slice %198 {offsets = [0, 96], sizes = [16, 32], strides = [1, 1]} : vector<16x128xf32> to vector<16x32xf32>
    %cst_107 = arith.constant 5.000000e-01 : f32
    %257 = vector.broadcast %cst_107 : f32 to vector<16x32xf32>
    %258 = arith.mulf %257, %256 : vector<16x32xf32>
    %259 = math.tanh %258 : vector<16x32xf32>
    %cst_108 = arith.constant 5.000000e-01 : f32
    %260 = vector.broadcast %cst_108 : f32 to vector<16x32xf32>
    %261 = arith.mulf %260, %259 : vector<16x32xf32>
    %cst_109 = arith.constant 5.000000e-01 : f32
    %262 = vector.broadcast %cst_109 : f32 to vector<16x32xf32>
    %263 = arith.addf %261, %262 : vector<16x32xf32>
    %264 = arith.mulf %253, %184 : vector<16x32xf32>
    %265 = arith.mulf %245, %255 : vector<16x32xf32>
    %266 = arith.addf %264, %265 : vector<16x32xf32>
    %267 = math.tanh %266 : vector<16x32xf32>
    %268 = arith.mulf %263, %267 : vector<16x32xf32>
    %269 = arith.mulf %206, %268 : vector<16x32xf32>
    %270 = arith.mulf %206, %266 : vector<16x32xf32>
    %271 = arith.mulf %202, %237 : vector<16x32xf32>
    %272 = arith.addf %186, %271 : vector<16x32xf32>
    %273 = arith.addf %187, %269 : vector<16x32xf32>
    %c3_i32 = arith.constant 3 : i32
    %c11_i32_110 = arith.constant 11 : i32
    %274 = arith.subi %c11_i32_110, %c3_i32 : i32
    %275 = arith.index_cast %c3_i32 : i32 to index
    %c0_111 = arith.constant 0 : index
    %c0_112 = arith.constant 0 : index
    %276 = vector.load %arg14[%275, %c0_111, %c0_112] : memref<12x16x128xf32, #tpu.memory_space<vmem>>, vector<1x16x128xf32>
    %277 = vector.shape_cast %276 : vector<1x16x128xf32> to vector<16x128xf32>
    %cst_113 = arith.constant dense<0.000000e+00> : vector<16x128xf32>
    %278 = tpu.matmul %237, %13, %cst_113 {dimension_numbers = #tpu.dot_dimension_numbers<[1], [0], [0], [1], [0, 0, 1, 1], [], []>} : vector<16x32xf32>, vector<32x128xf32>, vector<16x128xf32> -> vector<16x128xf32>
    %279 = arith.addf %277, %278 : vector<16x128xf32>
    %280 = arith.index_cast %274 : i32 to index
    %c0_114 = arith.constant 0 : index
    %c0_115 = arith.constant 0 : index
    %281 = vector.load %arg15[%280, %c0_114, %c0_115] : memref<12x16x128xf32, #tpu.memory_space<vmem>>, vector<1x16x128xf32>
    %282 = vector.shape_cast %281 : vector<1x16x128xf32> to vector<16x128xf32>
    %cst_116 = arith.constant dense<0.000000e+00> : vector<16x128xf32>
    %283 = tpu.matmul %269, %14, %cst_116 {dimension_numbers = #tpu.dot_dimension_numbers<[1], [0], [0], [1], [0, 0, 1, 1], [], []>} : vector<16x32xf32>, vector<32x128xf32>, vector<16x128xf32> -> vector<16x128xf32>
    %284 = arith.addf %282, %283 : vector<16x128xf32>
    %285 = arith.index_cast %c3_i32 : i32 to index
    %c0_117 = arith.constant 0 : index
    %c0_118 = arith.constant 0 : index
    %c0_119 = arith.constant 0 : index
    %286 = vector.load %arg2[%285, %c0_117, %c0_118, %c0_119] : memref<12x2x8x32xf32, #tpu.memory_space<vmem>>, vector<1x2x8x32xf32>
    %287 = vector.shape_cast %286 : vector<1x2x8x32xf32> to vector<2x8x32xf32>
    %288 = vector.shape_cast %287 : vector<2x8x32xf32> to vector<16x32xf32>
    %289 = arith.index_cast %274 : i32 to index
    %c0_120 = arith.constant 0 : index
    %c0_121 = arith.constant 0 : index
    %c0_122 = arith.constant 0 : index
    %290 = vector.load %arg2[%289, %c0_120, %c0_121, %c0_122] : memref<12x2x8x32xf32, #tpu.memory_space<vmem>>, vector<1x2x8x32xf32>
    %291 = vector.shape_cast %290 : vector<1x2x8x32xf32> to vector<2x8x32xf32>
    %292 = vector.shape_cast %291 : vector<2x8x32xf32> to vector<16x32xf32>
    %293 = vector.extract_strided_slice %279 {offsets = [0, 0], sizes = [16, 32], strides = [1, 1]} : vector<16x128xf32> to vector<16x32xf32>
    %cst_123 = arith.constant 5.000000e-01 : f32
    %294 = vector.broadcast %cst_123 : f32 to vector<16x32xf32>
    %295 = arith.mulf %294, %293 : vector<16x32xf32>
    %296 = math.tanh %295 : vector<16x32xf32>
    %cst_124 = arith.constant 5.000000e-01 : f32
    %297 = vector.broadcast %cst_124 : f32 to vector<16x32xf32>
    %298 = arith.mulf %297, %296 : vector<16x32xf32>
    %cst_125 = arith.constant 5.000000e-01 : f32
    %299 = vector.broadcast %cst_125 : f32 to vector<16x32xf32>
    %300 = arith.addf %298, %299 : vector<16x32xf32>
    %301 = vector.extract_strided_slice %279 {offsets = [0, 32], sizes = [16, 32], strides = [1, 1]} : vector<16x128xf32> to vector<16x32xf32>
    %cst_126 = arith.constant 5.000000e-01 : f32
    %302 = vector.broadcast %cst_126 : f32 to vector<16x32xf32>
    %303 = arith.mulf %302, %301 : vector<16x32xf32>
    %304 = math.tanh %303 : vector<16x32xf32>
    %cst_127 = arith.constant 5.000000e-01 : f32
    %305 = vector.broadcast %cst_127 : f32 to vector<16x32xf32>
    %306 = arith.mulf %305, %304 : vector<16x32xf32>
    %cst_128 = arith.constant 5.000000e-01 : f32
    %307 = vector.broadcast %cst_128 : f32 to vector<16x32xf32>
    %308 = arith.addf %306, %307 : vector<16x32xf32>
    %309 = vector.extract_strided_slice %279 {offsets = [0, 64], sizes = [16, 32], strides = [1, 1]} : vector<16x128xf32> to vector<16x32xf32>
    %310 = math.tanh %309 : vector<16x32xf32>
    %311 = vector.extract_strided_slice %279 {offsets = [0, 96], sizes = [16, 32], strides = [1, 1]} : vector<16x128xf32> to vector<16x32xf32>
    %cst_129 = arith.constant 5.000000e-01 : f32
    %312 = vector.broadcast %cst_129 : f32 to vector<16x32xf32>
    %313 = arith.mulf %312, %311 : vector<16x32xf32>
    %314 = math.tanh %313 : vector<16x32xf32>
    %cst_130 = arith.constant 5.000000e-01 : f32
    %315 = vector.broadcast %cst_130 : f32 to vector<16x32xf32>
    %316 = arith.mulf %315, %314 : vector<16x32xf32>
    %cst_131 = arith.constant 5.000000e-01 : f32
    %317 = vector.broadcast %cst_131 : f32 to vector<16x32xf32>
    %318 = arith.addf %316, %317 : vector<16x32xf32>
    %319 = arith.mulf %308, %235 : vector<16x32xf32>
    %320 = arith.mulf %300, %310 : vector<16x32xf32>
    %321 = arith.addf %319, %320 : vector<16x32xf32>
    %322 = math.tanh %321 : vector<16x32xf32>
    %323 = arith.mulf %318, %322 : vector<16x32xf32>
    %324 = vector.extract_strided_slice %284 {offsets = [0, 0], sizes = [16, 32], strides = [1, 1]} : vector<16x128xf32> to vector<16x32xf32>
    %cst_132 = arith.constant 5.000000e-01 : f32
    %325 = vector.broadcast %cst_132 : f32 to vector<16x32xf32>
    %326 = arith.mulf %325, %324 : vector<16x32xf32>
    %327 = math.tanh %326 : vector<16x32xf32>
    %cst_133 = arith.constant 5.000000e-01 : f32
    %328 = vector.broadcast %cst_133 : f32 to vector<16x32xf32>
    %329 = arith.mulf %328, %327 : vector<16x32xf32>
    %cst_134 = arith.constant 5.000000e-01 : f32
    %330 = vector.broadcast %cst_134 : f32 to vector<16x32xf32>
    %331 = arith.addf %329, %330 : vector<16x32xf32>
    %332 = vector.extract_strided_slice %284 {offsets = [0, 32], sizes = [16, 32], strides = [1, 1]} : vector<16x128xf32> to vector<16x32xf32>
    %cst_135 = arith.constant 5.000000e-01 : f32
    %333 = vector.broadcast %cst_135 : f32 to vector<16x32xf32>
    %334 = arith.mulf %333, %332 : vector<16x32xf32>
    %335 = math.tanh %334 : vector<16x32xf32>
    %cst_136 = arith.constant 5.000000e-01 : f32
    %336 = vector.broadcast %cst_136 : f32 to vector<16x32xf32>
    %337 = arith.mulf %336, %335 : vector<16x32xf32>
    %cst_137 = arith.constant 5.000000e-01 : f32
    %338 = vector.broadcast %cst_137 : f32 to vector<16x32xf32>
    %339 = arith.addf %337, %338 : vector<16x32xf32>
    %340 = vector.extract_strided_slice %284 {offsets = [0, 64], sizes = [16, 32], strides = [1, 1]} : vector<16x128xf32> to vector<16x32xf32>
    %341 = math.tanh %340 : vector<16x32xf32>
    %342 = vector.extract_strided_slice %284 {offsets = [0, 96], sizes = [16, 32], strides = [1, 1]} : vector<16x128xf32> to vector<16x32xf32>
    %cst_138 = arith.constant 5.000000e-01 : f32
    %343 = vector.broadcast %cst_138 : f32 to vector<16x32xf32>
    %344 = arith.mulf %343, %342 : vector<16x32xf32>
    %345 = math.tanh %344 : vector<16x32xf32>
    %cst_139 = arith.constant 5.000000e-01 : f32
    %346 = vector.broadcast %cst_139 : f32 to vector<16x32xf32>
    %347 = arith.mulf %346, %345 : vector<16x32xf32>
    %cst_140 = arith.constant 5.000000e-01 : f32
    %348 = vector.broadcast %cst_140 : f32 to vector<16x32xf32>
    %349 = arith.addf %347, %348 : vector<16x32xf32>
    %350 = arith.mulf %339, %270 : vector<16x32xf32>
    %351 = arith.mulf %331, %341 : vector<16x32xf32>
    %352 = arith.addf %350, %351 : vector<16x32xf32>
    %353 = math.tanh %352 : vector<16x32xf32>
    %354 = arith.mulf %349, %353 : vector<16x32xf32>
    %355 = arith.mulf %292, %354 : vector<16x32xf32>
    %356 = arith.mulf %292, %352 : vector<16x32xf32>
    %357 = arith.mulf %288, %323 : vector<16x32xf32>
    %358 = arith.addf %272, %357 : vector<16x32xf32>
    %359 = arith.addf %273, %355 : vector<16x32xf32>
    %c4_i32 = arith.constant 4 : i32
    %c11_i32_141 = arith.constant 11 : i32
    %360 = arith.subi %c11_i32_141, %c4_i32 : i32
    %361 = arith.index_cast %c4_i32 : i32 to index
    %c0_142 = arith.constant 0 : index
    %c0_143 = arith.constant 0 : index
    %362 = vector.load %arg14[%361, %c0_142, %c0_143] : memref<12x16x128xf32, #tpu.memory_space<vmem>>, vector<1x16x128xf32>
    %363 = vector.shape_cast %362 : vector<1x16x128xf32> to vector<16x128xf32>
    %cst_144 = arith.constant dense<0.000000e+00> : vector<16x128xf32>
    %364 = tpu.matmul %323, %13, %cst_144 {dimension_numbers = #tpu.dot_dimension_numbers<[1], [0], [0], [1], [0, 0, 1, 1], [], []>} : vector<16x32xf32>, vector<32x128xf32>, vector<16x128xf32> -> vector<16x128xf32>
    %365 = arith.addf %363, %364 : vector<16x128xf32>
    %366 = arith.index_cast %360 : i32 to index
    %c0_145 = arith.constant 0 : index
    %c0_146 = arith.constant 0 : index
    %367 = vector.load %arg15[%366, %c0_145, %c0_146] : memref<12x16x128xf32, #tpu.memory_space<vmem>>, vector<1x16x128xf32>
    %368 = vector.shape_cast %367 : vector<1x16x128xf32> to vector<16x128xf32>
    %cst_147 = arith.constant dense<0.000000e+00> : vector<16x128xf32>
    %369 = tpu.matmul %355, %14, %cst_147 {dimension_numbers = #tpu.dot_dimension_numbers<[1], [0], [0], [1], [0, 0, 1, 1], [], []>} : vector<16x32xf32>, vector<32x128xf32>, vector<16x128xf32> -> vector<16x128xf32>
    %370 = arith.addf %368, %369 : vector<16x128xf32>
    %371 = arith.index_cast %c4_i32 : i32 to index
    %c0_148 = arith.constant 0 : index
    %c0_149 = arith.constant 0 : index
    %c0_150 = arith.constant 0 : index
    %372 = vector.load %arg2[%371, %c0_148, %c0_149, %c0_150] : memref<12x2x8x32xf32, #tpu.memory_space<vmem>>, vector<1x2x8x32xf32>
    %373 = vector.shape_cast %372 : vector<1x2x8x32xf32> to vector<2x8x32xf32>
    %374 = vector.shape_cast %373 : vector<2x8x32xf32> to vector<16x32xf32>
    %375 = arith.index_cast %360 : i32 to index
    %c0_151 = arith.constant 0 : index
    %c0_152 = arith.constant 0 : index
    %c0_153 = arith.constant 0 : index
    %376 = vector.load %arg2[%375, %c0_151, %c0_152, %c0_153] : memref<12x2x8x32xf32, #tpu.memory_space<vmem>>, vector<1x2x8x32xf32>
    %377 = vector.shape_cast %376 : vector<1x2x8x32xf32> to vector<2x8x32xf32>
    %378 = vector.shape_cast %377 : vector<2x8x32xf32> to vector<16x32xf32>
    %379 = vector.extract_strided_slice %365 {offsets = [0, 0], sizes = [16, 32], strides = [1, 1]} : vector<16x128xf32> to vector<16x32xf32>
    %cst_154 = arith.constant 5.000000e-01 : f32
    %380 = vector.broadcast %cst_154 : f32 to vector<16x32xf32>
    %381 = arith.mulf %380, %379 : vector<16x32xf32>
    %382 = math.tanh %381 : vector<16x32xf32>
    %cst_155 = arith.constant 5.000000e-01 : f32
    %383 = vector.broadcast %cst_155 : f32 to vector<16x32xf32>
    %384 = arith.mulf %383, %382 : vector<16x32xf32>
    %cst_156 = arith.constant 5.000000e-01 : f32
    %385 = vector.broadcast %cst_156 : f32 to vector<16x32xf32>
    %386 = arith.addf %384, %385 : vector<16x32xf32>
    %387 = vector.extract_strided_slice %365 {offsets = [0, 32], sizes = [16, 32], strides = [1, 1]} : vector<16x128xf32> to vector<16x32xf32>
    %cst_157 = arith.constant 5.000000e-01 : f32
    %388 = vector.broadcast %cst_157 : f32 to vector<16x32xf32>
    %389 = arith.mulf %388, %387 : vector<16x32xf32>
    %390 = math.tanh %389 : vector<16x32xf32>
    %cst_158 = arith.constant 5.000000e-01 : f32
    %391 = vector.broadcast %cst_158 : f32 to vector<16x32xf32>
    %392 = arith.mulf %391, %390 : vector<16x32xf32>
    %cst_159 = arith.constant 5.000000e-01 : f32
    %393 = vector.broadcast %cst_159 : f32 to vector<16x32xf32>
    %394 = arith.addf %392, %393 : vector<16x32xf32>
    %395 = vector.extract_strided_slice %365 {offsets = [0, 64], sizes = [16, 32], strides = [1, 1]} : vector<16x128xf32> to vector<16x32xf32>
    %396 = math.tanh %395 : vector<16x32xf32>
    %397 = vector.extract_strided_slice %365 {offsets = [0, 96], sizes = [16, 32], strides = [1, 1]} : vector<16x128xf32> to vector<16x32xf32>
    %cst_160 = arith.constant 5.000000e-01 : f32
    %398 = vector.broadcast %cst_160 : f32 to vector<16x32xf32>
    %399 = arith.mulf %398, %397 : vector<16x32xf32>
    %400 = math.tanh %399 : vector<16x32xf32>
    %cst_161 = arith.constant 5.000000e-01 : f32
    %401 = vector.broadcast %cst_161 : f32 to vector<16x32xf32>
    %402 = arith.mulf %401, %400 : vector<16x32xf32>
    %cst_162 = arith.constant 5.000000e-01 : f32
    %403 = vector.broadcast %cst_162 : f32 to vector<16x32xf32>
    %404 = arith.addf %402, %403 : vector<16x32xf32>
    %405 = arith.mulf %394, %321 : vector<16x32xf32>
    %406 = arith.mulf %386, %396 : vector<16x32xf32>
    %407 = arith.addf %405, %406 : vector<16x32xf32>
    %408 = math.tanh %407 : vector<16x32xf32>
    %409 = arith.mulf %404, %408 : vector<16x32xf32>
    %410 = vector.extract_strided_slice %370 {offsets = [0, 0], sizes = [16, 32], strides = [1, 1]} : vector<16x128xf32> to vector<16x32xf32>
    %cst_163 = arith.constant 5.000000e-01 : f32
    %411 = vector.broadcast %cst_163 : f32 to vector<16x32xf32>
    %412 = arith.mulf %411, %410 : vector<16x32xf32>
    %413 = math.tanh %412 : vector<16x32xf32>
    %cst_164 = arith.constant 5.000000e-01 : f32
    %414 = vector.broadcast %cst_164 : f32 to vector<16x32xf32>
    %415 = arith.mulf %414, %413 : vector<16x32xf32>
    %cst_165 = arith.constant 5.000000e-01 : f32
    %416 = vector.broadcast %cst_165 : f32 to vector<16x32xf32>
    %417 = arith.addf %415, %416 : vector<16x32xf32>
    %418 = vector.extract_strided_slice %370 {offsets = [0, 32], sizes = [16, 32], strides = [1, 1]} : vector<16x128xf32> to vector<16x32xf32>
    %cst_166 = arith.constant 5.000000e-01 : f32
    %419 = vector.broadcast %cst_166 : f32 to vector<16x32xf32>
    %420 = arith.mulf %419, %418 : vector<16x32xf32>
    %421 = math.tanh %420 : vector<16x32xf32>
    %cst_167 = arith.constant 5.000000e-01 : f32
    %422 = vector.broadcast %cst_167 : f32 to vector<16x32xf32>
    %423 = arith.mulf %422, %421 : vector<16x32xf32>
    %cst_168 = arith.constant 5.000000e-01 : f32
    %424 = vector.broadcast %cst_168 : f32 to vector<16x32xf32>
    %425 = arith.addf %423, %424 : vector<16x32xf32>
    %426 = vector.extract_strided_slice %370 {offsets = [0, 64], sizes = [16, 32], strides = [1, 1]} : vector<16x128xf32> to vector<16x32xf32>
    %427 = math.tanh %426 : vector<16x32xf32>
    %428 = vector.extract_strided_slice %370 {offsets = [0, 96], sizes = [16, 32], strides = [1, 1]} : vector<16x128xf32> to vector<16x32xf32>
    %cst_169 = arith.constant 5.000000e-01 : f32
    %429 = vector.broadcast %cst_169 : f32 to vector<16x32xf32>
    %430 = arith.mulf %429, %428 : vector<16x32xf32>
    %431 = math.tanh %430 : vector<16x32xf32>
    %cst_170 = arith.constant 5.000000e-01 : f32
    %432 = vector.broadcast %cst_170 : f32 to vector<16x32xf32>
    %433 = arith.mulf %432, %431 : vector<16x32xf32>
    %cst_171 = arith.constant 5.000000e-01 : f32
    %434 = vector.broadcast %cst_171 : f32 to vector<16x32xf32>
    %435 = arith.addf %433, %434 : vector<16x32xf32>
    %436 = arith.mulf %425, %356 : vector<16x32xf32>
    %437 = arith.mulf %417, %427 : vector<16x32xf32>
    %438 = arith.addf %436, %437 : vector<16x32xf32>
    %439 = math.tanh %438 : vector<16x32xf32>
    %440 = arith.mulf %435, %439 : vector<16x32xf32>
    %441 = arith.mulf %378, %440 : vector<16x32xf32>
    %442 = arith.mulf %378, %438 : vector<16x32xf32>
    %443 = arith.mulf %374, %409 : vector<16x32xf32>
    %444 = arith.addf %358, %443 : vector<16x32xf32>
    %445 = arith.addf %359, %441 : vector<16x32xf32>
    %c5_i32 = arith.constant 5 : i32
    %c11_i32_172 = arith.constant 11 : i32
    %446 = arith.subi %c11_i32_172, %c5_i32 : i32
    %447 = arith.index_cast %c5_i32 : i32 to index
    %c0_173 = arith.constant 0 : index
    %c0_174 = arith.constant 0 : index
    %448 = vector.load %arg14[%447, %c0_173, %c0_174] : memref<12x16x128xf32, #tpu.memory_space<vmem>>, vector<1x16x128xf32>
    %449 = vector.shape_cast %448 : vector<1x16x128xf32> to vector<16x128xf32>
    %cst_175 = arith.constant dense<0.000000e+00> : vector<16x128xf32>
    %450 = tpu.matmul %409, %13, %cst_175 {dimension_numbers = #tpu.dot_dimension_numbers<[1], [0], [0], [1], [0, 0, 1, 1], [], []>} : vector<16x32xf32>, vector<32x128xf32>, vector<16x128xf32> -> vector<16x128xf32>
    %451 = arith.addf %449, %450 : vector<16x128xf32>
    %452 = arith.index_cast %446 : i32 to index
    %c0_176 = arith.constant 0 : index
    %c0_177 = arith.constant 0 : index
    %453 = vector.load %arg15[%452, %c0_176, %c0_177] : memref<12x16x128xf32, #tpu.memory_space<vmem>>, vector<1x16x128xf32>
    %454 = vector.shape_cast %453 : vector<1x16x128xf32> to vector<16x128xf32>
    %cst_178 = arith.constant dense<0.000000e+00> : vector<16x128xf32>
    %455 = tpu.matmul %441, %14, %cst_178 {dimension_numbers = #tpu.dot_dimension_numbers<[1], [0], [0], [1], [0, 0, 1, 1], [], []>} : vector<16x32xf32>, vector<32x128xf32>, vector<16x128xf32> -> vector<16x128xf32>
    %456 = arith.addf %454, %455 : vector<16x128xf32>
    %457 = arith.index_cast %c5_i32 : i32 to index
    %c0_179 = arith.constant 0 : index
    %c0_180 = arith.constant 0 : index
    %c0_181 = arith.constant 0 : index
    %458 = vector.load %arg2[%457, %c0_179, %c0_180, %c0_181] : memref<12x2x8x32xf32, #tpu.memory_space<vmem>>, vector<1x2x8x32xf32>
    %459 = vector.shape_cast %458 : vector<1x2x8x32xf32> to vector<2x8x32xf32>
    %460 = vector.shape_cast %459 : vector<2x8x32xf32> to vector<16x32xf32>
    %461 = arith.index_cast %446 : i32 to index
    %c0_182 = arith.constant 0 : index
    %c0_183 = arith.constant 0 : index
    %c0_184 = arith.constant 0 : index
    %462 = vector.load %arg2[%461, %c0_182, %c0_183, %c0_184] : memref<12x2x8x32xf32, #tpu.memory_space<vmem>>, vector<1x2x8x32xf32>
    %463 = vector.shape_cast %462 : vector<1x2x8x32xf32> to vector<2x8x32xf32>
    %464 = vector.shape_cast %463 : vector<2x8x32xf32> to vector<16x32xf32>
    %465 = vector.extract_strided_slice %451 {offsets = [0, 0], sizes = [16, 32], strides = [1, 1]} : vector<16x128xf32> to vector<16x32xf32>
    %cst_185 = arith.constant 5.000000e-01 : f32
    %466 = vector.broadcast %cst_185 : f32 to vector<16x32xf32>
    %467 = arith.mulf %466, %465 : vector<16x32xf32>
    %468 = math.tanh %467 : vector<16x32xf32>
    %cst_186 = arith.constant 5.000000e-01 : f32
    %469 = vector.broadcast %cst_186 : f32 to vector<16x32xf32>
    %470 = arith.mulf %469, %468 : vector<16x32xf32>
    %cst_187 = arith.constant 5.000000e-01 : f32
    %471 = vector.broadcast %cst_187 : f32 to vector<16x32xf32>
    %472 = arith.addf %470, %471 : vector<16x32xf32>
    %473 = vector.extract_strided_slice %451 {offsets = [0, 32], sizes = [16, 32], strides = [1, 1]} : vector<16x128xf32> to vector<16x32xf32>
    %cst_188 = arith.constant 5.000000e-01 : f32
    %474 = vector.broadcast %cst_188 : f32 to vector<16x32xf32>
    %475 = arith.mulf %474, %473 : vector<16x32xf32>
    %476 = math.tanh %475 : vector<16x32xf32>
    %cst_189 = arith.constant 5.000000e-01 : f32
    %477 = vector.broadcast %cst_189 : f32 to vector<16x32xf32>
    %478 = arith.mulf %477, %476 : vector<16x32xf32>
    %cst_190 = arith.constant 5.000000e-01 : f32
    %479 = vector.broadcast %cst_190 : f32 to vector<16x32xf32>
    %480 = arith.addf %478, %479 : vector<16x32xf32>
    %481 = vector.extract_strided_slice %451 {offsets = [0, 64], sizes = [16, 32], strides = [1, 1]} : vector<16x128xf32> to vector<16x32xf32>
    %482 = math.tanh %481 : vector<16x32xf32>
    %483 = vector.extract_strided_slice %451 {offsets = [0, 96], sizes = [16, 32], strides = [1, 1]} : vector<16x128xf32> to vector<16x32xf32>
    %cst_191 = arith.constant 5.000000e-01 : f32
    %484 = vector.broadcast %cst_191 : f32 to vector<16x32xf32>
    %485 = arith.mulf %484, %483 : vector<16x32xf32>
    %486 = math.tanh %485 : vector<16x32xf32>
    %cst_192 = arith.constant 5.000000e-01 : f32
    %487 = vector.broadcast %cst_192 : f32 to vector<16x32xf32>
    %488 = arith.mulf %487, %486 : vector<16x32xf32>
    %cst_193 = arith.constant 5.000000e-01 : f32
    %489 = vector.broadcast %cst_193 : f32 to vector<16x32xf32>
    %490 = arith.addf %488, %489 : vector<16x32xf32>
    %491 = arith.mulf %480, %407 : vector<16x32xf32>
    %492 = arith.mulf %472, %482 : vector<16x32xf32>
    %493 = arith.addf %491, %492 : vector<16x32xf32>
    %494 = math.tanh %493 : vector<16x32xf32>
    %495 = arith.mulf %490, %494 : vector<16x32xf32>
    %496 = vector.extract_strided_slice %456 {offsets = [0, 0], sizes = [16, 32], strides = [1, 1]} : vector<16x128xf32> to vector<16x32xf32>
    %cst_194 = arith.constant 5.000000e-01 : f32
    %497 = vector.broadcast %cst_194 : f32 to vector<16x32xf32>
    %498 = arith.mulf %497, %496 : vector<16x32xf32>
    %499 = math.tanh %498 : vector<16x32xf32>
    %cst_195 = arith.constant 5.000000e-01 : f32
    %500 = vector.broadcast %cst_195 : f32 to vector<16x32xf32>
    %501 = arith.mulf %500, %499 : vector<16x32xf32>
    %cst_196 = arith.constant 5.000000e-01 : f32
    %502 = vector.broadcast %cst_196 : f32 to vector<16x32xf32>
    %503 = arith.addf %501, %502 : vector<16x32xf32>
    %504 = vector.extract_strided_slice %456 {offsets = [0, 32], sizes = [16, 32], strides = [1, 1]} : vector<16x128xf32> to vector<16x32xf32>
    %cst_197 = arith.constant 5.000000e-01 : f32
    %505 = vector.broadcast %cst_197 : f32 to vector<16x32xf32>
    %506 = arith.mulf %505, %504 : vector<16x32xf32>
    %507 = math.tanh %506 : vector<16x32xf32>
    %cst_198 = arith.constant 5.000000e-01 : f32
    %508 = vector.broadcast %cst_198 : f32 to vector<16x32xf32>
    %509 = arith.mulf %508, %507 : vector<16x32xf32>
    %cst_199 = arith.constant 5.000000e-01 : f32
    %510 = vector.broadcast %cst_199 : f32 to vector<16x32xf32>
    %511 = arith.addf %509, %510 : vector<16x32xf32>
    %512 = vector.extract_strided_slice %456 {offsets = [0, 64], sizes = [16, 32], strides = [1, 1]} : vector<16x128xf32> to vector<16x32xf32>
    %513 = math.tanh %512 : vector<16x32xf32>
    %514 = vector.extract_strided_slice %456 {offsets = [0, 96], sizes = [16, 32], strides = [1, 1]} : vector<16x128xf32> to vector<16x32xf32>
    %cst_200 = arith.constant 5.000000e-01 : f32
    %515 = vector.broadcast %cst_200 : f32 to vector<16x32xf32>
    %516 = arith.mulf %515, %514 : vector<16x32xf32>
    %517 = math.tanh %516 : vector<16x32xf32>
    %cst_201 = arith.constant 5.000000e-01 : f32
    %518 = vector.broadcast %cst_201 : f32 to vector<16x32xf32>
    %519 = arith.mulf %518, %517 : vector<16x32xf32>
    %cst_202 = arith.constant 5.000000e-01 : f32
    %520 = vector.broadcast %cst_202 : f32 to vector<16x32xf32>
    %521 = arith.addf %519, %520 : vector<16x32xf32>
    %522 = arith.mulf %511, %442 : vector<16x32xf32>
    %523 = arith.mulf %503, %513 : vector<16x32xf32>
    %524 = arith.addf %522, %523 : vector<16x32xf32>
    %525 = math.tanh %524 : vector<16x32xf32>
    %526 = arith.mulf %521, %525 : vector<16x32xf32>
    %527 = arith.mulf %464, %526 : vector<16x32xf32>
    %528 = arith.mulf %464, %524 : vector<16x32xf32>
    %529 = arith.mulf %460, %495 : vector<16x32xf32>
    %530 = arith.addf %444, %529 : vector<16x32xf32>
    %531 = arith.addf %445, %527 : vector<16x32xf32>
    %c6_i32 = arith.constant 6 : i32
    %c11_i32_203 = arith.constant 11 : i32
    %532 = arith.subi %c11_i32_203, %c6_i32 : i32
    %533 = arith.index_cast %c6_i32 : i32 to index
    %c0_204 = arith.constant 0 : index
    %c0_205 = arith.constant 0 : index
    %534 = vector.load %arg14[%533, %c0_204, %c0_205] : memref<12x16x128xf32, #tpu.memory_space<vmem>>, vector<1x16x128xf32>
    %535 = vector.shape_cast %534 : vector<1x16x128xf32> to vector<16x128xf32>
    %cst_206 = arith.constant dense<0.000000e+00> : vector<16x128xf32>
    %536 = tpu.matmul %495, %13, %cst_206 {dimension_numbers = #tpu.dot_dimension_numbers<[1], [0], [0], [1], [0, 0, 1, 1], [], []>} : vector<16x32xf32>, vector<32x128xf32>, vector<16x128xf32> -> vector<16x128xf32>
    %537 = arith.addf %535, %536 : vector<16x128xf32>
    %538 = arith.index_cast %532 : i32 to index
    %c0_207 = arith.constant 0 : index
    %c0_208 = arith.constant 0 : index
    %539 = vector.load %arg15[%538, %c0_207, %c0_208] : memref<12x16x128xf32, #tpu.memory_space<vmem>>, vector<1x16x128xf32>
    %540 = vector.shape_cast %539 : vector<1x16x128xf32> to vector<16x128xf32>
    %cst_209 = arith.constant dense<0.000000e+00> : vector<16x128xf32>
    %541 = tpu.matmul %527, %14, %cst_209 {dimension_numbers = #tpu.dot_dimension_numbers<[1], [0], [0], [1], [0, 0, 1, 1], [], []>} : vector<16x32xf32>, vector<32x128xf32>, vector<16x128xf32> -> vector<16x128xf32>
    %542 = arith.addf %540, %541 : vector<16x128xf32>
    %543 = arith.index_cast %c6_i32 : i32 to index
    %c0_210 = arith.constant 0 : index
    %c0_211 = arith.constant 0 : index
    %c0_212 = arith.constant 0 : index
    %544 = vector.load %arg2[%543, %c0_210, %c0_211, %c0_212] : memref<12x2x8x32xf32, #tpu.memory_space<vmem>>, vector<1x2x8x32xf32>
    %545 = vector.shape_cast %544 : vector<1x2x8x32xf32> to vector<2x8x32xf32>
    %546 = vector.shape_cast %545 : vector<2x8x32xf32> to vector<16x32xf32>
    %547 = arith.index_cast %532 : i32 to index
    %c0_213 = arith.constant 0 : index
    %c0_214 = arith.constant 0 : index
    %c0_215 = arith.constant 0 : index
    %548 = vector.load %arg2[%547, %c0_213, %c0_214, %c0_215] : memref<12x2x8x32xf32, #tpu.memory_space<vmem>>, vector<1x2x8x32xf32>
    %549 = vector.shape_cast %548 : vector<1x2x8x32xf32> to vector<2x8x32xf32>
    %550 = vector.shape_cast %549 : vector<2x8x32xf32> to vector<16x32xf32>
    %551 = vector.extract_strided_slice %537 {offsets = [0, 0], sizes = [16, 32], strides = [1, 1]} : vector<16x128xf32> to vector<16x32xf32>
    %cst_216 = arith.constant 5.000000e-01 : f32
    %552 = vector.broadcast %cst_216 : f32 to vector<16x32xf32>
    %553 = arith.mulf %552, %551 : vector<16x32xf32>
    %554 = math.tanh %553 : vector<16x32xf32>
    %cst_217 = arith.constant 5.000000e-01 : f32
    %555 = vector.broadcast %cst_217 : f32 to vector<16x32xf32>
    %556 = arith.mulf %555, %554 : vector<16x32xf32>
    %cst_218 = arith.constant 5.000000e-01 : f32
    %557 = vector.broadcast %cst_218 : f32 to vector<16x32xf32>
    %558 = arith.addf %556, %557 : vector<16x32xf32>
    %559 = vector.extract_strided_slice %537 {offsets = [0, 32], sizes = [16, 32], strides = [1, 1]} : vector<16x128xf32> to vector<16x32xf32>
    %cst_219 = arith.constant 5.000000e-01 : f32
    %560 = vector.broadcast %cst_219 : f32 to vector<16x32xf32>
    %561 = arith.mulf %560, %559 : vector<16x32xf32>
    %562 = math.tanh %561 : vector<16x32xf32>
    %cst_220 = arith.constant 5.000000e-01 : f32
    %563 = vector.broadcast %cst_220 : f32 to vector<16x32xf32>
    %564 = arith.mulf %563, %562 : vector<16x32xf32>
    %cst_221 = arith.constant 5.000000e-01 : f32
    %565 = vector.broadcast %cst_221 : f32 to vector<16x32xf32>
    %566 = arith.addf %564, %565 : vector<16x32xf32>
    %567 = vector.extract_strided_slice %537 {offsets = [0, 64], sizes = [16, 32], strides = [1, 1]} : vector<16x128xf32> to vector<16x32xf32>
    %568 = math.tanh %567 : vector<16x32xf32>
    %569 = vector.extract_strided_slice %537 {offsets = [0, 96], sizes = [16, 32], strides = [1, 1]} : vector<16x128xf32> to vector<16x32xf32>
    %cst_222 = arith.constant 5.000000e-01 : f32
    %570 = vector.broadcast %cst_222 : f32 to vector<16x32xf32>
    %571 = arith.mulf %570, %569 : vector<16x32xf32>
    %572 = math.tanh %571 : vector<16x32xf32>
    %cst_223 = arith.constant 5.000000e-01 : f32
    %573 = vector.broadcast %cst_223 : f32 to vector<16x32xf32>
    %574 = arith.mulf %573, %572 : vector<16x32xf32>
    %cst_224 = arith.constant 5.000000e-01 : f32
    %575 = vector.broadcast %cst_224 : f32 to vector<16x32xf32>
    %576 = arith.addf %574, %575 : vector<16x32xf32>
    %577 = arith.mulf %566, %493 : vector<16x32xf32>
    %578 = arith.mulf %558, %568 : vector<16x32xf32>
    %579 = arith.addf %577, %578 : vector<16x32xf32>
    %580 = math.tanh %579 : vector<16x32xf32>
    %581 = arith.mulf %576, %580 : vector<16x32xf32>
    %582 = vector.extract_strided_slice %542 {offsets = [0, 0], sizes = [16, 32], strides = [1, 1]} : vector<16x128xf32> to vector<16x32xf32>
    %cst_225 = arith.constant 5.000000e-01 : f32
    %583 = vector.broadcast %cst_225 : f32 to vector<16x32xf32>
    %584 = arith.mulf %583, %582 : vector<16x32xf32>
    %585 = math.tanh %584 : vector<16x32xf32>
    %cst_226 = arith.constant 5.000000e-01 : f32
    %586 = vector.broadcast %cst_226 : f32 to vector<16x32xf32>
    %587 = arith.mulf %586, %585 : vector<16x32xf32>
    %cst_227 = arith.constant 5.000000e-01 : f32
    %588 = vector.broadcast %cst_227 : f32 to vector<16x32xf32>
    %589 = arith.addf %587, %588 : vector<16x32xf32>
    %590 = vector.extract_strided_slice %542 {offsets = [0, 32], sizes = [16, 32], strides = [1, 1]} : vector<16x128xf32> to vector<16x32xf32>
    %cst_228 = arith.constant 5.000000e-01 : f32
    %591 = vector.broadcast %cst_228 : f32 to vector<16x32xf32>
    %592 = arith.mulf %591, %590 : vector<16x32xf32>
    %593 = math.tanh %592 : vector<16x32xf32>
    %cst_229 = arith.constant 5.000000e-01 : f32
    %594 = vector.broadcast %cst_229 : f32 to vector<16x32xf32>
    %595 = arith.mulf %594, %593 : vector<16x32xf32>
    %cst_230 = arith.constant 5.000000e-01 : f32
    %596 = vector.broadcast %cst_230 : f32 to vector<16x32xf32>
    %597 = arith.addf %595, %596 : vector<16x32xf32>
    %598 = vector.extract_strided_slice %542 {offsets = [0, 64], sizes = [16, 32], strides = [1, 1]} : vector<16x128xf32> to vector<16x32xf32>
    %599 = math.tanh %598 : vector<16x32xf32>
    %600 = vector.extract_strided_slice %542 {offsets = [0, 96], sizes = [16, 32], strides = [1, 1]} : vector<16x128xf32> to vector<16x32xf32>
    %cst_231 = arith.constant 5.000000e-01 : f32
    %601 = vector.broadcast %cst_231 : f32 to vector<16x32xf32>
    %602 = arith.mulf %601, %600 : vector<16x32xf32>
    %603 = math.tanh %602 : vector<16x32xf32>
    %cst_232 = arith.constant 5.000000e-01 : f32
    %604 = vector.broadcast %cst_232 : f32 to vector<16x32xf32>
    %605 = arith.mulf %604, %603 : vector<16x32xf32>
    %cst_233 = arith.constant 5.000000e-01 : f32
    %606 = vector.broadcast %cst_233 : f32 to vector<16x32xf32>
    %607 = arith.addf %605, %606 : vector<16x32xf32>
    %608 = arith.mulf %597, %528 : vector<16x32xf32>
    %609 = arith.mulf %589, %599 : vector<16x32xf32>
    %610 = arith.addf %608, %609 : vector<16x32xf32>
    %611 = math.tanh %610 : vector<16x32xf32>
    %612 = arith.mulf %607, %611 : vector<16x32xf32>
    %613 = arith.mulf %550, %612 : vector<16x32xf32>
    %614 = arith.mulf %550, %610 : vector<16x32xf32>
    %615 = arith.mulf %546, %581 : vector<16x32xf32>
    %616 = arith.addf %530, %615 : vector<16x32xf32>
    %617 = arith.addf %531, %613 : vector<16x32xf32>
    %c7_i32 = arith.constant 7 : i32
    %c11_i32_234 = arith.constant 11 : i32
    %618 = arith.subi %c11_i32_234, %c7_i32 : i32
    %619 = arith.index_cast %c7_i32 : i32 to index
    %c0_235 = arith.constant 0 : index
    %c0_236 = arith.constant 0 : index
    %620 = vector.load %arg14[%619, %c0_235, %c0_236] : memref<12x16x128xf32, #tpu.memory_space<vmem>>, vector<1x16x128xf32>
    %621 = vector.shape_cast %620 : vector<1x16x128xf32> to vector<16x128xf32>
    %cst_237 = arith.constant dense<0.000000e+00> : vector<16x128xf32>
    %622 = tpu.matmul %581, %13, %cst_237 {dimension_numbers = #tpu.dot_dimension_numbers<[1], [0], [0], [1], [0, 0, 1, 1], [], []>} : vector<16x32xf32>, vector<32x128xf32>, vector<16x128xf32> -> vector<16x128xf32>
    %623 = arith.addf %621, %622 : vector<16x128xf32>
    %624 = arith.index_cast %618 : i32 to index
    %c0_238 = arith.constant 0 : index
    %c0_239 = arith.constant 0 : index
    %625 = vector.load %arg15[%624, %c0_238, %c0_239] : memref<12x16x128xf32, #tpu.memory_space<vmem>>, vector<1x16x128xf32>
    %626 = vector.shape_cast %625 : vector<1x16x128xf32> to vector<16x128xf32>
    %cst_240 = arith.constant dense<0.000000e+00> : vector<16x128xf32>
    %627 = tpu.matmul %613, %14, %cst_240 {dimension_numbers = #tpu.dot_dimension_numbers<[1], [0], [0], [1], [0, 0, 1, 1], [], []>} : vector<16x32xf32>, vector<32x128xf32>, vector<16x128xf32> -> vector<16x128xf32>
    %628 = arith.addf %626, %627 : vector<16x128xf32>
    %629 = arith.index_cast %c7_i32 : i32 to index
    %c0_241 = arith.constant 0 : index
    %c0_242 = arith.constant 0 : index
    %c0_243 = arith.constant 0 : index
    %630 = vector.load %arg2[%629, %c0_241, %c0_242, %c0_243] : memref<12x2x8x32xf32, #tpu.memory_space<vmem>>, vector<1x2x8x32xf32>
    %631 = vector.shape_cast %630 : vector<1x2x8x32xf32> to vector<2x8x32xf32>
    %632 = vector.shape_cast %631 : vector<2x8x32xf32> to vector<16x32xf32>
    %633 = arith.index_cast %618 : i32 to index
    %c0_244 = arith.constant 0 : index
    %c0_245 = arith.constant 0 : index
    %c0_246 = arith.constant 0 : index
    %634 = vector.load %arg2[%633, %c0_244, %c0_245, %c0_246] : memref<12x2x8x32xf32, #tpu.memory_space<vmem>>, vector<1x2x8x32xf32>
    %635 = vector.shape_cast %634 : vector<1x2x8x32xf32> to vector<2x8x32xf32>
    %636 = vector.shape_cast %635 : vector<2x8x32xf32> to vector<16x32xf32>
    %637 = vector.extract_strided_slice %623 {offsets = [0, 0], sizes = [16, 32], strides = [1, 1]} : vector<16x128xf32> to vector<16x32xf32>
    %cst_247 = arith.constant 5.000000e-01 : f32
    %638 = vector.broadcast %cst_247 : f32 to vector<16x32xf32>
    %639 = arith.mulf %638, %637 : vector<16x32xf32>
    %640 = math.tanh %639 : vector<16x32xf32>
    %cst_248 = arith.constant 5.000000e-01 : f32
    %641 = vector.broadcast %cst_248 : f32 to vector<16x32xf32>
    %642 = arith.mulf %641, %640 : vector<16x32xf32>
    %cst_249 = arith.constant 5.000000e-01 : f32
    %643 = vector.broadcast %cst_249 : f32 to vector<16x32xf32>
    %644 = arith.addf %642, %643 : vector<16x32xf32>
    %645 = vector.extract_strided_slice %623 {offsets = [0, 32], sizes = [16, 32], strides = [1, 1]} : vector<16x128xf32> to vector<16x32xf32>
    %cst_250 = arith.constant 5.000000e-01 : f32
    %646 = vector.broadcast %cst_250 : f32 to vector<16x32xf32>
    %647 = arith.mulf %646, %645 : vector<16x32xf32>
    %648 = math.tanh %647 : vector<16x32xf32>
    %cst_251 = arith.constant 5.000000e-01 : f32
    %649 = vector.broadcast %cst_251 : f32 to vector<16x32xf32>
    %650 = arith.mulf %649, %648 : vector<16x32xf32>
    %cst_252 = arith.constant 5.000000e-01 : f32
    %651 = vector.broadcast %cst_252 : f32 to vector<16x32xf32>
    %652 = arith.addf %650, %651 : vector<16x32xf32>
    %653 = vector.extract_strided_slice %623 {offsets = [0, 64], sizes = [16, 32], strides = [1, 1]} : vector<16x128xf32> to vector<16x32xf32>
    %654 = math.tanh %653 : vector<16x32xf32>
    %655 = vector.extract_strided_slice %623 {offsets = [0, 96], sizes = [16, 32], strides = [1, 1]} : vector<16x128xf32> to vector<16x32xf32>
    %cst_253 = arith.constant 5.000000e-01 : f32
    %656 = vector.broadcast %cst_253 : f32 to vector<16x32xf32>
    %657 = arith.mulf %656, %655 : vector<16x32xf32>
    %658 = math.tanh %657 : vector<16x32xf32>
    %cst_254 = arith.constant 5.000000e-01 : f32
    %659 = vector.broadcast %cst_254 : f32 to vector<16x32xf32>
    %660 = arith.mulf %659, %658 : vector<16x32xf32>
    %cst_255 = arith.constant 5.000000e-01 : f32
    %661 = vector.broadcast %cst_255 : f32 to vector<16x32xf32>
    %662 = arith.addf %660, %661 : vector<16x32xf32>
    %663 = arith.mulf %652, %579 : vector<16x32xf32>
    %664 = arith.mulf %644, %654 : vector<16x32xf32>
    %665 = arith.addf %663, %664 : vector<16x32xf32>
    %666 = math.tanh %665 : vector<16x32xf32>
    %667 = arith.mulf %662, %666 : vector<16x32xf32>
    %668 = vector.extract_strided_slice %628 {offsets = [0, 0], sizes = [16, 32], strides = [1, 1]} : vector<16x128xf32> to vector<16x32xf32>
    %cst_256 = arith.constant 5.000000e-01 : f32
    %669 = vector.broadcast %cst_256 : f32 to vector<16x32xf32>
    %670 = arith.mulf %669, %668 : vector<16x32xf32>
    %671 = math.tanh %670 : vector<16x32xf32>
    %cst_257 = arith.constant 5.000000e-01 : f32
    %672 = vector.broadcast %cst_257 : f32 to vector<16x32xf32>
    %673 = arith.mulf %672, %671 : vector<16x32xf32>
    %cst_258 = arith.constant 5.000000e-01 : f32
    %674 = vector.broadcast %cst_258 : f32 to vector<16x32xf32>
    %675 = arith.addf %673, %674 : vector<16x32xf32>
    %676 = vector.extract_strided_slice %628 {offsets = [0, 32], sizes = [16, 32], strides = [1, 1]} : vector<16x128xf32> to vector<16x32xf32>
    %cst_259 = arith.constant 5.000000e-01 : f32
    %677 = vector.broadcast %cst_259 : f32 to vector<16x32xf32>
    %678 = arith.mulf %677, %676 : vector<16x32xf32>
    %679 = math.tanh %678 : vector<16x32xf32>
    %cst_260 = arith.constant 5.000000e-01 : f32
    %680 = vector.broadcast %cst_260 : f32 to vector<16x32xf32>
    %681 = arith.mulf %680, %679 : vector<16x32xf32>
    %cst_261 = arith.constant 5.000000e-01 : f32
    %682 = vector.broadcast %cst_261 : f32 to vector<16x32xf32>
    %683 = arith.addf %681, %682 : vector<16x32xf32>
    %684 = vector.extract_strided_slice %628 {offsets = [0, 64], sizes = [16, 32], strides = [1, 1]} : vector<16x128xf32> to vector<16x32xf32>
    %685 = math.tanh %684 : vector<16x32xf32>
    %686 = vector.extract_strided_slice %628 {offsets = [0, 96], sizes = [16, 32], strides = [1, 1]} : vector<16x128xf32> to vector<16x32xf32>
    %cst_262 = arith.constant 5.000000e-01 : f32
    %687 = vector.broadcast %cst_262 : f32 to vector<16x32xf32>
    %688 = arith.mulf %687, %686 : vector<16x32xf32>
    %689 = math.tanh %688 : vector<16x32xf32>
    %cst_263 = arith.constant 5.000000e-01 : f32
    %690 = vector.broadcast %cst_263 : f32 to vector<16x32xf32>
    %691 = arith.mulf %690, %689 : vector<16x32xf32>
    %cst_264 = arith.constant 5.000000e-01 : f32
    %692 = vector.broadcast %cst_264 : f32 to vector<16x32xf32>
    %693 = arith.addf %691, %692 : vector<16x32xf32>
    %694 = arith.mulf %683, %614 : vector<16x32xf32>
    %695 = arith.mulf %675, %685 : vector<16x32xf32>
    %696 = arith.addf %694, %695 : vector<16x32xf32>
    %697 = math.tanh %696 : vector<16x32xf32>
    %698 = arith.mulf %693, %697 : vector<16x32xf32>
    %699 = arith.mulf %636, %698 : vector<16x32xf32>
    %700 = arith.mulf %636, %696 : vector<16x32xf32>
    %701 = arith.mulf %632, %667 : vector<16x32xf32>
    %702 = arith.addf %616, %701 : vector<16x32xf32>
    %703 = arith.addf %617, %699 : vector<16x32xf32>
    %c8_i32 = arith.constant 8 : i32
    %c11_i32_265 = arith.constant 11 : i32
    %704 = arith.subi %c11_i32_265, %c8_i32 : i32
    %705 = arith.index_cast %c8_i32 : i32 to index
    %c0_266 = arith.constant 0 : index
    %c0_267 = arith.constant 0 : index
    %706 = vector.load %arg14[%705, %c0_266, %c0_267] : memref<12x16x128xf32, #tpu.memory_space<vmem>>, vector<1x16x128xf32>
    %707 = vector.shape_cast %706 : vector<1x16x128xf32> to vector<16x128xf32>
    %cst_268 = arith.constant dense<0.000000e+00> : vector<16x128xf32>
    %708 = tpu.matmul %667, %13, %cst_268 {dimension_numbers = #tpu.dot_dimension_numbers<[1], [0], [0], [1], [0, 0, 1, 1], [], []>} : vector<16x32xf32>, vector<32x128xf32>, vector<16x128xf32> -> vector<16x128xf32>
    %709 = arith.addf %707, %708 : vector<16x128xf32>
    %710 = arith.index_cast %704 : i32 to index
    %c0_269 = arith.constant 0 : index
    %c0_270 = arith.constant 0 : index
    %711 = vector.load %arg15[%710, %c0_269, %c0_270] : memref<12x16x128xf32, #tpu.memory_space<vmem>>, vector<1x16x128xf32>
    %712 = vector.shape_cast %711 : vector<1x16x128xf32> to vector<16x128xf32>
    %cst_271 = arith.constant dense<0.000000e+00> : vector<16x128xf32>
    %713 = tpu.matmul %699, %14, %cst_271 {dimension_numbers = #tpu.dot_dimension_numbers<[1], [0], [0], [1], [0, 0, 1, 1], [], []>} : vector<16x32xf32>, vector<32x128xf32>, vector<16x128xf32> -> vector<16x128xf32>
    %714 = arith.addf %712, %713 : vector<16x128xf32>
    %715 = arith.index_cast %c8_i32 : i32 to index
    %c0_272 = arith.constant 0 : index
    %c0_273 = arith.constant 0 : index
    %c0_274 = arith.constant 0 : index
    %716 = vector.load %arg2[%715, %c0_272, %c0_273, %c0_274] : memref<12x2x8x32xf32, #tpu.memory_space<vmem>>, vector<1x2x8x32xf32>
    %717 = vector.shape_cast %716 : vector<1x2x8x32xf32> to vector<2x8x32xf32>
    %718 = vector.shape_cast %717 : vector<2x8x32xf32> to vector<16x32xf32>
    %719 = arith.index_cast %704 : i32 to index
    %c0_275 = arith.constant 0 : index
    %c0_276 = arith.constant 0 : index
    %c0_277 = arith.constant 0 : index
    %720 = vector.load %arg2[%719, %c0_275, %c0_276, %c0_277] : memref<12x2x8x32xf32, #tpu.memory_space<vmem>>, vector<1x2x8x32xf32>
    %721 = vector.shape_cast %720 : vector<1x2x8x32xf32> to vector<2x8x32xf32>
    %722 = vector.shape_cast %721 : vector<2x8x32xf32> to vector<16x32xf32>
    %723 = vector.extract_strided_slice %709 {offsets = [0, 0], sizes = [16, 32], strides = [1, 1]} : vector<16x128xf32> to vector<16x32xf32>
    %cst_278 = arith.constant 5.000000e-01 : f32
    %724 = vector.broadcast %cst_278 : f32 to vector<16x32xf32>
    %725 = arith.mulf %724, %723 : vector<16x32xf32>
    %726 = math.tanh %725 : vector<16x32xf32>
    %cst_279 = arith.constant 5.000000e-01 : f32
    %727 = vector.broadcast %cst_279 : f32 to vector<16x32xf32>
    %728 = arith.mulf %727, %726 : vector<16x32xf32>
    %cst_280 = arith.constant 5.000000e-01 : f32
    %729 = vector.broadcast %cst_280 : f32 to vector<16x32xf32>
    %730 = arith.addf %728, %729 : vector<16x32xf32>
    %731 = vector.extract_strided_slice %709 {offsets = [0, 32], sizes = [16, 32], strides = [1, 1]} : vector<16x128xf32> to vector<16x32xf32>
    %cst_281 = arith.constant 5.000000e-01 : f32
    %732 = vector.broadcast %cst_281 : f32 to vector<16x32xf32>
    %733 = arith.mulf %732, %731 : vector<16x32xf32>
    %734 = math.tanh %733 : vector<16x32xf32>
    %cst_282 = arith.constant 5.000000e-01 : f32
    %735 = vector.broadcast %cst_282 : f32 to vector<16x32xf32>
    %736 = arith.mulf %735, %734 : vector<16x32xf32>
    %cst_283 = arith.constant 5.000000e-01 : f32
    %737 = vector.broadcast %cst_283 : f32 to vector<16x32xf32>
    %738 = arith.addf %736, %737 : vector<16x32xf32>
    %739 = vector.extract_strided_slice %709 {offsets = [0, 64], sizes = [16, 32], strides = [1, 1]} : vector<16x128xf32> to vector<16x32xf32>
    %740 = math.tanh %739 : vector<16x32xf32>
    %741 = vector.extract_strided_slice %709 {offsets = [0, 96], sizes = [16, 32], strides = [1, 1]} : vector<16x128xf32> to vector<16x32xf32>
    %cst_284 = arith.constant 5.000000e-01 : f32
    %742 = vector.broadcast %cst_284 : f32 to vector<16x32xf32>
    %743 = arith.mulf %742, %741 : vector<16x32xf32>
    %744 = math.tanh %743 : vector<16x32xf32>
    %cst_285 = arith.constant 5.000000e-01 : f32
    %745 = vector.broadcast %cst_285 : f32 to vector<16x32xf32>
    %746 = arith.mulf %745, %744 : vector<16x32xf32>
    %cst_286 = arith.constant 5.000000e-01 : f32
    %747 = vector.broadcast %cst_286 : f32 to vector<16x32xf32>
    %748 = arith.addf %746, %747 : vector<16x32xf32>
    %749 = arith.mulf %738, %665 : vector<16x32xf32>
    %750 = arith.mulf %730, %740 : vector<16x32xf32>
    %751 = arith.addf %749, %750 : vector<16x32xf32>
    %752 = math.tanh %751 : vector<16x32xf32>
    %753 = arith.mulf %748, %752 : vector<16x32xf32>
    %754 = vector.extract_strided_slice %714 {offsets = [0, 0], sizes = [16, 32], strides = [1, 1]} : vector<16x128xf32> to vector<16x32xf32>
    %cst_287 = arith.constant 5.000000e-01 : f32
    %755 = vector.broadcast %cst_287 : f32 to vector<16x32xf32>
    %756 = arith.mulf %755, %754 : vector<16x32xf32>
    %757 = math.tanh %756 : vector<16x32xf32>
    %cst_288 = arith.constant 5.000000e-01 : f32
    %758 = vector.broadcast %cst_288 : f32 to vector<16x32xf32>
    %759 = arith.mulf %758, %757 : vector<16x32xf32>
    %cst_289 = arith.constant 5.000000e-01 : f32
    %760 = vector.broadcast %cst_289 : f32 to vector<16x32xf32>
    %761 = arith.addf %759, %760 : vector<16x32xf32>
    %762 = vector.extract_strided_slice %714 {offsets = [0, 32], sizes = [16, 32], strides = [1, 1]} : vector<16x128xf32> to vector<16x32xf32>
    %cst_290 = arith.constant 5.000000e-01 : f32
    %763 = vector.broadcast %cst_290 : f32 to vector<16x32xf32>
    %764 = arith.mulf %763, %762 : vector<16x32xf32>
    %765 = math.tanh %764 : vector<16x32xf32>
    %cst_291 = arith.constant 5.000000e-01 : f32
    %766 = vector.broadcast %cst_291 : f32 to vector<16x32xf32>
    %767 = arith.mulf %766, %765 : vector<16x32xf32>
    %cst_292 = arith.constant 5.000000e-01 : f32
    %768 = vector.broadcast %cst_292 : f32 to vector<16x32xf32>
    %769 = arith.addf %767, %768 : vector<16x32xf32>
    %770 = vector.extract_strided_slice %714 {offsets = [0, 64], sizes = [16, 32], strides = [1, 1]} : vector<16x128xf32> to vector<16x32xf32>
    %771 = math.tanh %770 : vector<16x32xf32>
    %772 = vector.extract_strided_slice %714 {offsets = [0, 96], sizes = [16, 32], strides = [1, 1]} : vector<16x128xf32> to vector<16x32xf32>
    %cst_293 = arith.constant 5.000000e-01 : f32
    %773 = vector.broadcast %cst_293 : f32 to vector<16x32xf32>
    %774 = arith.mulf %773, %772 : vector<16x32xf32>
    %775 = math.tanh %774 : vector<16x32xf32>
    %cst_294 = arith.constant 5.000000e-01 : f32
    %776 = vector.broadcast %cst_294 : f32 to vector<16x32xf32>
    %777 = arith.mulf %776, %775 : vector<16x32xf32>
    %cst_295 = arith.constant 5.000000e-01 : f32
    %778 = vector.broadcast %cst_295 : f32 to vector<16x32xf32>
    %779 = arith.addf %777, %778 : vector<16x32xf32>
    %780 = arith.mulf %769, %700 : vector<16x32xf32>
    %781 = arith.mulf %761, %771 : vector<16x32xf32>
    %782 = arith.addf %780, %781 : vector<16x32xf32>
    %783 = math.tanh %782 : vector<16x32xf32>
    %784 = arith.mulf %779, %783 : vector<16x32xf32>
    %785 = arith.mulf %722, %784 : vector<16x32xf32>
    %786 = arith.mulf %722, %782 : vector<16x32xf32>
    %787 = arith.mulf %718, %753 : vector<16x32xf32>
    %788 = arith.addf %702, %787 : vector<16x32xf32>
    %789 = arith.addf %703, %785 : vector<16x32xf32>
    %c9_i32 = arith.constant 9 : i32
    %c11_i32_296 = arith.constant 11 : i32
    %790 = arith.subi %c11_i32_296, %c9_i32 : i32
    %791 = arith.index_cast %c9_i32 : i32 to index
    %c0_297 = arith.constant 0 : index
    %c0_298 = arith.constant 0 : index
    %792 = vector.load %arg14[%791, %c0_297, %c0_298] : memref<12x16x128xf32, #tpu.memory_space<vmem>>, vector<1x16x128xf32>
    %793 = vector.shape_cast %792 : vector<1x16x128xf32> to vector<16x128xf32>
    %cst_299 = arith.constant dense<0.000000e+00> : vector<16x128xf32>
    %794 = tpu.matmul %753, %13, %cst_299 {dimension_numbers = #tpu.dot_dimension_numbers<[1], [0], [0], [1], [0, 0, 1, 1], [], []>} : vector<16x32xf32>, vector<32x128xf32>, vector<16x128xf32> -> vector<16x128xf32>
    %795 = arith.addf %793, %794 : vector<16x128xf32>
    %796 = arith.index_cast %790 : i32 to index
    %c0_300 = arith.constant 0 : index
    %c0_301 = arith.constant 0 : index
    %797 = vector.load %arg15[%796, %c0_300, %c0_301] : memref<12x16x128xf32, #tpu.memory_space<vmem>>, vector<1x16x128xf32>
    %798 = vector.shape_cast %797 : vector<1x16x128xf32> to vector<16x128xf32>
    %cst_302 = arith.constant dense<0.000000e+00> : vector<16x128xf32>
    %799 = tpu.matmul %785, %14, %cst_302 {dimension_numbers = #tpu.dot_dimension_numbers<[1], [0], [0], [1], [0, 0, 1, 1], [], []>} : vector<16x32xf32>, vector<32x128xf32>, vector<16x128xf32> -> vector<16x128xf32>
    %800 = arith.addf %798, %799 : vector<16x128xf32>
    %801 = arith.index_cast %c9_i32 : i32 to index
    %c0_303 = arith.constant 0 : index
    %c0_304 = arith.constant 0 : index
    %c0_305 = arith.constant 0 : index
    %802 = vector.load %arg2[%801, %c0_303, %c0_304, %c0_305] : memref<12x2x8x32xf32, #tpu.memory_space<vmem>>, vector<1x2x8x32xf32>
    %803 = vector.shape_cast %802 : vector<1x2x8x32xf32> to vector<2x8x32xf32>
    %804 = vector.shape_cast %803 : vector<2x8x32xf32> to vector<16x32xf32>
    %805 = arith.index_cast %790 : i32 to index
    %c0_306 = arith.constant 0 : index
    %c0_307 = arith.constant 0 : index
    %c0_308 = arith.constant 0 : index
    %806 = vector.load %arg2[%805, %c0_306, %c0_307, %c0_308] : memref<12x2x8x32xf32, #tpu.memory_space<vmem>>, vector<1x2x8x32xf32>
    %807 = vector.shape_cast %806 : vector<1x2x8x32xf32> to vector<2x8x32xf32>
    %808 = vector.shape_cast %807 : vector<2x8x32xf32> to vector<16x32xf32>
    %809 = vector.extract_strided_slice %795 {offsets = [0, 0], sizes = [16, 32], strides = [1, 1]} : vector<16x128xf32> to vector<16x32xf32>
    %cst_309 = arith.constant 5.000000e-01 : f32
    %810 = vector.broadcast %cst_309 : f32 to vector<16x32xf32>
    %811 = arith.mulf %810, %809 : vector<16x32xf32>
    %812 = math.tanh %811 : vector<16x32xf32>
    %cst_310 = arith.constant 5.000000e-01 : f32
    %813 = vector.broadcast %cst_310 : f32 to vector<16x32xf32>
    %814 = arith.mulf %813, %812 : vector<16x32xf32>
    %cst_311 = arith.constant 5.000000e-01 : f32
    %815 = vector.broadcast %cst_311 : f32 to vector<16x32xf32>
    %816 = arith.addf %814, %815 : vector<16x32xf32>
    %817 = vector.extract_strided_slice %795 {offsets = [0, 32], sizes = [16, 32], strides = [1, 1]} : vector<16x128xf32> to vector<16x32xf32>
    %cst_312 = arith.constant 5.000000e-01 : f32
    %818 = vector.broadcast %cst_312 : f32 to vector<16x32xf32>
    %819 = arith.mulf %818, %817 : vector<16x32xf32>
    %820 = math.tanh %819 : vector<16x32xf32>
    %cst_313 = arith.constant 5.000000e-01 : f32
    %821 = vector.broadcast %cst_313 : f32 to vector<16x32xf32>
    %822 = arith.mulf %821, %820 : vector<16x32xf32>
    %cst_314 = arith.constant 5.000000e-01 : f32
    %823 = vector.broadcast %cst_314 : f32 to vector<16x32xf32>
    %824 = arith.addf %822, %823 : vector<16x32xf32>
    %825 = vector.extract_strided_slice %795 {offsets = [0, 64], sizes = [16, 32], strides = [1, 1]} : vector<16x128xf32> to vector<16x32xf32>
    %826 = math.tanh %825 : vector<16x32xf32>
    %827 = vector.extract_strided_slice %795 {offsets = [0, 96], sizes = [16, 32], strides = [1, 1]} : vector<16x128xf32> to vector<16x32xf32>
    %cst_315 = arith.constant 5.000000e-01 : f32
    %828 = vector.broadcast %cst_315 : f32 to vector<16x32xf32>
    %829 = arith.mulf %828, %827 : vector<16x32xf32>
    %830 = math.tanh %829 : vector<16x32xf32>
    %cst_316 = arith.constant 5.000000e-01 : f32
    %831 = vector.broadcast %cst_316 : f32 to vector<16x32xf32>
    %832 = arith.mulf %831, %830 : vector<16x32xf32>
    %cst_317 = arith.constant 5.000000e-01 : f32
    %833 = vector.broadcast %cst_317 : f32 to vector<16x32xf32>
    %834 = arith.addf %832, %833 : vector<16x32xf32>
    %835 = arith.mulf %824, %751 : vector<16x32xf32>
    %836 = arith.mulf %816, %826 : vector<16x32xf32>
    %837 = arith.addf %835, %836 : vector<16x32xf32>
    %838 = math.tanh %837 : vector<16x32xf32>
    %839 = arith.mulf %834, %838 : vector<16x32xf32>
    %840 = vector.extract_strided_slice %800 {offsets = [0, 0], sizes = [16, 32], strides = [1, 1]} : vector<16x128xf32> to vector<16x32xf32>
    %cst_318 = arith.constant 5.000000e-01 : f32
    %841 = vector.broadcast %cst_318 : f32 to vector<16x32xf32>
    %842 = arith.mulf %841, %840 : vector<16x32xf32>
    %843 = math.tanh %842 : vector<16x32xf32>
    %cst_319 = arith.constant 5.000000e-01 : f32
    %844 = vector.broadcast %cst_319 : f32 to vector<16x32xf32>
    %845 = arith.mulf %844, %843 : vector<16x32xf32>
    %cst_320 = arith.constant 5.000000e-01 : f32
    %846 = vector.broadcast %cst_320 : f32 to vector<16x32xf32>
    %847 = arith.addf %845, %846 : vector<16x32xf32>
    %848 = vector.extract_strided_slice %800 {offsets = [0, 32], sizes = [16, 32], strides = [1, 1]} : vector<16x128xf32> to vector<16x32xf32>
    %cst_321 = arith.constant 5.000000e-01 : f32
    %849 = vector.broadcast %cst_321 : f32 to vector<16x32xf32>
    %850 = arith.mulf %849, %848 : vector<16x32xf32>
    %851 = math.tanh %850 : vector<16x32xf32>
    %cst_322 = arith.constant 5.000000e-01 : f32
    %852 = vector.broadcast %cst_322 : f32 to vector<16x32xf32>
    %853 = arith.mulf %852, %851 : vector<16x32xf32>
    %cst_323 = arith.constant 5.000000e-01 : f32
    %854 = vector.broadcast %cst_323 : f32 to vector<16x32xf32>
    %855 = arith.addf %853, %854 : vector<16x32xf32>
    %856 = vector.extract_strided_slice %800 {offsets = [0, 64], sizes = [16, 32], strides = [1, 1]} : vector<16x128xf32> to vector<16x32xf32>
    %857 = math.tanh %856 : vector<16x32xf32>
    %858 = vector.extract_strided_slice %800 {offsets = [0, 96], sizes = [16, 32], strides = [1, 1]} : vector<16x128xf32> to vector<16x32xf32>
    %cst_324 = arith.constant 5.000000e-01 : f32
    %859 = vector.broadcast %cst_324 : f32 to vector<16x32xf32>
    %860 = arith.mulf %859, %858 : vector<16x32xf32>
    %861 = math.tanh %860 : vector<16x32xf32>
    %cst_325 = arith.constant 5.000000e-01 : f32
    %862 = vector.broadcast %cst_325 : f32 to vector<16x32xf32>
    %863 = arith.mulf %862, %861 : vector<16x32xf32>
    %cst_326 = arith.constant 5.000000e-01 : f32
    %864 = vector.broadcast %cst_326 : f32 to vector<16x32xf32>
    %865 = arith.addf %863, %864 : vector<16x32xf32>
    %866 = arith.mulf %855, %786 : vector<16x32xf32>
    %867 = arith.mulf %847, %857 : vector<16x32xf32>
    %868 = arith.addf %866, %867 : vector<16x32xf32>
    %869 = math.tanh %868 : vector<16x32xf32>
    %870 = arith.mulf %865, %869 : vector<16x32xf32>
    %871 = arith.mulf %808, %870 : vector<16x32xf32>
    %872 = arith.mulf %808, %868 : vector<16x32xf32>
    %873 = arith.mulf %804, %839 : vector<16x32xf32>
    %874 = arith.addf %788, %873 : vector<16x32xf32>
    %875 = arith.addf %789, %871 : vector<16x32xf32>
    %c10_i32 = arith.constant 10 : i32
    %c11_i32_327 = arith.constant 11 : i32
    %876 = arith.subi %c11_i32_327, %c10_i32 : i32
    %877 = arith.index_cast %c10_i32 : i32 to index
    %c0_328 = arith.constant 0 : index
    %c0_329 = arith.constant 0 : index
    %878 = vector.load %arg14[%877, %c0_328, %c0_329] : memref<12x16x128xf32, #tpu.memory_space<vmem>>, vector<1x16x128xf32>
    %879 = vector.shape_cast %878 : vector<1x16x128xf32> to vector<16x128xf32>
    %cst_330 = arith.constant dense<0.000000e+00> : vector<16x128xf32>
    %880 = tpu.matmul %839, %13, %cst_330 {dimension_numbers = #tpu.dot_dimension_numbers<[1], [0], [0], [1], [0, 0, 1, 1], [], []>} : vector<16x32xf32>, vector<32x128xf32>, vector<16x128xf32> -> vector<16x128xf32>
    %881 = arith.addf %879, %880 : vector<16x128xf32>
    %882 = arith.index_cast %876 : i32 to index
    %c0_331 = arith.constant 0 : index
    %c0_332 = arith.constant 0 : index
    %883 = vector.load %arg15[%882, %c0_331, %c0_332] : memref<12x16x128xf32, #tpu.memory_space<vmem>>, vector<1x16x128xf32>
    %884 = vector.shape_cast %883 : vector<1x16x128xf32> to vector<16x128xf32>
    %cst_333 = arith.constant dense<0.000000e+00> : vector<16x128xf32>
    %885 = tpu.matmul %871, %14, %cst_333 {dimension_numbers = #tpu.dot_dimension_numbers<[1], [0], [0], [1], [0, 0, 1, 1], [], []>} : vector<16x32xf32>, vector<32x128xf32>, vector<16x128xf32> -> vector<16x128xf32>
    %886 = arith.addf %884, %885 : vector<16x128xf32>
    %887 = arith.index_cast %c10_i32 : i32 to index
    %c0_334 = arith.constant 0 : index
    %c0_335 = arith.constant 0 : index
    %c0_336 = arith.constant 0 : index
    %888 = vector.load %arg2[%887, %c0_334, %c0_335, %c0_336] : memref<12x2x8x32xf32, #tpu.memory_space<vmem>>, vector<1x2x8x32xf32>
    %889 = vector.shape_cast %888 : vector<1x2x8x32xf32> to vector<2x8x32xf32>
    %890 = vector.shape_cast %889 : vector<2x8x32xf32> to vector<16x32xf32>
    %891 = arith.index_cast %876 : i32 to index
    %c0_337 = arith.constant 0 : index
    %c0_338 = arith.constant 0 : index
    %c0_339 = arith.constant 0 : index
    %892 = vector.load %arg2[%891, %c0_337, %c0_338, %c0_339] : memref<12x2x8x32xf32, #tpu.memory_space<vmem>>, vector<1x2x8x32xf32>
    %893 = vector.shape_cast %892 : vector<1x2x8x32xf32> to vector<2x8x32xf32>
    %894 = vector.shape_cast %893 : vector<2x8x32xf32> to vector<16x32xf32>
    %895 = vector.extract_strided_slice %881 {offsets = [0, 0], sizes = [16, 32], strides = [1, 1]} : vector<16x128xf32> to vector<16x32xf32>
    %cst_340 = arith.constant 5.000000e-01 : f32
    %896 = vector.broadcast %cst_340 : f32 to vector<16x32xf32>
    %897 = arith.mulf %896, %895 : vector<16x32xf32>
    %898 = math.tanh %897 : vector<16x32xf32>
    %cst_341 = arith.constant 5.000000e-01 : f32
    %899 = vector.broadcast %cst_341 : f32 to vector<16x32xf32>
    %900 = arith.mulf %899, %898 : vector<16x32xf32>
    %cst_342 = arith.constant 5.000000e-01 : f32
    %901 = vector.broadcast %cst_342 : f32 to vector<16x32xf32>
    %902 = arith.addf %900, %901 : vector<16x32xf32>
    %903 = vector.extract_strided_slice %881 {offsets = [0, 32], sizes = [16, 32], strides = [1, 1]} : vector<16x128xf32> to vector<16x32xf32>
    %cst_343 = arith.constant 5.000000e-01 : f32
    %904 = vector.broadcast %cst_343 : f32 to vector<16x32xf32>
    %905 = arith.mulf %904, %903 : vector<16x32xf32>
    %906 = math.tanh %905 : vector<16x32xf32>
    %cst_344 = arith.constant 5.000000e-01 : f32
    %907 = vector.broadcast %cst_344 : f32 to vector<16x32xf32>
    %908 = arith.mulf %907, %906 : vector<16x32xf32>
    %cst_345 = arith.constant 5.000000e-01 : f32
    %909 = vector.broadcast %cst_345 : f32 to vector<16x32xf32>
    %910 = arith.addf %908, %909 : vector<16x32xf32>
    %911 = vector.extract_strided_slice %881 {offsets = [0, 64], sizes = [16, 32], strides = [1, 1]} : vector<16x128xf32> to vector<16x32xf32>
    %912 = math.tanh %911 : vector<16x32xf32>
    %913 = vector.extract_strided_slice %881 {offsets = [0, 96], sizes = [16, 32], strides = [1, 1]} : vector<16x128xf32> to vector<16x32xf32>
    %cst_346 = arith.constant 5.000000e-01 : f32
    %914 = vector.broadcast %cst_346 : f32 to vector<16x32xf32>
    %915 = arith.mulf %914, %913 : vector<16x32xf32>
    %916 = math.tanh %915 : vector<16x32xf32>
    %cst_347 = arith.constant 5.000000e-01 : f32
    %917 = vector.broadcast %cst_347 : f32 to vector<16x32xf32>
    %918 = arith.mulf %917, %916 : vector<16x32xf32>
    %cst_348 = arith.constant 5.000000e-01 : f32
    %919 = vector.broadcast %cst_348 : f32 to vector<16x32xf32>
    %920 = arith.addf %918, %919 : vector<16x32xf32>
    %921 = arith.mulf %910, %837 : vector<16x32xf32>
    %922 = arith.mulf %902, %912 : vector<16x32xf32>
    %923 = arith.addf %921, %922 : vector<16x32xf32>
    %924 = math.tanh %923 : vector<16x32xf32>
    %925 = arith.mulf %920, %924 : vector<16x32xf32>
    %926 = vector.extract_strided_slice %886 {offsets = [0, 0], sizes = [16, 32], strides = [1, 1]} : vector<16x128xf32> to vector<16x32xf32>
    %cst_349 = arith.constant 5.000000e-01 : f32
    %927 = vector.broadcast %cst_349 : f32 to vector<16x32xf32>
    %928 = arith.mulf %927, %926 : vector<16x32xf32>
    %929 = math.tanh %928 : vector<16x32xf32>
    %cst_350 = arith.constant 5.000000e-01 : f32
    %930 = vector.broadcast %cst_350 : f32 to vector<16x32xf32>
    %931 = arith.mulf %930, %929 : vector<16x32xf32>
    %cst_351 = arith.constant 5.000000e-01 : f32
    %932 = vector.broadcast %cst_351 : f32 to vector<16x32xf32>
    %933 = arith.addf %931, %932 : vector<16x32xf32>
    %934 = vector.extract_strided_slice %886 {offsets = [0, 32], sizes = [16, 32], strides = [1, 1]} : vector<16x128xf32> to vector<16x32xf32>
    %cst_352 = arith.constant 5.000000e-01 : f32
    %935 = vector.broadcast %cst_352 : f32 to vector<16x32xf32>
    %936 = arith.mulf %935, %934 : vector<16x32xf32>
    %937 = math.tanh %936 : vector<16x32xf32>
    %cst_353 = arith.constant 5.000000e-01 : f32
    %938 = vector.broadcast %cst_353 : f32 to vector<16x32xf32>
    %939 = arith.mulf %938, %937 : vector<16x32xf32>
    %cst_354 = arith.constant 5.000000e-01 : f32
    %940 = vector.broadcast %cst_354 : f32 to vector<16x32xf32>
    %941 = arith.addf %939, %940 : vector<16x32xf32>
    %942 = vector.extract_strided_slice %886 {offsets = [0, 64], sizes = [16, 32], strides = [1, 1]} : vector<16x128xf32> to vector<16x32xf32>
    %943 = math.tanh %942 : vector<16x32xf32>
    %944 = vector.extract_strided_slice %886 {offsets = [0, 96], sizes = [16, 32], strides = [1, 1]} : vector<16x128xf32> to vector<16x32xf32>
    %cst_355 = arith.constant 5.000000e-01 : f32
    %945 = vector.broadcast %cst_355 : f32 to vector<16x32xf32>
    %946 = arith.mulf %945, %944 : vector<16x32xf32>
    %947 = math.tanh %946 : vector<16x32xf32>
    %cst_356 = arith.constant 5.000000e-01 : f32
    %948 = vector.broadcast %cst_356 : f32 to vector<16x32xf32>
    %949 = arith.mulf %948, %947 : vector<16x32xf32>
    %cst_357 = arith.constant 5.000000e-01 : f32
    %950 = vector.broadcast %cst_357 : f32 to vector<16x32xf32>
    %951 = arith.addf %949, %950 : vector<16x32xf32>
    %952 = arith.mulf %941, %872 : vector<16x32xf32>
    %953 = arith.mulf %933, %943 : vector<16x32xf32>
    %954 = arith.addf %952, %953 : vector<16x32xf32>
    %955 = math.tanh %954 : vector<16x32xf32>
    %956 = arith.mulf %951, %955 : vector<16x32xf32>
    %957 = arith.mulf %894, %956 : vector<16x32xf32>
    %958 = arith.mulf %894, %954 : vector<16x32xf32>
    %959 = arith.mulf %890, %925 : vector<16x32xf32>
    %960 = arith.addf %874, %959 : vector<16x32xf32>
    %961 = arith.addf %875, %957 : vector<16x32xf32>
    %c11_i32_358 = arith.constant 11 : i32
    %c11_i32_359 = arith.constant 11 : i32
    %962 = arith.subi %c11_i32_359, %c11_i32_358 : i32
    %963 = arith.index_cast %c11_i32_358 : i32 to index
    %c0_360 = arith.constant 0 : index
    %c0_361 = arith.constant 0 : index
    %964 = vector.load %arg14[%963, %c0_360, %c0_361] : memref<12x16x128xf32, #tpu.memory_space<vmem>>, vector<1x16x128xf32>
    %965 = vector.shape_cast %964 : vector<1x16x128xf32> to vector<16x128xf32>
    %cst_362 = arith.constant dense<0.000000e+00> : vector<16x128xf32>
    %966 = tpu.matmul %925, %13, %cst_362 {dimension_numbers = #tpu.dot_dimension_numbers<[1], [0], [0], [1], [0, 0, 1, 1], [], []>} : vector<16x32xf32>, vector<32x128xf32>, vector<16x128xf32> -> vector<16x128xf32>
    %967 = arith.addf %965, %966 : vector<16x128xf32>
    %968 = arith.index_cast %962 : i32 to index
    %c0_363 = arith.constant 0 : index
    %c0_364 = arith.constant 0 : index
    %969 = vector.load %arg15[%968, %c0_363, %c0_364] : memref<12x16x128xf32, #tpu.memory_space<vmem>>, vector<1x16x128xf32>
    %970 = vector.shape_cast %969 : vector<1x16x128xf32> to vector<16x128xf32>
    %cst_365 = arith.constant dense<0.000000e+00> : vector<16x128xf32>
    %971 = tpu.matmul %957, %14, %cst_365 {dimension_numbers = #tpu.dot_dimension_numbers<[1], [0], [0], [1], [0, 0, 1, 1], [], []>} : vector<16x32xf32>, vector<32x128xf32>, vector<16x128xf32> -> vector<16x128xf32>
    %972 = arith.addf %970, %971 : vector<16x128xf32>
    %973 = arith.index_cast %c11_i32_358 : i32 to index
    %c0_366 = arith.constant 0 : index
    %c0_367 = arith.constant 0 : index
    %c0_368 = arith.constant 0 : index
    %974 = vector.load %arg2[%973, %c0_366, %c0_367, %c0_368] : memref<12x2x8x32xf32, #tpu.memory_space<vmem>>, vector<1x2x8x32xf32>
    %975 = vector.shape_cast %974 : vector<1x2x8x32xf32> to vector<2x8x32xf32>
    %976 = vector.shape_cast %975 : vector<2x8x32xf32> to vector<16x32xf32>
    %977 = arith.index_cast %962 : i32 to index
    %c0_369 = arith.constant 0 : index
    %c0_370 = arith.constant 0 : index
    %c0_371 = arith.constant 0 : index
    %978 = vector.load %arg2[%977, %c0_369, %c0_370, %c0_371] : memref<12x2x8x32xf32, #tpu.memory_space<vmem>>, vector<1x2x8x32xf32>
    %979 = vector.shape_cast %978 : vector<1x2x8x32xf32> to vector<2x8x32xf32>
    %980 = vector.shape_cast %979 : vector<2x8x32xf32> to vector<16x32xf32>
    %981 = vector.extract_strided_slice %967 {offsets = [0, 0], sizes = [16, 32], strides = [1, 1]} : vector<16x128xf32> to vector<16x32xf32>
    %cst_372 = arith.constant 5.000000e-01 : f32
    %982 = vector.broadcast %cst_372 : f32 to vector<16x32xf32>
    %983 = arith.mulf %982, %981 : vector<16x32xf32>
    %984 = math.tanh %983 : vector<16x32xf32>
    %cst_373 = arith.constant 5.000000e-01 : f32
    %985 = vector.broadcast %cst_373 : f32 to vector<16x32xf32>
    %986 = arith.mulf %985, %984 : vector<16x32xf32>
    %cst_374 = arith.constant 5.000000e-01 : f32
    %987 = vector.broadcast %cst_374 : f32 to vector<16x32xf32>
    %988 = arith.addf %986, %987 : vector<16x32xf32>
    %989 = vector.extract_strided_slice %967 {offsets = [0, 32], sizes = [16, 32], strides = [1, 1]} : vector<16x128xf32> to vector<16x32xf32>
    %cst_375 = arith.constant 5.000000e-01 : f32
    %990 = vector.broadcast %cst_375 : f32 to vector<16x32xf32>
    %991 = arith.mulf %990, %989 : vector<16x32xf32>
    %992 = math.tanh %991 : vector<16x32xf32>
    %cst_376 = arith.constant 5.000000e-01 : f32
    %993 = vector.broadcast %cst_376 : f32 to vector<16x32xf32>
    %994 = arith.mulf %993, %992 : vector<16x32xf32>
    %cst_377 = arith.constant 5.000000e-01 : f32
    %995 = vector.broadcast %cst_377 : f32 to vector<16x32xf32>
    %996 = arith.addf %994, %995 : vector<16x32xf32>
    %997 = vector.extract_strided_slice %967 {offsets = [0, 64], sizes = [16, 32], strides = [1, 1]} : vector<16x128xf32> to vector<16x32xf32>
    %998 = math.tanh %997 : vector<16x32xf32>
    %999 = vector.extract_strided_slice %967 {offsets = [0, 96], sizes = [16, 32], strides = [1, 1]} : vector<16x128xf32> to vector<16x32xf32>
    %cst_378 = arith.constant 5.000000e-01 : f32
    %1000 = vector.broadcast %cst_378 : f32 to vector<16x32xf32>
    %1001 = arith.mulf %1000, %999 : vector<16x32xf32>
    %1002 = math.tanh %1001 : vector<16x32xf32>
    %cst_379 = arith.constant 5.000000e-01 : f32
    %1003 = vector.broadcast %cst_379 : f32 to vector<16x32xf32>
    %1004 = arith.mulf %1003, %1002 : vector<16x32xf32>
    %cst_380 = arith.constant 5.000000e-01 : f32
    %1005 = vector.broadcast %cst_380 : f32 to vector<16x32xf32>
    %1006 = arith.addf %1004, %1005 : vector<16x32xf32>
    %1007 = arith.mulf %996, %923 : vector<16x32xf32>
    %1008 = arith.mulf %988, %998 : vector<16x32xf32>
    %1009 = arith.addf %1007, %1008 : vector<16x32xf32>
    %1010 = math.tanh %1009 : vector<16x32xf32>
    %1011 = arith.mulf %1006, %1010 : vector<16x32xf32>
    %1012 = vector.extract_strided_slice %972 {offsets = [0, 0], sizes = [16, 32], strides = [1, 1]} : vector<16x128xf32> to vector<16x32xf32>
    %cst_381 = arith.constant 5.000000e-01 : f32
    %1013 = vector.broadcast %cst_381 : f32 to vector<16x32xf32>
    %1014 = arith.mulf %1013, %1012 : vector<16x32xf32>
    %1015 = math.tanh %1014 : vector<16x32xf32>
    %cst_382 = arith.constant 5.000000e-01 : f32
    %1016 = vector.broadcast %cst_382 : f32 to vector<16x32xf32>
    %1017 = arith.mulf %1016, %1015 : vector<16x32xf32>
    %cst_383 = arith.constant 5.000000e-01 : f32
    %1018 = vector.broadcast %cst_383 : f32 to vector<16x32xf32>
    %1019 = arith.addf %1017, %1018 : vector<16x32xf32>
    %1020 = vector.extract_strided_slice %972 {offsets = [0, 32], sizes = [16, 32], strides = [1, 1]} : vector<16x128xf32> to vector<16x32xf32>
    %cst_384 = arith.constant 5.000000e-01 : f32
    %1021 = vector.broadcast %cst_384 : f32 to vector<16x32xf32>
    %1022 = arith.mulf %1021, %1020 : vector<16x32xf32>
    %1023 = math.tanh %1022 : vector<16x32xf32>
    %cst_385 = arith.constant 5.000000e-01 : f32
    %1024 = vector.broadcast %cst_385 : f32 to vector<16x32xf32>
    %1025 = arith.mulf %1024, %1023 : vector<16x32xf32>
    %cst_386 = arith.constant 5.000000e-01 : f32
    %1026 = vector.broadcast %cst_386 : f32 to vector<16x32xf32>
    %1027 = arith.addf %1025, %1026 : vector<16x32xf32>
    %1028 = vector.extract_strided_slice %972 {offsets = [0, 64], sizes = [16, 32], strides = [1, 1]} : vector<16x128xf32> to vector<16x32xf32>
    %1029 = math.tanh %1028 : vector<16x32xf32>
    %1030 = vector.extract_strided_slice %972 {offsets = [0, 96], sizes = [16, 32], strides = [1, 1]} : vector<16x128xf32> to vector<16x32xf32>
    %cst_387 = arith.constant 5.000000e-01 : f32
    %1031 = vector.broadcast %cst_387 : f32 to vector<16x32xf32>
    %1032 = arith.mulf %1031, %1030 : vector<16x32xf32>
    %1033 = math.tanh %1032 : vector<16x32xf32>
    %cst_388 = arith.constant 5.000000e-01 : f32
    %1034 = vector.broadcast %cst_388 : f32 to vector<16x32xf32>
    %1035 = arith.mulf %1034, %1033 : vector<16x32xf32>
    %cst_389 = arith.constant 5.000000e-01 : f32
    %1036 = vector.broadcast %cst_389 : f32 to vector<16x32xf32>
    %1037 = arith.addf %1035, %1036 : vector<16x32xf32>
    %1038 = arith.mulf %1027, %958 : vector<16x32xf32>
    %1039 = arith.mulf %1019, %1029 : vector<16x32xf32>
    %1040 = arith.addf %1038, %1039 : vector<16x32xf32>
    %1041 = math.tanh %1040 : vector<16x32xf32>
    %1042 = arith.mulf %1037, %1041 : vector<16x32xf32>
    %1043 = arith.mulf %980, %1042 : vector<16x32xf32>
    %1044 = arith.mulf %980, %1040 : vector<16x32xf32>
    %1045 = arith.mulf %976, %1011 : vector<16x32xf32>
    %1046 = arith.addf %960, %1045 : vector<16x32xf32>
    %1047 = arith.addf %961, %1043 : vector<16x32xf32>
    %c12_i32 = arith.constant 12 : i32
    %c0_390 = arith.constant 0 : index
    %c0_391 = arith.constant 0 : index
    %c0_392 = arith.constant 0 : index
    %1048 = vector.load %arg3[%c0_390, %c0_391, %c0_392] : memref<2x8x1xf32, #tpu.memory_space<vmem>>, vector<2x8x1xf32>
    %1049 = vector.shape_cast %1048 : vector<2x8x1xf32> to vector<16x1xf32>
    %1050 = vector.broadcast %1049 : vector<16x1xf32> to vector<16x32xf32>
    %1051 = arith.mulf %1046, %1050 : vector<16x32xf32>
    %1052 = vector.broadcast %1049 : vector<16x1xf32> to vector<16x32xf32>
    %1053 = arith.mulf %1047, %1052 : vector<16x32xf32>
    %1054 = vector.extract_strided_slice %1051 {offsets = [0, 0], sizes = [8, 32], strides = [1, 1]} : vector<16x32xf32> to vector<8x32xf32>
    %c0_393 = arith.constant 0 : index
    %c0_394 = arith.constant 0 : index
    %1055 = vector.load %arg9[%c0_393, %c0_394] : memref<128x128xf32, #tpu.memory_space<vmem>>, vector<32x128xf32>
    %cst_395 = arith.constant dense<0.000000e+00> : vector<8x128xf32>
    %1056 = tpu.matmul %1054, %1055, %cst_395 {dimension_numbers = #tpu.dot_dimension_numbers<[1], [0], [0], [1], [0, 0, 1, 1], [], []>} : vector<8x32xf32>, vector<32x128xf32>, vector<8x128xf32> -> vector<8x128xf32>
    %1057 = vector.extract_strided_slice %1053 {offsets = [0, 0], sizes = [8, 32], strides = [1, 1]} : vector<16x32xf32> to vector<8x32xf32>
    %c32 = arith.constant 32 : index
    %c0_396 = arith.constant 0 : index
    %1058 = vector.load %arg9[%c32, %c0_396] : memref<128x128xf32, #tpu.memory_space<vmem>>, vector<32x128xf32>
    %cst_397 = arith.constant dense<0.000000e+00> : vector<8x128xf32>
    %1059 = tpu.matmul %1057, %1058, %cst_397 {dimension_numbers = #tpu.dot_dimension_numbers<[1], [0], [0], [1], [0, 0, 1, 1], [], []>} : vector<8x32xf32>, vector<32x128xf32>, vector<8x128xf32> -> vector<8x128xf32>
    %1060 = arith.addf %1056, %1059 : vector<8x128xf32>
    %1061 = vector.extract_strided_slice %1051 {offsets = [8, 0], sizes = [8, 32], strides = [1, 1]} : vector<16x32xf32> to vector<8x32xf32>
    %c64 = arith.constant 64 : index
    %c0_398 = arith.constant 0 : index
    %1062 = vector.load %arg9[%c64, %c0_398] : memref<128x128xf32, #tpu.memory_space<vmem>>, vector<32x128xf32>
    %cst_399 = arith.constant dense<0.000000e+00> : vector<8x128xf32>
    %1063 = tpu.matmul %1061, %1062, %cst_399 {dimension_numbers = #tpu.dot_dimension_numbers<[1], [0], [0], [1], [0, 0, 1, 1], [], []>} : vector<8x32xf32>, vector<32x128xf32>, vector<8x128xf32> -> vector<8x128xf32>
    %1064 = arith.addf %1060, %1063 : vector<8x128xf32>
    %1065 = vector.extract_strided_slice %1053 {offsets = [8, 0], sizes = [8, 32], strides = [1, 1]} : vector<16x32xf32> to vector<8x32xf32>
    %c96 = arith.constant 96 : index
    %c0_400 = arith.constant 0 : index
    %1066 = vector.load %arg9[%c96, %c0_400] : memref<128x128xf32, #tpu.memory_space<vmem>>, vector<32x128xf32>
    %cst_401 = arith.constant dense<0.000000e+00> : vector<8x128xf32>
    %1067 = tpu.matmul %1065, %1066, %cst_401 {dimension_numbers = #tpu.dot_dimension_numbers<[1], [0], [0], [1], [0, 0, 1, 1], [], []>} : vector<8x32xf32>, vector<32x128xf32>, vector<8x128xf32> -> vector<8x128xf32>
    %1068 = arith.addf %1064, %1067 : vector<8x128xf32>
    %c0_402 = arith.constant 0 : index
    %c0_403 = arith.constant 0 : index
    %1069 = vector.load %arg10[%c0_402, %c0_403] : memref<1x128xf32, #tpu.memory_space<vmem>>, vector<1x128xf32>
    %1070 = vector.broadcast %1069 : vector<1x128xf32> to vector<8x128xf32>
    %1071 = arith.addf %1068, %1070 : vector<8x128xf32>
    %cst_404 = arith.constant 0.000000e+00 : f32
    %1072 = vector.broadcast %cst_404 : f32 to vector<8x128xf32>
    %1073 = arith.maximumf %1071, %1072 : vector<8x128xf32>
    %c0_405 = arith.constant 0 : index
    %c0_406 = arith.constant 0 : index
    %1074 = vector.load %arg11[%c0_405, %c0_406] : memref<128x3xf32, #tpu.memory_space<vmem>>, vector<128x3xf32>
    %cst_407 = arith.constant dense<0.000000e+00> : vector<8x3xf32>
    %1075 = tpu.matmul %1073, %1074, %cst_407 {dimension_numbers = #tpu.dot_dimension_numbers<[1], [0], [0], [1], [0, 0, 1, 1], [], []>} : vector<8x128xf32>, vector<128x3xf32>, vector<8x3xf32> -> vector<8x3xf32>
    %c0_408 = arith.constant 0 : index
    %c0_409 = arith.constant 0 : index
    %1076 = vector.load %arg12[%c0_408, %c0_409] : memref<1x3xf32, #tpu.memory_space<vmem>>, vector<1x3xf32>
    %1077 = vector.broadcast %1076 : vector<1x3xf32> to vector<8x3xf32>
    %1078 = arith.addf %1075, %1077 : vector<8x3xf32>
    %cst_410 = arith.constant dense<0xFF800000> : vector<8xf32>
    %1079 = vector.multi_reduction <maximumf>, %1078, %cst_410 [1] : vector<8x3xf32> to vector<8xf32>
    %1080 = vector.shape_cast %1079 : vector<8xf32> to vector<8x1xf32>
    %1081 = vector.broadcast %1080 : vector<8x1xf32> to vector<8x3xf32>
    %1082 = arith.subf %1078, %1081 : vector<8x3xf32>
    %1083 = math.exp %1082 : vector<8x3xf32>
    %cst_411 = arith.constant dense<0.000000e+00> : vector<8xf32>
    %1084 = vector.multi_reduction <add>, %1083, %cst_411 [1] : vector<8x3xf32> to vector<8xf32>
    %1085 = vector.shape_cast %1084 : vector<8xf32> to vector<8x1xf32>
    %1086 = math.log %1085 : vector<8x1xf32>
    %1087 = arith.addf %1086, %1080 : vector<8x1xf32>
    %c0_412 = arith.constant 0 : index
    %c0_413 = arith.constant 0 : index
    %1088 = vector.load %arg4[%c0_412, %c0_413] : memref<8x3xf32, #tpu.memory_space<vmem>>, vector<8x3xf32>
    %1089 = arith.mulf %1078, %1088 : vector<8x3xf32>
    %cst_414 = arith.constant dense<0.000000e+00> : vector<8xf32>
    %1090 = vector.multi_reduction <add>, %1089, %cst_414 [1] : vector<8x3xf32> to vector<8xf32>
    %1091 = vector.shape_cast %1090 : vector<8xf32> to vector<8x1xf32>
    %1092 = arith.subf %1087, %1091 : vector<8x1xf32>
    %cst_415 = arith.constant 0.000000e+00 : f32
    %1093 = vector.broadcast %cst_415 : f32 to vector<8x124xf32>
    %1094 = tpu.concatenate %1078, %1092, %1093 in 1 : vector<8x3xf32>, vector<8x1xf32>, vector<8x124xf32> -> vector<8x128xf32>
    %c0_416 = arith.constant 0 : index
    %c0_417 = arith.constant 0 : index
    %1095 = vector.load %arg13[%c0_416, %c0_417] : memref<8x128xf32, #tpu.memory_space<vmem>>, vector<8x128xf32>
    tpu.vector_store %arg13[%c0_416, %c0_417], %1094 {strides = array<i32>} : memref<8x128xf32, #tpu.memory_space<vmem>>, vector<8x128xf32>,
    return
  }
  func.func @transform_0(%arg0: i32) -> (i32, i32, i32, i32) {
    %c0_i32 = arith.constant 0 : i32
    %c0_i32_0 = arith.constant 0 : i32
    %c0_i32_1 = arith.constant 0 : i32
    %c0_i32_2 = arith.constant 0 : i32
    return %c0_i32, %c0_i32_0, %arg0, %c0_i32_1 : i32, i32, i32, i32
  }
  func.func @transform_1(%arg0: i32) -> (i32, i32, i32, i32) {
    %c0_i32 = arith.constant 0 : i32
    %c0_i32_0 = arith.constant 0 : i32
    %c0_i32_1 = arith.constant 0 : i32
    %c0_i32_2 = arith.constant 0 : i32
    return %c0_i32, %c0_i32_0, %arg0, %c0_i32_1 : i32, i32, i32, i32
  }
  func.func @transform_2(%arg0: i32) -> (i32, i32, i32) {
    %c0_i32 = arith.constant 0 : i32
    %c0_i32_0 = arith.constant 0 : i32
    %c0_i32_1 = arith.constant 0 : i32
    return %c0_i32, %arg0, %c0_i32_0 : i32, i32, i32
  }
  func.func @transform_3(%arg0: i32) -> (i32, i32) {
    %c0_i32 = arith.constant 0 : i32
    %c0_i32_0 = arith.constant 0 : i32
    return %arg0, %c0_i32 : i32, i32
  }
  func.func @transform_4(%arg0: i32) -> (i32, i32) {
    %c0_i32 = arith.constant 0 : i32
    %c0_i32_0 = arith.constant 0 : i32
    %c0_i32_1 = arith.constant 0 : i32
    return %c0_i32, %c0_i32_0 : i32, i32
  }
  func.func @transform_5(%arg0: i32) -> (i32, i32) {
    %c0_i32 = arith.constant 0 : i32
    %c0_i32_0 = arith.constant 0 : i32
    %c0_i32_1 = arith.constant 0 : i32
    return %c0_i32, %c0_i32_0 : i32, i32
  }
  func.func @transform_6(%arg0: i32) -> (i32, i32) {
    %c0_i32 = arith.constant 0 : i32
    %c0_i32_0 = arith.constant 0 : i32
    %c0_i32_1 = arith.constant 0 : i32
    return %c0_i32, %c0_i32_0 : i32, i32
  }
  func.func @transform_7(%arg0: i32) -> (i32, i32) {
    %c0_i32 = arith.constant 0 : i32
    %c0_i32_0 = arith.constant 0 : i32
    %c0_i32_1 = arith.constant 0 : i32
    return %c0_i32, %c0_i32_0 : i32, i32
  }
  func.func @transform_8(%arg0: i32) -> (i32, i32) {
    %c0_i32 = arith.constant 0 : i32
    %c0_i32_0 = arith.constant 0 : i32
    %c0_i32_1 = arith.constant 0 : i32
    return %c0_i32, %c0_i32_0 : i32, i32
  }
  func.func @transform_9(%arg0: i32) -> (i32, i32) {
    %c0_i32 = arith.constant 0 : i32
    %c0_i32_0 = arith.constant 0 : i32
    %c0_i32_1 = arith.constant 0 : i32
    return %c0_i32, %c0_i32_0 : i32, i32
  }
  func.func @transform_10(%arg0: i32) -> (i32, i32) {
    %c0_i32 = arith.constant 0 : i32
    %c0_i32_0 = arith.constant 0 : i32
    %c0_i32_1 = arith.constant 0 : i32
    return %c0_i32, %c0_i32_0 : i32, i32
  }
  func.func @transform_11(%arg0: i32) -> (i32, i32) {
    %c0_i32 = arith.constant 0 : i32
    %c0_i32_0 = arith.constant 0 : i32
    %c0_i32_1 = arith.constant 0 : i32
    return %c0_i32, %c0_i32_0 : i32, i32
  }
  func.func @transform_12(%arg0: i32) -> (i32, i32) {
    %c0_i32 = arith.constant 0 : i32
    %c0_i32_0 = arith.constant 0 : i32
    return %arg0, %c0_i32 : i32, i32
  }
}

</mosaic_0001>

<bundles_post_ra>
// kernel: infersent_forward.1
= control target key start
LH: loop header
LB: loop body
LE: loop exit
PB: predicated region body
PF: predicated region fallthrough
CT: control target
= control target key end

     0   :  { %s6399_s21 = smov 0   ;;  %s6401_s22 = smov 0   ;;  %s8056_s0 = inlined_call_operand.vmem [shape: f32[12,2,16,32], index: 0, kind: input, shape index: {}]   ;;  %s8057_s1 = inlined_call_operand.vmem [shape: f32[12,2,16,32], index: 1, kind: input, shape index: {}]   ;;  %s8058_s2 = inlined_call_operand.vmem [shape: f32[2,16,1], index: 2, kind: input, shape index: {}]   ;;  %s8059_s3 = inlined_call_operand.vmem [shape: f32[16,3], index: 3, kind: input, shape index: {}]   ;;  %s8060_s4 = inlined_call_operand.vmem [shape: f32[32,256], index: 4, kind: input, shape index: {}]   ;;  %s8061_s5 = inlined_call_operand.vmem [shape: f32[1,256], index: 5, kind: input, shape index: {}]   ;;  %s8062_s6 = inlined_call_operand.vmem [shape: f32[32,128], index: 6, kind: input, shape index: {}]   ;;  %s8063_s7 = inlined_call_operand.vmem [shape: f32[32,128], index: 7, kind: input, shape index: {}]   ;;  %s8064_s8 = inlined_call_operand.vmem [shape: f32[128,128], index: 8, kind: input, shape index: {}]   ;;  %s8065_s9 = inlined_call_operand.vmem [shape: f32[1,128], index: 9, kind: input, shape index: {}]   ;;  %s8066_s10 = inlined_call_operand.vmem [shape: f32[128,3], index: 10, kind: input, shape index: {}]   ;;  %s8067_s11 = inlined_call_operand.vmem [shape: f32[1,3], index: 11, kind: input, shape index: {}]   ;;  %s8068_s12 = inlined_call_operand.vmem [shape: f32[16,128], index: 12, kind: output, shape index: {}]  }
   0x1   :  { %s6403_s23 = smov 0  }
   0x2 LB: > { %s5310_s24 = sadd.s32 4294967295, %s6326_s23   ;;  %s6416_s25 = sadd.s32 1, %s6326_s23   ;;  %s6326_s23 = sphi %s6403_s23, %s8089_s23   ;;  %s6322_s22 = sphi %s6401_s22, %s8088_s22   ;;  %s6318_s21 = sphi %s6399_s21, %s8087_s21  }
   0x3   : > { %s26_s26 = ssub.s32 %s6326_s23, %s6416_s25  ;;  %s29_s27 = sadd.s32 1, %s6322_s22 }
   0x4   : > { %p27_p0 = scmp.eq.s32.totalorder %s26_s26, 0  ;;  %p36_p1 = scmp.ne.s32.totalorder %s6322_s22, %s6318_s21 }
   0x5   : > { %p37_p2 = scmp.eq.s32.totalorder %s6326_s23, 0  ;;  %p5313_p4 = scmp.ge.s32.totalorder %s6326_s23, 2 }
   0x6   : > { %s6425_s28 = scalar_select %p27_p0, %s6322_s22, %s29_s27  }
   0x7   : > { %p6427_p3 = por %p37_p2, %p36_p1  ;;  %358 = sbr.rel (%p5313_p4) target bundleno = 49 (0x31), region = 48 }
   0xc   : > { %361 = sbr.rel (!%p6427_p3) target bundleno = 28 (0x1c), region = 52  ;;  %s363_s30 = sand.u32 (%p6427_p3), 1, %s6322_s22  }
   0xd   : > { %s5314_s13 = sshll.u32 (%p6427_p3), %s6326_s23, 3  ;;  %s5952_s14 = smul.u32 (%p6427_p3), 192, %s363_s30 }
   0xe   : > { %s6439_s17 = scalar_lea.vmem (%p6427_p3), %s8056_s0, %s5314_s13 }
   0xf   : > { %v442_v0 = vld [vmem:[%s6439_s17] sm:$0xff] (%p6427_p3)  ;;  %v444_v1 = vld [vmem:[%s6439_s17 + $0x10] sm:$0xff] (%p6427_p3)  ;;  %s6447_s18 = scalar_lea.vmem (%p6427_p3), [#allocation4], %s5952_s14 }
  0x10   : > { %v446_v2 = vld [vmem:[%s6439_s17 + $0x20] sm:$0xff] (%p6427_p3)  ;;  %v448_v3 = vld [vmem:[%s6439_s17 + $0x30] sm:$0xff] (%p6427_p3)  ;;  %443 = vst [vmem:[%s6447_s18] sm:$0xff] (%p6427_p3), %v442_v0  ;;  %445 = vst [vmem:[%s6447_s18 + $0x8] sm:$0xff] (%p6427_p3), %v444_v1 }
  0x11   : > { %v450_v4 = vld [vmem:[%s6439_s17 + $0x40] sm:$0xff]  ;;  %v452_v5 = vld [vmem:[%s6439_s17 + $0x50] sm:$0xff]  ;;  %447 = vst [vmem:[%s6447_s18 + $0x10] sm:$0xff] %v446_v2  ;;  %449 = vst [vmem:[%s6447_s18 + $0x18] sm:$0xff] %v448_v3 }
  0x12   : > { %451 = vst [vmem:[%s6447_s18 + $0x20] sm:$0xff] %v450_v4  ;;  %453 = vst [vmem:[%s6447_s18 + $0x28] sm:$0xff] %v452_v5  ;;  %v454_v6 = vld [vmem:[%s6439_s17 + $0x60] sm:$0xff]  ;;  %v456_v7 = vld [vmem:[%s6439_s17 + $0x70] sm:$0xff] }
  0x13   : > { %v458_v8 = vld [vmem:[%s6439_s17 + $0x80] sm:$0xff]  ;;  %455 = vst [vmem:[%s6447_s18 + $0x30] sm:$0xff] %v454_v6  ;;  %457 = vst [vmem:[%s6447_s18 + $0x38] sm:$0xff] %v456_v7  ;;  %v460_v9 = vld [vmem:[%s6439_s17 + $0x90] sm:$0xff] }
  0x14   : > { %459 = vst [vmem:[%s6447_s18 + $0x40] sm:$0xff] %v458_v8  ;;  %v462_v10 = vld [vmem:[%s6439_s17 + $0xa0] sm:$0xff]  ;;  %v464_v11 = vld [vmem:[%s6439_s17 + $0xb0] sm:$0xff]  ;;  %461 = vst [vmem:[%s6447_s18 + $0x48] sm:$0xff] %v460_v9 }
  0x15   : > { %463 = vst [vmem:[%s6447_s18 + $0x50] sm:$0xff] %v462_v10  ;;  %465 = vst [vmem:[%s6447_s18 + $0x58] sm:$0xff] %v464_v11  ;;  %v466_v12 = vld [vmem:[%s6439_s17 + $0xc0] sm:$0xff]  ;;  %v468_v13 = vld [vmem:[%s6439_s17 + $0xd0] sm:$0xff] }
  0x16   : > { %v470_v14 = vld [vmem:[%s6439_s17 + $0xe0] sm:$0xff]  ;;  %467 = vst [vmem:[%s6447_s18 + $0x60] sm:$0xff] %v466_v12  ;;  %469 = vst [vmem:[%s6447_s18 + $0x68] sm:$0xff] %v468_v13  ;;  %v472_v15 = vld [vmem:[%s6439_s17 + $0xf0] sm:$0xff] }
  0x17   : > { %471 = vst [vmem:[%s6447_s18 + $0x70] sm:$0xff] %v470_v14  ;;  %v474_v16 = vld [vmem:[%s6439_s17 + $0x100] sm:$0xff]  ;;  %v476_v17 = vld [vmem:[%s6439_s17 + $0x110] sm:$0xff]  ;;  %473 = vst [vmem:[%s6447_s18 + $0x78] sm:$0xff] %v472_v15 }
  0x18   : > { %475 = vst [vmem:[%s6447_s18 + $0x80] sm:$0xff] %v474_v16  ;;  %477 = vst [vmem:[%s6447_s18 + $0x88] sm:$0xff] %v476_v17  ;;  %v478_v18 = vld [vmem:[%s6439_s17 + $0x120] sm:$0xff]  ;;  %v480_v19 = vld [vmem:[%s6439_s17 + $0x130] sm:$0xff] }
  0x19   : > { %v482_v20 = vld [vmem:[%s6439_s17 + $0x140] sm:$0xff]  ;;  %479 = vst [vmem:[%s6447_s18 + $0x90] sm:$0xff] %v478_v18  ;;  %481 = vst [vmem:[%s6447_s18 + $0x98] sm:$0xff] %v480_v19  ;;  %v484_v21 = vld [vmem:[%s6439_s17 + $0x150] sm:$0xff] }
  0x1a   : > { %483 = vst [vmem:[%s6447_s18 + $0xa0] sm:$0xff] %v482_v20  ;;  %v486_v22 = vld [vmem:[%s6439_s17 + $0x160] sm:$0xff]  ;;  %v488_v23 = vld [vmem:[%s6439_s17 + $0x170] sm:$0xff]  ;;  %485 = vst [vmem:[%s6447_s18 + $0xa8] sm:$0xff] %v484_v21 }
  0x1b   : > { %487 = vst [vmem:[%s6447_s18 + $0xb0] sm:$0xff] %v486_v22  ;;  %489 = vst [vmem:[%s6447_s18 + $0xb8] sm:$0xff] %v488_v23 }
  0x1c PF: > { %495 = sbr.rel (!%p6427_p3) target bundleno = 44 (0x2c), region = 90  ;;  %s497_s19 = sand.u32 (%p6427_p3), 1, %s6322_s22  }
  0x1d   : > { %s5315_s20 = sshll.u32 (%p6427_p3), %s6326_s23, 3  ;;  %s5953_s26 = smul.u32 (%p6427_p3), 192, %s497_s19 }
  0x1e   : > { %s6498_s13 = scalar_lea.vmem (%p6427_p3), %s8057_s1, %s5315_s20 }
  0x1f   : > { %v576_v24 = vld [vmem:[%s6498_s13] sm:$0xff] (%p6427_p3)  ;;  %v578_v25 = vld [vmem:[%s6498_s13 + $0x10] sm:$0xff] (%p6427_p3)  ;;  %s6506_s14 = scalar_lea.vmem (%p6427_p3), [#allocation5], %s5953_s26 }
  0x20   : > { %v580_v26 = vld [vmem:[%s6498_s13 + $0x20] sm:$0xff] (%p6427_p3)  ;;  %v582_v27 = vld [vmem:[%s6498_s13 + $0x30] sm:$0xff] (%p6427_p3)  ;;  %577 = vst [vmem:[%s6506_s14] sm:$0xff] (%p6427_p3), %v576_v24  ;;  %579 = vst [vmem:[%s6506_s14 + $0x8] sm:$0xff] (%p6427_p3), %v578_v25 }
  0x21   : > { %v584_v28 = vld [vmem:[%s6498_s13 + $0x40] sm:$0xff]  ;;  %v586_v29 = vld [vmem:[%s6498_s13 + $0x50] sm:$0xff]  ;;  %581 = vst [vmem:[%s6506_s14 + $0x10] sm:$0xff] %v580_v26  ;;  %583 = vst [vmem:[%s6506_s14 + $0x18] sm:$0xff] %v582_v27 }
  0x22   : > { %585 = vst [vmem:[%s6506_s14 + $0x20] sm:$0xff] %v584_v28  ;;  %587 = vst [vmem:[%s6506_s14 + $0x28] sm:$0xff] %v586_v29  ;;  %v588_v30 = vld [vmem:[%s6498_s13 + $0x60] sm:$0xff]  ;;  %v590_v31 = vld [vmem:[%s6498_s13 + $0x70] sm:$0xff] }
  0x23   : > { %v592_v32 = vld [vmem:[%s6498_s13 + $0x80] sm:$0xff]  ;;  %589 = vst [vmem:[%s6506_s14 + $0x30] sm:$0xff] %v588_v30  ;;  %591 = vst [vmem:[%s6506_s14 + $0x38] sm:$0xff] %v590_v31  ;;  %v594_v33 = vld [vmem:[%s6498_s13 + $0x90] sm:$0xff] }
  0x24   : > { %593 = vst [vmem:[%s6506_s14 + $0x40] sm:$0xff] %v592_v32  ;;  %v596_v34 = vld [vmem:[%s6498_s13 + $0xa0] sm:$0xff]  ;;  %v598_v35 = vld [vmem:[%s6498_s13 + $0xb0] sm:$0xff]  ;;  %595 = vst [vmem:[%s6506_s14 + $0x48] sm:$0xff] %v594_v33 }
  0x25   : > { %597 = vst [vmem:[%s6506_s14 + $0x50] sm:$0xff] %v596_v34  ;;  %599 = vst [vmem:[%s6506_s14 + $0x58] sm:$0xff] %v598_v35  ;;  %v600_v36 = vld [vmem:[%s6498_s13 + $0xc0] sm:$0xff]  ;;  %v602_v37 = vld [vmem:[%s6498_s13 + $0xd0] sm:$0xff] }
  0x26   : > { %v604_v38 = vld [vmem:[%s6498_s13 + $0xe0] sm:$0xff]  ;;  %601 = vst [vmem:[%s6506_s14 + $0x60] sm:$0xff] %v600_v36  ;;  %603 = vst [vmem:[%s6506_s14 + $0x68] sm:$0xff] %v602_v37  ;;  %v606_v39 = vld [vmem:[%s6498_s13 + $0xf0] sm:$0xff] }
  0x27   : > { %605 = vst [vmem:[%s6506_s14 + $0x70] sm:$0xff] %v604_v38  ;;  %v608_v40 = vld [vmem:[%s6498_s13 + $0x100] sm:$0xff]  ;;  %v610_v41 = vld [vmem:[%s6498_s13 + $0x110] sm:$0xff]  ;;  %607 = vst [vmem:[%s6506_s14 + $0x78] sm:$0xff] %v606_v39 }
  0x28   : > { %609 = vst [vmem:[%s6506_s14 + $0x80] sm:$0xff] %v608_v40  ;;  %611 = vst [vmem:[%s6506_s14 + $0x88] sm:$0xff] %v610_v41  ;;  %v612_v42 = vld [vmem:[%s6498_s13 + $0x120] sm:$0xff]  ;;  %v614_v43 = vld [vmem:[%s6498_s13 + $0x130] sm:$0xff] }
  0x29   : > { %v616_v44 = vld [vmem:[%s6498_s13 + $0x140] sm:$0xff]  ;;  %613 = vst [vmem:[%s6506_s14 + $0x90] sm:$0xff] %v612_v42  ;;  %615 = vst [vmem:[%s6506_s14 + $0x98] sm:$0xff] %v614_v43  ;;  %v618_v45 = vld [vmem:[%s6498_s13 + $0x150] sm:$0xff] }
  0x2a   : > { %617 = vst [vmem:[%s6506_s14 + $0xa0] sm:$0xff] %v616_v44  ;;  %v620_v46 = vld [vmem:[%s6498_s13 + $0x160] sm:$0xff]  ;;  %v622_v47 = vld [vmem:[%s6498_s13 + $0x170] sm:$0xff]  ;;  %619 = vst [vmem:[%s6506_s14 + $0xa8] sm:$0xff] %v618_v45 }
  0x2b   : > { %621 = vst [vmem:[%s6506_s14 + $0xb0] sm:$0xff] %v620_v46  ;;  %623 = vst [vmem:[%s6506_s14 + $0xb8] sm:$0xff] %v622_v47 }
  0x2c PF: > { %629 = sbr.rel (!%p6427_p3) target bundleno = 49 (0x31), region = 128  ;;  %s631_s15 = sand.u32 (%p6427_p3), 1, %s6322_s22  }
  0x2d   : > { %s5317_s16 = sshll.u32 (%p6427_p3), %s6326_s23, 3  ;;  %s5316_s17 = sshll.u32 (%p6427_p3), %s631_s15, 4 }
  0x2e   : > { %s635_s20 = scalar_lea.vmem (%p6427_p3), %s8058_s2, %s5317_s16  ;;  %s633_s26 = scalar_lea.vmem (%p6427_p3), [#allocation6], %s5316_s17 }
  0x2f   : > { %v666_v48 = vld [vmem:[%s635_s20] sm:$0xff] (%p6427_p3)  ;;  %v668_v49 = vld [vmem:[%s635_s20 + $0x10] sm:$0xff] (%p6427_p3) }
  0x30   : > { %667 = vst [vmem:[%s633_s26] sm:$0xff] (%p6427_p3), %v666_v48  ;;  %669 = vst [vmem:[%s633_s26 + $0x8] sm:$0xff] (%p6427_p3), %v668_v49 }
  0x31 PF: > { %p5318_p5 = scmp.ge.s32.totalorder %s6326_s23, 1  ;;  %p681_p6 = scmp.lt.s32.totalorder %s6326_s23, 3 }
  0x33   : > { %p682_p7 = pnand %p5318_p5, %p681_p6 }
  0x35   : > { %685 = sbr.rel (%p682_p7) target bundleno = 9165 (0x23cd), region = 170 }
  0x3a   : > { %v793_v50 = vld [vmem:[%s8060_s4 + $0x38] sm:$0xff]  ;;  %v792_v51 = vld [vmem:[%s8060_s4 + $0x30] sm:$0xff]  ;;  %v791_v52 = vld [vmem:[%s8060_s4 + $0x28] sm:$0xff]  ;;  %s688_s16 = sand.u32 1, %s6318_s21   ;;  %v8069_v54 = vmov 0.0   ;;  %vm806_vm0 = vcmask 261120   ;;  %v796_v10 = vlaneseq }
  0x3b   : > { %5944 = vmatprep.subr.mxu1 %v793_v50  ;;  %v790_v53 = vld [vmem:[%s8060_s4 + $0x20] sm:$0xff]  ;;  %1063 = vmatprep.mubr.f32.mxu1 %v8069_v54  ;;  %s6575_s19 = smul.u32 192, %s688_s16  ;;  %v789_v55 = vld [vmem:[%s8060_s4 + $0x18] sm:$0xff]  ;;  %v788_v56 = vld [vmem:[%s8060_s4 + $0x10] sm:$0xff]  ;;  %s6329_s18 = smov 64   ;;  %vm6333_vm1 = vmmov 0  }
  0x3c   : > { %5948 = vmatpush1.msra.mxu1 %v792_v51  ;;  %903 = vmatprep.subr.mxu0 %v793_v50  ;;  %v787_v57 = vld [vmem:[%s8060_s4 + $0x8] sm:$0xff]  ;;  %v786_v58 = vld [vmem:[%s8060_s4] sm:$0xff]  ;;  %v6596_v60 = vld [vmem:[%s8062_s6 + $0x18] sm:$0xff]  ;;  %v797_v13 = vshrl.u32 %v796_v10, 7  ;;  %s6330_s20 = smov 32   ;;  %s5319_s14 = sshll.u32 %s688_s16, 4 }
  0x3d   : > { %5945 = vmatprep.subr.mxu1 %v791_v52  ;;  %904 = vmatpush1.msra.mxu0 %v792_v51  ;;  %s6590_s17 = scalar_lea.vmem [#allocation4], %s6575_s19  ;;  %v6601_v61 = vld [vmem:[%s8062_s6 + $0x10] sm:$0xff]  ;;  %v6611_v63 = vld [vmem:[%s8062_s6 + $0x8] sm:$0xff]  ;;  %v6620_v1 = vld [vmem:[%s8062_s6] sm:$0xff]  ;;  %s6757_s26 = scalar_lea.vmem [#allocation5], %s6575_s19  ;;  %vm5180_vm2 = vcmask 23552  }
  0x3e   : > { %5949 = vmatpush1.msra.mxu1 %v790_v53  ;;  %905 = vmatprep.subr.mxu0 %v791_v52  ;;  %v782_v59 = vld [vmem:[%s6590_s17 + $0xa0] sm:$0xff]  ;;  %v783_v62 = vld [vmem:[%s6590_s17 + $0xa8] sm:$0xff]  ;;  %v784_v2 = vld [vmem:[%s6590_s17 + $0xb0] sm:$0xff]  ;;  %v798_v17 = vsub.s32 0, %v797_v13  ;;  %v802_v29 = vsub.s32 1, %v797_v13  ;;  %s6331_s19 = smov 96  }
  0x3f   : > { %5946 = vmatprep.subr.mxu1 %v789_v55  ;;  %906 = vmatpush1.msra.mxu0 %v790_v53  ;;  %v762_v0 = vld [vmem:[%s6590_s17] sm:$0xff]  ;;  %v6630_v3 = vld [vmem:[%s8063_s7 + $0x18] sm:$0xff]  ;;  %v763_v4 = vld [vmem:[%s6590_s17 + $0x8] sm:$0xff]  ;;  %s704_s15 = scalar_lea.vmem [#allocation6], %s5319_s14  ;;  %p754_p8 = scmp.lt.s32.totalorder %s5310_s24, 1  ;;  %vm5200_vm3 = vcmask 31744  }
  0x40   : > { %5950 = vmatpush1.msra.mxu1 %v788_v56  ;;  %907 = vmatprep.subr.mxu0 %v789_v55  ;;  %v785_v5 = vld [vmem:[%s6590_s17 + $0xb8] sm:$0xff]  ;;  %v6653_v6 = vld [vmem:[%s8063_s7 + $0x10] sm:$0xff]  ;;  %v6662_v7 = vld [vmem:[%s8063_s7 + $0x8] sm:$0xff] }
  0x41   : > { %5947 = vmatprep.subr.mxu1 %v787_v57  ;;  %908 = vmatpush1.msra.mxu0 %v788_v56  ;;  %v6671_v8 = vld [vmem:[%s8063_s7] sm:$0xff]  ;;  %s8091_s24 = smov (!%p754_p8, %s5310_s24), 1 }
  0x42   : > { %5951 = vmatpush1.msra.mxu1 %v786_v58  ;;  %909 = vmatprep.subr.mxu0 %v787_v57  ;;  %v794_v18 = vld [vmem:[%s8061_s5] sm:$0x3]  ;;  %s5320_s16 = sshll.u32 %s8091_s24, 3 }
  0x43   : > { %5342 = vmatmul.mubr.msk.f32.vlgmr.msra.gmra.mxu1 %vm806_vm0, %v782_v59  ;;  %5601 = vmatprep.subr.mxu1 %v6596_v60  ;;  %v6705_v22 = vrot.slane %v794_v18, %v798_v17  ;;  %v6709_v32 = vrot.slane %v794_v18, %v802_v29  ;;  %s757_s30 = scalar_lea.vmem %s8059_s3, %s5320_s16 }
  0x44   : > { %5602 = vmatpush3.msra.mxu1 %v6596_v60  ;;  %1069 = vmatprep.mubr.f32.mxu1 %v8069_v54 }
  0x45   : > { %5603 = vmatprep.subr.mxu1 %v6601_v61  ;;  %910 = vmatpush1.msra.mxu0 %v786_v58 }
  0x46   : > { %5604 = vmatpush3.msra.mxu1 %v6601_v61  ;;  %943 = vmatprep.mubr.f32.mxu0 %v8069_v54 }
  0x47   : > { %5343 = vmatmul.mubr.msk.f32.gmra.mxu1 %vm806_vm0, %v783_v62  ;;  %5605 = vmatprep.subr.mxu1 %v6611_v63 }
  0x48   : > { %1075 = vmatprep.mubr.f32.mxu1 %v8069_v54  ;;  %5606 = vmatpush3.msra.mxu1 %v6611_v63 }
  0x49   : > { %5322 = vmatmul.mubr.msk.f32.vlgmr.msra.gmra.mxu0 %vm806_vm0, %v762_v0  ;;  %5607 = vmatprep.subr.mxu1 %v6620_v1 }
  0x4a   : > { %5608 = vmatpush3.msra.mxu1 %v6620_v1  ;;  %949 = vmatprep.mubr.f32.mxu0 %v8069_v54 }
  0x4b   : > { %5344 = vmatmul.mubr.msk.f32.gmra.mxu1 %vm806_vm0, %v784_v2  ;;  %5612 = vmatprep.subr.mxu1 %v6630_v3 }
  0x4c   : > { %1081 = vmatprep.mubr.f32.mxu1 %v8069_v54  ;;  %5733 = vmatprep.subr.mxu0 %v6596_v60 }
  0x4d   : > { %5323 = vmatmul.mubr.msk.f32.gmra.mxu0 %vm806_vm0, %v763_v4 }
  0x4e   : > { %955 = vmatprep.mubr.f32.mxu0 %v8069_v54  ;;  %5734 = vmatpush3.msra.mxu0 %v6596_v60 }
  0x4f   : > { %5345 = vmatmul.mubr.msk.f32.gmra.mxu1 %vm806_vm0, %v785_v5  ;;  %5735 = vmatprep.subr.mxu0 %v6601_v61 }
  0x50   : > { %5609 = vmatprep.mubr.f32.mxu1 %v8069_v54  ;;  %5736 = vmatpush3.msra.mxu0 %v6601_v61 }
  0x51   : > { %5737 = vmatprep.subr.mxu0 %v6611_v63 }
  0x52   : > { %5738 = vmatpush3.msra.mxu0 %v6611_v63 }
  0x53   : > { %5610 = vmatmul.mubr.f32.vlgmr.msra.gmra.mxu1 %v8069_v54  ;;  %5739 = vmatprep.subr.mxu0 %v6620_v1 }
  0x54   : > { %5613 = vmatpush3.msra.mxu1 %v6630_v3  ;;  %5620 = vmatprep.mubr.f32.mxu1 %v8069_v54 }
  0x55   : > { %5614 = vmatprep.subr.mxu1 %v6653_v6  ;;  %5740 = vmatpush3.msra.mxu0 %v6620_v1 }
  0x56   : > { %5615 = vmatpush3.msra.mxu1 %v6653_v6  ;;  %5755 = vmatprep.subr.mxu0 %v6596_v60 }
  0x57   : > { %5616 = vmatprep.subr.mxu1 %v6662_v7 }
  0x58   : > { %5617 = vmatpush3.msra.mxu1 %v6662_v7 }
  0x59   : > { %5618 = vmatprep.subr.mxu1 %v6671_v8 }
  0x5a   : > { %5619 = vmatpush3.msra.mxu1 %v6671_v8 }
  0x5b   : > { %5621 = vmatmul.mubr.f32.vlgmr.msra.gmra.mxu1 %v8069_v54  ;;  %5623 = vmatprep.subr.mxu1 %v6596_v60 }
  0x5c   : > { %5624 = vmatpush3.msra.mxu1 %v6596_v60 }
  0x5d   : > { %5625 = vmatprep.subr.mxu1 %v6601_v61 }
  0x5e   : > { %5626 = vmatpush3.msra.mxu1 %v6601_v61 }
  0x5f   : > { %5627 = vmatprep.subr.mxu1 %v6611_v63 }
  0x60   : > { %5628 = vmatpush3.msra.mxu1 %v6611_v63 }
  0x61   : > { %5629 = vmatprep.subr.mxu1 %v6620_v1 }
  0x62   : > { %5630 = vmatpush3.msra.mxu1 %v6620_v1 }
  0x63   : > { %5634 = vmatprep.subr.mxu1 %v6630_v3 }
 0x103   : > { %v6688_v9 = vpop.f32.mrf.mxu1 }
 0x104   : > { %8072 = vst [vmem:[#allocation7_spill] sm:$0xff] %v6688_v9 }
 0x105   : > { %v6690_v11 = vpop.f32.mrf.mxu1 }
 0x107   : > { %v6692_v12 = vpop.f32.mrf.mxu1 }
 0x108   : > { %8073 = vst [vmem:[#allocation8_spill] sm:$0xff] %v6692_v12 }
 0x109   : > { %v6694_v14 = vpop.f32.mrf.mxu1  ;;  %v945_v15 = vpop.f32.mrf.mxu0 }
 0x10a   : > { %v946_v24 = vadd.f32 %v945_v15, %v6705_v22 }
 0x10b   : > { %v6696_v16 = vpop.f32.mrf.mxu1  ;;  %v6701_v20 = vpop.f32.mrf.mxu0 }
 0x10c   : > { %8074 = vst [vmem:[#allocation9_spill] sm:$0xff] %v6696_v16  ;;  %8075 = vst [vmem:[#allocation10_spill] sm:$0xff] %v6701_v20 }
 0x10d   : > { %v1079_v19 = vpop.f32.mrf.mxu1  ;;  %v951_v25 = vpop.f32.mrf.mxu0 }
 0x10e   : > { %v952_v27 = vadd.f32 %v951_v25, %v6705_v22  ;;  %v1080_v34 = vadd.f32 %v1079_v19, %v6709_v32 }
 0x10f   : > { %v6703_v21 = vpop.f32.mrf.mxu1 }
 0x110   : > { %8076 = vst [vmem:[#allocation11_spill] sm:$0xff] %v6703_v21 }
 0x111   : > { %v1085_v23 = vpop.f32.mrf.mxu1 }
 0x112   : > { %v1086_v37 = vadd.f32 %v1085_v23, %v6709_v32 }
 0x113   : > { %v5611_v26 = vpop.f32.mrf.mxu1 }
 0x114   : > { %v1225_v31 = vadd.f32 %v5611_v26, %v952_v27 }
 0x115   : > { %v1215_v28 = vpop.f32.mrf.mxu1 }
 0x116   : > { %v1224_v30 = vadd.f32 %v1215_v28, %v946_v24  ;;  %v1312_v44 = vmul.f32 0.5, %v1225_v31 }
 0x118   : > { %5986 = vtanh.f32 %v1224_v30  ;;  %v1311_v43 = vmul.f32 0.5, %v1224_v30 }
 0x119   : > { %5988 = vtanh.f32 %v1225_v31 }
 0x11b   : > { %v5622_v33 = vpop.f32.mrf.mxu1 }
 0x11c   : > { %v1305_v38 = vadd.f32 %v5622_v33, %v1086_v37 }
 0x11d   : > { %v1295_v35 = vpop.f32.mrf.mxu1 }
 0x11e   : > { %v1304_v36 = vadd.f32 %v1295_v35, %v1080_v34  ;;  %v1356_v46 = vmul.f32 0.5, %v1305_v38  ;;  %v764_v34 = vld [vmem:[%s6590_s17 + $0x10] sm:$0xff] }
 0x11f   : > { %5324 = vmatmul.mubr.msk.f32.gmra.mxu0 %vm806_vm0, %v764_v34 }
 0x120   : > { %5990 = vtanh.f32 %v1304_v36  ;;  %v1355_v45 = vmul.f32 0.5, %v1304_v36  ;;  %961 = vmatprep.mubr.f32.mxu0 %v8069_v54 }
 0x121   : > { %5992 = vtanh.f32 %v1305_v38  ;;  %v765_v38 = vld [vmem:[%s6590_s17 + $0x18] sm:$0xff] }
 0x122   : > { %5994 = vtanh.f32 %v1311_v43 }
 0x123   : > { %5996 = vtanh.f32 %v1312_v44  ;;  %5325 = vmatmul.mubr.msk.f32.gmra.mxu0 %vm806_vm0, %v765_v38 }
 0x124   : > { %5998 = vtanh.f32 %v1355_v45  ;;  %967 = vmatprep.mubr.f32.mxu0 %v8069_v54 }
 0x125   : > { %v5987_v39 = vpop.eup %5986  ;;  %6000 = vtanh.f32 %v1356_v46 }
 0x126   : > { %1325 = vrot.lane.b32.xlu0 %v5987_v39, %s6329_s18  ;;  %v5989_v40 = vpop.eup %5988 }
 0x12a   : > { %1327 = vrot.lane.b32.xlu0 %v5989_v40, %s6329_s18 }
 0x12d   : > { %v5991_v41 = vpop.eup %5990 }
 0x12e   : > { %1369 = vrot.lane.b32.xlu1 %v5991_v41, %s6329_s18  ;;  %v5993_v42 = vpop.eup %5992 }
 0x12f   : > { %v5995_v47 = vpop.eup %5994 }
 0x130   : > { %v1315_v48 = vmul.f32 0.5, %v5995_v47  ;;  %v5997_v49 = vpop.eup %5996 }
 0x131   : > { %v1316_v50 = vmul.f32 0.5, %v5997_v49  ;;  %v5999_v52 = vpop.eup %5998  ;;  %v6760_v49 = vld [vmem:[%s6757_s26 + $0xb0] sm:$0xff] }
 0x132   : > { %1371 = vrot.lane.b32.xlu1 %v5993_v42, %s6329_s18  ;;  %v1317_v51 = vadd.f32 0.5, %v1315_v48  ;;  %v1359_v56 = vmul.f32 0.5, %v5999_v52  ;;  %v6001_v58 = vpop.eup %6000  ;;  %v6769_v52 = vld [vmem:[%s6757_s26 + $0xb8] sm:$0xff] }
 0x133   : > { %v1318_v57 = vadd.f32 0.5, %v1316_v50  ;;  %v1360_v0 = vmul.f32 0.5, %v6001_v58 }
 0x134   : > { %v1361_v2 = vadd.f32 0.5, %v1359_v56  ;;  %v1321_v17 = vmul.f32 0.0, %v1317_v51  ;;  %v6790_v56 = vpop.f32.mrf.mxu0 }
 0x135   : > { %v1362_v10 = vadd.f32 0.5, %v1360_v0  ;;  %v1322_v23 = vmul.f32 0.0, %v1318_v57  ;;  %8077 = vst [vmem:[#allocation12_spill] sm:$0xff] %v6790_v56 }
 0x136   : > { %v1365_v26 = vmul.f32 0.0, %v1361_v2 }
 0x137   : > { %v1366_v29 = vmul.f32 0.0, %v1362_v10 }
 0x198   : > { %v1326_v53 = vpop.permute.xlu0 %1325 }
 0x199   : > { %v1331_v55 = vmul.f32 %v1326_v53, %v1317_v51 }
 0x19b   : > { %1335 = vrot.lane.b32.xlu0 %v1331_v55, %s6330_s20 }
 0x19c   : > { %v1328_v59 = vpop.permute.xlu0 %1327 }
 0x19d   : > { %v1332_v62 = vmul.f32 %v1328_v59, %v1318_v57 }
 0x19f   : > { %1337 = vrot.lane.b32.xlu1 %v1332_v62, %s6330_s20 }
 0x1a0   : > { %v1370_v4 = vpop.permute.xlu1 %1369 }
 0x1a1   : > { %v1375_v5 = vmul.f32 %v1370_v4, %v1361_v2 }
 0x1a3   : > { %1379 = vrot.lane.b32.xlu0 %v1375_v5, %s6330_s20 }
 0x1a4   : > { %v1372_v13 = vpop.permute.xlu1 %1371 }
 0x1a5   : > { %v1376_v15 = vmul.f32 %v1372_v13, %v1362_v10  ;;  %v1074_v13 = vadd.f32 %v6694_v14, %v6709_v32 }
 0x1a7   : > { %1381 = vrot.lane.b32.xlu1 %v1376_v15, %s6330_s20 }
 0x20d   : > { %v1336_v18 = vpop.permute.xlu0 %1335 }
 0x20e   : > { %v6721_v19 = vadd.f32 %v1336_v18, %v1321_v17  ;;  %v1068_v17 = vadd.f32 %v6690_v11, %v6709_v32 }
 0x210   : > { %6002 = vtanh.f32 %v6721_v19 }
 0x211   : > { %v1338_v24 = vpop.permute.xlu1 %1337 }
 0x212   : > { %v6724_v25 = vadd.f32 %v1338_v24, %v1322_v23 }
 0x214   : > { %6004 = vtanh.f32 %v6724_v25 }
 0x215   : > { %v1380_v27 = vpop.permute.xlu0 %1379 }
 0x216   : > { %v6727_v28 = vadd.f32 %v1380_v27, %v1365_v26 }
 0x218   : > { %6006 = vtanh.f32 %v6727_v28 }
 0x219   : > { %v1382_v30 = vpop.permute.xlu1 %1381 }
 0x21a   : > { %v6730_v31 = vadd.f32 %v1382_v30, %v1366_v29 }
 0x21c   : > { %6008 = vtanh.f32 %v6730_v31 }
 0x21d   : > { %v6003_v33 = vpop.eup %6002 }
 0x21e   : > { %1347 = vrot.lane.b32.xlu0 %v6003_v33, %s6329_s18 }
 0x221   : > { %v6005_v35 = vpop.eup %6004 }
 0x222   : > { %1349 = vrot.lane.b32.xlu1 %v6005_v35, %s6329_s18 }
 0x225   : > { %v6007_v36 = vpop.eup %6006 }
 0x226   : > { %1391 = vrot.lane.b32.xlu0 %v6007_v36, %s6329_s18 }
 0x229   : > { %v6009_v37 = vpop.eup %6008 }
 0x22a   : > { %1393 = vrot.lane.b32.xlu1 %v6009_v37, %s6329_s18 }
 0x290   : > { %v1348_v39 = vpop.permute.xlu0 %1347 }
 0x291   : > { %v1353_v40 = vmul.f32 %v1348_v39, %v1317_v51 }
 0x293   : > { %1421 = vrot.lane.b32.xlu0 %v1353_v40, %s6330_s20 }
 0x294   : > { %v1350_v41 = vpop.permute.xlu1 %1349 }
 0x295   : > { %v1354_v42 = vmul.f32 %v1350_v41, %v1318_v57  ;;  %v957_v57 = vpop.f32.mrf.mxu0 }
 0x297   : > { %1423 = vrot.lane.b32.xlu1 %v1354_v42, %s6330_s20  ;;  %v6792_v58 = vpop.f32.mrf.mxu0 }
 0x298   : > { %v1392_v43 = vpop.permute.xlu0 %1391  ;;  %8078 = vst [vmem:[#allocation13_spill] sm:$0xff] %v6792_v58 }
 0x299   : > { %v1397_v44 = vmul.f32 %v1392_v43, %v1361_v2  ;;  %v963_v59 = vpop.f32.mrf.mxu0  ;;  %v958_v2 = vadd.f32 %v957_v57, %v6705_v22 }
 0x29a   : > { %v964_v62 = vadd.f32 %v963_v59, %v6705_v22 }
 0x29b   : > { %1401 = vrot.lane.b32.xlu0 %v1397_v44, %s6330_s20 }
 0x29c   : > { %v1394_v45 = vpop.permute.xlu1 %1393 }
 0x29d   : > { %v1398_v46 = vmul.f32 %v1394_v45, %v1362_v10 }
 0x29f   : > { %1403 = vrot.lane.b32.xlu1 %v1398_v46, %s6330_s20 }
 0x305   : > { %v6747_v47 = vpop.permute.xlu0 %1421 }
 0x306   : > { %5631 = vmatprep.mubr.msk.f32.mxu1 %vm806_vm0, %v6747_v47 }
 0x309   : > { %v6751_v48 = vpop.permute.xlu1 %1423 }
 0x30a   : > { %5632 = vmatmul.mubr.msk.f32.vlgmr.msra.gmra.mxu1 %vm806_vm0, %v6751_v48 }
 0x30b   : > { %5635 = vmatpush3.msra.mxu1 %v6630_v3 }
 0x30c   : > { %5636 = vmatprep.subr.mxu1 %v6653_v6 }
 0x30d   : > { %v1402_v50 = vpop.permute.xlu0 %1401  ;;  %5637 = vmatpush3.msra.mxu1 %v6653_v6 }
 0x30e   : > { %v6765_v51 = vmul.f32 %v6760_v49, %v1402_v50  ;;  %5638 = vmatprep.subr.mxu1 %v6662_v7 }
 0x30f   : > { %5639 = vmatpush3.msra.mxu1 %v6662_v7 }
 0x310   : > { %5642 = vmatprep.mubr.msk.f32.mxu1 %vm806_vm0, %v6765_v51  ;;  %5640 = vmatprep.subr.mxu1 %v6671_v8 }
 0x311   : > { %v1404_v53 = vpop.permute.xlu1 %1403  ;;  %5641 = vmatpush3.msra.mxu1 %v6671_v8 }
 0x312   : > { %v6777_v55 = vmul.f32 %v6769_v52, %v1404_v53  ;;  %5645 = vmatprep.subr.mxu1 %v6596_v60 }
 0x314   : > { %5643 = vmatmul.mubr.msk.f32.vlgmr.msra.gmra.mxu1 %vm806_vm0, %v6777_v55 }
 0x315   : > { %5646 = vmatpush3.msra.mxu1 %v6596_v60 }
 0x316   : > { %5647 = vmatprep.subr.mxu1 %v6601_v61 }
 0x317   : > { %5648 = vmatpush3.msra.mxu1 %v6601_v61 }
 0x318   : > { %5649 = vmatprep.subr.mxu1 %v6611_v63 }
 0x319   : > { %5650 = vmatpush3.msra.mxu1 %v6611_v63 }
 0x31a   : > { %5651 = vmatprep.subr.mxu1 %v6620_v1 }
 0x31b   : > { %5652 = vmatpush3.msra.mxu1 %v6620_v1 }
 0x31c   : > { %5656 = vmatprep.subr.mxu1 %v6630_v3 }
 0x3ca   : > { %v5633_v0 = vpop.f32.mrf.mxu1 }
 0x3cb   : > { %v1516_v4 = vadd.f32 %v5633_v0, %v964_v62 }
 0x3cc   : > { %v1506_v5 = vpop.f32.mrf.mxu1 }
 0x3cd   : > { %6010 = vtanh.f32 %v1516_v4  ;;  %v1515_v10 = vadd.f32 %v1506_v5, %v958_v2  ;;  %v1610_v29 = vmul.f32 0.5, %v1516_v4 }
 0x3cf   : > { %6012 = vtanh.f32 %v1515_v10  ;;  %v1609_v30 = vmul.f32 0.5, %v1515_v10 }
 0x3d4   : > { %v5644_v15 = vpop.f32.mrf.mxu1 }
 0x3d5   : > { %v1602_v18 = vadd.f32 %v5644_v15, %v1074_v13 }
 0x3d6   : > { %v1592_v23 = vpop.f32.mrf.mxu1 }
 0x3d7   : > { %6014 = vtanh.f32 %v1602_v18  ;;  %v1601_v24 = vadd.f32 %v1592_v23, %v1068_v17  ;;  %v1654_v33 = vmul.f32 0.5, %v1602_v18 }
 0x3d9   : > { %6016 = vtanh.f32 %v1601_v24  ;;  %v1653_v34 = vmul.f32 0.5, %v1601_v24 }
 0x3da   : > { %v6011_v26 = vpop.eup %6010  ;;  %6018 = vtanh.f32 %v1610_v29 }
 0x3db   : > { %1625 = vrot.lane.b32.xlu1 %v6011_v26, %s6329_s18  ;;  %6020 = vtanh.f32 %v1609_v30 }
 0x3dc   : > { %v6013_v27 = vpop.eup %6012  ;;  %6022 = vtanh.f32 %v1654_v33  ;;  %v766_v33 = vld [vmem:[%s6590_s17 + $0x20] sm:$0xff] }
 0x3dd   : > { %1623 = vrot.lane.b32.xlu0 %v6013_v27, %s6329_s18  ;;  %6024 = vtanh.f32 %v1653_v34  ;;  %5326 = vmatmul.mubr.msk.f32.gmra.mxu0 %vm806_vm0, %v766_v33  ;;  %v767_v34 = vld [vmem:[%s6590_s17 + $0x28] sm:$0xff] }
 0x3de   : > { %973 = vmatprep.mubr.f32.mxu0 %v8069_v54 }
 0x3df   : > { %1413 = vrot.lane.b32.xlu1 %v6730_v31, %s6331_s19 }
 0x3e1   : > { %1411 = vrot.lane.b32.xlu0 %v6727_v28, %s6331_s19  ;;  %5327 = vmatmul.mubr.msk.f32.gmra.mxu0 %vm806_vm0, %v767_v34 }
 0x3e2   : > { %979 = vmatprep.mubr.f32.mxu0 %v8069_v54 }
 0x3e4   : > { %v6015_v14 = vpop.eup %6014 }
 0x3e5   : > { %1677 = vrot.lane.b32.xlu1 %v6015_v14, %s6329_s18 }
 0x3e6   : > { %v6017_v11 = vpop.eup %6016 }
 0x3e7   : > { %1675 = vrot.lane.b32.xlu0 %v6017_v11, %s6329_s18  ;;  %v6019_v35 = vpop.eup %6018 }
 0x3e8   : > { %v6021_v36 = vpop.eup %6020  ;;  %v1614_v31 = vmul.f32 0.5, %v6019_v35  ;;  %v768_v35 = vld [vmem:[%s6590_s17 + $0x30] sm:$0xff] }
 0x3e9   : > { %v1613_v37 = vmul.f32 0.5, %v6021_v36  ;;  %v6023_v40 = vpop.eup %6022  ;;  %5328 = vmatmul.mubr.msk.f32.gmra.mxu0 %vm806_vm0, %v768_v35 }
 0x3ea   : > { %v6808_v38 = vadd.f32 0.5, %v1614_v31  ;;  %v6025_v45 = vpop.eup %6024  ;;  %v1658_v46 = vmul.f32 0.5, %v6023_v40  ;;  %985 = vmatprep.mubr.f32.mxu0 %v8069_v54  ;;  %v772_v40 = vld [vmem:[%s6590_s17 + $0x50] sm:$0xff] }
 0x3eb   : > { %v6811_v41 = vadd.f32 0.5, %v1613_v37  ;;  %v1657_v57 = vmul.f32 0.5, %v6025_v45  ;;  %v769_v37 = vld [vmem:[%s6590_s17 + $0x38] sm:$0xff]  ;;  %v776_v45 = vld [vmem:[%s6590_s17 + $0x70] sm:$0xff] }
 0x3ec   : > { %v6819_v62 = vadd.f32 0.5, %v1658_v46  ;;  %v1620_v10 = vmul.f32 %v6808_v38, %v6724_v25  ;;  %v777_v46 = vld [vmem:[%s6590_s17 + $0x78] sm:$0xff] }
 0x3ed   : > { %v6823_v4 = vadd.f32 0.5, %v1657_v57  ;;  %v1619_v15 = vmul.f32 %v6811_v41, %v6721_v19  ;;  %5329 = vmatmul.mubr.msk.f32.gmra.mxu0 %vm806_vm0, %v769_v37  ;;  %v780_v57 = vld [vmem:[%s6590_s17 + $0x90] sm:$0xff] }
 0x3ee   : > { %991 = vmatprep.mubr.f32.mxu0 %v8069_v54 }
 0x44d   : > { %v1626_v28 = vpop.permute.xlu1 %1625 }
 0x44e   : > { %v1630_v39 = vmul.f32 %v1626_v28, %v6808_v38  ;;  %v770_v28 = vld [vmem:[%s6590_s17 + $0x40] sm:$0xff] }
 0x44f   : > { %v1624_v42 = vpop.permute.xlu0 %1623  ;;  %5330 = vmatmul.mubr.msk.f32.gmra.mxu0 %vm806_vm0, %v770_v28 }
 0x450   : > { %1635 = vrot.lane.b32.xlu1 %v1630_v39, %s6330_s20  ;;  %v1629_v43 = vmul.f32 %v1624_v42, %v6811_v41  ;;  %997 = vmatprep.mubr.f32.mxu0 %v8069_v54  ;;  %v771_v39 = vld [vmem:[%s6590_s17 + $0x48] sm:$0xff]  ;;  %v773_v42 = vld [vmem:[%s6590_s17 + $0x58] sm:$0xff] }
 0x451   : > { %v1414_v44 = vpop.permute.xlu1 %1413 }
 0x452   : > { %v1418_v50 = vmul.f32 %v6769_v52, %v1414_v44  ;;  %1633 = vrot.lane.b32.xlu0 %v1629_v43, %s6330_s20  ;;  %v774_v43 = vld [vmem:[%s6590_s17 + $0x60] sm:$0xff]  ;;  %v775_v44 = vld [vmem:[%s6590_s17 + $0x68] sm:$0xff] }
 0x453   : > { %v1412_v53 = vpop.permute.xlu0 %1411  ;;  %5331 = vmatmul.mubr.msk.f32.gmra.mxu0 %vm806_vm0, %v771_v39 }
 0x454   : > { %1667 = vrot.lane.b32.xlu1 %v1418_v50, %s6330_s20  ;;  %v1417_v59 = vmul.f32 %v6760_v49, %v1412_v53  ;;  %1003 = vmatprep.mubr.f32.mxu0 %v8069_v54  ;;  %v778_v50 = vld [vmem:[%s6590_s17 + $0x80] sm:$0xff]  ;;  %v779_v53 = vld [vmem:[%s6590_s17 + $0x88] sm:$0xff] }
 0x456   : > { %1665 = vrot.lane.b32.xlu0 %v1417_v59, %s6330_s20 }
 0x457   : > { %v1678_v0 = vpop.permute.xlu1 %1677  ;;  %5332 = vmatmul.mubr.msk.f32.gmra.mxu0 %vm806_vm0, %v772_v40 }
 0x458   : > { %v1682_v2 = vmul.f32 %v1678_v0, %v6819_v62  ;;  %1009 = vmatprep.mubr.f32.mxu0 %v8069_v54 }
 0x459   : > { %v1676_v5 = vpop.permute.xlu0 %1675 }
 0x45a   : > { %1687 = vrot.lane.b32.xlu1 %v1682_v2, %s6330_s20  ;;  %v1681_v52 = vmul.f32 %v1676_v5, %v6823_v4  ;;  %v781_v2 = vld [vmem:[%s6590_s17 + $0x98] sm:$0xff] }
 0x45b   : > { %5333 = vmatmul.mubr.msk.f32.gmra.mxu0 %vm806_vm0, %v773_v42 }
 0x45c   : > { %1685 = vrot.lane.b32.xlu0 %v1681_v52, %s6330_s20  ;;  %1015 = vmatprep.mubr.f32.mxu0 %v8069_v54 }
 0x45f   : > { %5334 = vmatmul.mubr.msk.f32.gmra.mxu0 %vm806_vm0, %v774_v43 }
 0x460   : > { %1021 = vmatprep.mubr.f32.mxu0 %v8069_v54 }
 0x463   : > { %5335 = vmatmul.mubr.msk.f32.gmra.mxu0 %vm806_vm0, %v775_v44 }
 0x464   : > { %1027 = vmatprep.mubr.f32.mxu0 %v8069_v54 }
 0x467   : > { %5336 = vmatmul.mubr.msk.f32.gmra.mxu0 %vm806_vm0, %v776_v45 }
 0x468   : > { %1033 = vmatprep.mubr.f32.mxu0 %v8069_v54 }
 0x46b   : > { %5337 = vmatmul.mubr.msk.f32.gmra.mxu0 %vm806_vm0, %v777_v46 }
 0x46c   : > { %1039 = vmatprep.mubr.f32.mxu0 %v8069_v54 }
 0x46f   : > { %5338 = vmatmul.mubr.msk.f32.gmra.mxu0 %vm806_vm0, %v778_v50 }
 0x470   : > { %1045 = vmatprep.mubr.f32.mxu0 %v8069_v54 }
 0x473   : > { %5339 = vmatmul.mubr.msk.f32.gmra.mxu0 %vm806_vm0, %v779_v53 }
 0x474   : > { %1051 = vmatprep.mubr.f32.mxu0 %v8069_v54 }
 0x477   : > { %5340 = vmatmul.mubr.msk.f32.gmra.mxu0 %vm806_vm0, %v780_v57 }
 0x478   : > { %1057 = vmatprep.mubr.f32.mxu0 %v8069_v54 }
 0x47b   : > { %5341 = vmatmul.mubr.msk.f32.gmra.mxu0 %vm806_vm0, %v781_v2 }
 0x4c2   : > { %v1636_v49 = vpop.permute.xlu1 %1635 }
 0x4c3   : > { %v6830_v13 = vadd.f32 %v1636_v49, %v1620_v10 }
 0x4c4   : > { %v1634_v17 = vpop.permute.xlu0 %1633 }
 0x4c5   : > { %6026 = vtanh.f32 %v6830_v13  ;;  %v6835_v18 = vadd.f32 %v1634_v17, %v1619_v15 }
 0x4c6   : > { %v1668_v23 = vpop.permute.xlu1 %1667 }
 0x4c7   : > { %6028 = vtanh.f32 %v6835_v18  ;;  %v1672_v26 = vmul.f32 %v1668_v23, %v6819_v62 }
 0x4c8   : > { %v1666_v24 = vpop.permute.xlu0 %1665 }
 0x4c9   : > { %v1671_v14 = vmul.f32 %v1666_v24, %v6823_v4 }
 0x4cc   : > { %v1688_v25 = vpop.permute.xlu1 %1687 }
 0x4cd   : > { %v6839_v27 = vadd.f32 %v1688_v25, %v1672_v26 }
 0x4ce   : > { %v1686_v19 = vpop.permute.xlu0 %1685 }
 0x4cf   : > { %6030 = vtanh.f32 %v6839_v27  ;;  %v6843_v11 = vadd.f32 %v1686_v19, %v1671_v14  ;;  %v6945_v14 = vpop.f32.mrf.mxu0 }
 0x4d1   : > { %6032 = vtanh.f32 %v6843_v11  ;;  %v969_v19 = vpop.f32.mrf.mxu0 }
 0x4d2   : > { %v6027_v29 = vpop.eup %6026 }
 0x4d3   : > { %1647 = vrot.lane.b32.xlu1 %v6027_v29, %s6329_s18  ;;  %v6947_v29 = vpop.f32.mrf.mxu0 }
 0x4d4   : > { %v6029_v30 = vpop.eup %6028 }
 0x4d5   : > { %1645 = vrot.lane.b32.xlu0 %v6029_v30, %s6329_s18 }
 0x4dc   : > { %v6031_v36 = vpop.eup %6030 }
 0x4dd   : > { %1699 = vrot.lane.b32.xlu1 %v6031_v36, %s6329_s18 }
 0x4de   : > { %v6033_v31 = vpop.eup %6032 }
 0x4df   : > { %1697 = vrot.lane.b32.xlu0 %v6033_v31, %s6329_s18 }
 0x545   : > { %v1648_v59 = vpop.permute.xlu1 %1647 }
 0x546   : > { %v1652_v0 = vmul.f32 %v1648_v59, %v6808_v38 }
 0x547   : > { %v1646_v5 = vpop.permute.xlu0 %1645 }
 0x548   : > { %1729 = vrot.lane.b32.xlu1 %v1652_v0, %s6330_s20  ;;  %v1651_v52 = vmul.f32 %v1646_v5, %v6811_v41  ;;  %v6919_v41 = vld [vmem:[%s6757_s26 + $0xa0] sm:$0xff] }
 0x54a   : > { %1727 = vrot.lane.b32.xlu0 %v1651_v52, %s6330_s20 }
 0x54f   : > { %v1700_v10 = vpop.permute.xlu1 %1699 }
 0x550   : > { %v1704_v49 = vmul.f32 %v1700_v10, %v6819_v62  ;;  %v6923_v62 = vld [vmem:[%s6757_s26 + $0xa8] sm:$0xff] }
 0x551   : > { %v1698_v15 = vpop.permute.xlu0 %1697 }
 0x552   : > { %1709 = vrot.lane.b32.xlu1 %v1704_v49, %s6330_s20  ;;  %v1703_v38 = vmul.f32 %v1698_v15, %v6823_v4  ;;  %v970_v15 = vadd.f32 %v969_v19, %v6705_v22 }
 0x554   : > { %1707 = vrot.lane.b32.xlu0 %v1703_v38, %s6330_s20 }
 0x5ba   : > { %v6907_v23 = vpop.permute.xlu1 %1729 }
 0x5bc   : > { %v6905_v17 = vpop.permute.xlu0 %1727 }
 0x5bd   : > { %5653 = vmatprep.mubr.msk.f32.mxu1 %vm806_vm0, %v6905_v17 }
 0x5be   : > { %5654 = vmatmul.mubr.msk.f32.vlgmr.msra.gmra.mxu1 %vm806_vm0, %v6907_v23 }
 0x5bf   : > { %5657 = vmatpush3.msra.mxu1 %v6630_v3 }
 0x5c0   : > { %5658 = vmatprep.subr.mxu1 %v6653_v6 }
 0x5c1   : > { %5659 = vmatpush3.msra.mxu1 %v6653_v6 }
 0x5c2   : > { %5660 = vmatprep.subr.mxu1 %v6662_v7 }
 0x5c3   : > { %5661 = vmatpush3.msra.mxu1 %v6662_v7 }
 0x5c4   : > { %5662 = vmatprep.subr.mxu1 %v6671_v8  ;;  %v1710_v4 = vpop.permute.xlu1 %1709 }
 0x5c5   : > { %5663 = vmatpush3.msra.mxu1 %v6671_v8  ;;  %v6931_v25 = vmul.f32 %v6923_v62, %v1710_v4 }
 0x5c6   : > { %v1708_v24 = vpop.permute.xlu0 %1707  ;;  %5667 = vmatprep.subr.mxu1 %v6596_v60 }
 0x5c7   : > { %v6928_v26 = vmul.f32 %v6919_v41, %v1708_v24 }
 0x5c9   : > { %5664 = vmatprep.mubr.msk.f32.mxu1 %vm806_vm0, %v6928_v26 }
 0x5ca   : > { %5665 = vmatmul.mubr.msk.f32.vlgmr.msra.gmra.mxu1 %vm806_vm0, %v6931_v25 }
 0x5cb   : > { %5668 = vmatpush3.msra.mxu1 %v6596_v60  ;;  %v975_v60 = vpop.f32.mrf.mxu0 }
 0x5cc   : > { %5669 = vmatprep.subr.mxu1 %v6601_v61  ;;  %v976_v10 = vadd.f32 %v975_v60, %v6705_v22 }
 0x5cd   : > { %5670 = vmatpush3.msra.mxu1 %v6601_v61  ;;  %v6949_v30 = vpop.f32.mrf.mxu0 }
 0x5ce   : > { %5671 = vmatprep.subr.mxu1 %v6611_v63 }
 0x5cf   : > { %5672 = vmatpush3.msra.mxu1 %v6611_v63  ;;  %v6951_v33 = vpop.f32.mrf.mxu0 }
 0x5d0   : > { %5673 = vmatprep.subr.mxu1 %v6620_v1 }
 0x5d1   : > { %5674 = vmatpush3.msra.mxu1 %v6620_v1  ;;  %v6953_v61 = vpop.f32.mrf.mxu0 }
 0x5d2   : > { %5678 = vmatprep.subr.mxu1 %v6630_v3 }
 0x5d3   : > { %v6955_v34 = vpop.f32.mrf.mxu0 }
 0x5d5   : > { %v6957_v63 = vpop.f32.mrf.mxu0 }
 0x5d7   : > { %v6959_v35 = vpop.f32.mrf.mxu0 }
 0x5d9   : > { %v6961_v1 = vpop.f32.mrf.mxu0 }
 0x5db   : > { %v6963_v3 = vpop.f32.mrf.mxu0 }
 0x5dd   : > { %v6965_v36 = vpop.f32.mrf.mxu0 }
 0x5df   : > { %v6967_v31 = vpop.f32.mrf.mxu0 }
 0x5e1   : > { %v6969_v37 = vpop.f32.mrf.mxu0 }
 0x5e3   : > { %v6971_v28 = vpop.f32.mrf.mxu0 }
 0x5e5   : > { %v6973_v39 = vpop.f32.mrf.mxu0 }
 0x5e7   : > { %v6975_v40 = vpop.f32.mrf.mxu0 }
 0x5e9   : > { %v6977_v42 = vpop.f32.mrf.mxu0 }
 0x5eb   : > { %v6979_v43 = vpop.f32.mrf.mxu0 }
 0x5ed   : > { %v6981_v44 = vpop.f32.mrf.mxu0 }
 0x5ef   : > { %v6983_v45 = vpop.f32.mrf.mxu0 }
 0x5f1   : > { %v6985_v46 = vpop.f32.mrf.mxu0 }
 0x5f3   : > { %v6987_v50 = vpop.f32.mrf.mxu0 }
 0x5f5   : > { %v6989_v53 = vpop.f32.mrf.mxu0 }
 0x5f7   : > { %v6991_v57 = vpop.f32.mrf.mxu0 }
 0x5f9   : > { %v6993_v59 = vpop.f32.mrf.mxu0 }
 0x5fb   : > { %v6995_v0 = vpop.f32.mrf.mxu0 }
 0x5fd   : > { %v6997_v2 = vpop.f32.mrf.mxu0 }
 0x5ff   : > { %v6999_v5 = vpop.f32.mrf.mxu0 }
 0x601   : > { %v1055_v52 = vpop.f32.mrf.mxu0 }
 0x602   : > { %v1056_v20 = vadd.f32 %v1055_v52, %v6709_v32 }
 0x603   : > { %v7003_v24 = vpop.f32.mrf.mxu0 }
 0x605   : > { %v1061_v56 = vpop.f32.mrf.mxu0 }
 0x606   : > { %v1062_v21 = vadd.f32 %v1061_v56, %v6709_v32 }
 0x67e   : > { %v5655_v49 = vpop.f32.mrf.mxu1 }
 0x67f   : > { %v1822_v38 = vadd.f32 %v5655_v49, %v976_v10 }
 0x680   : > { %v1812_v4 = vpop.f32.mrf.mxu1 }
 0x681   : > { %6034 = vtanh.f32 %v1822_v38  ;;  %v1821_v54 = vadd.f32 %v1812_v4, %v970_v15 }
 0x683   : > { %6036 = vtanh.f32 %v1821_v54 }
 0x68a   : > { %v5666_v16 = vpop.f32.mrf.mxu1 }
 0x68b   : > { %v1908_v9 = vadd.f32 %v5666_v16, %v1062_v21  ;;  %v1915_v21 = vmul.f32 0.5, %v1821_v54 }
 0x68c   : > { %v1898_v58 = vpop.f32.mrf.mxu1 }
 0x68d   : > { %6038 = vtanh.f32 %v1908_v9  ;;  %v1907_v60 = vadd.f32 %v1898_v58, %v1056_v20  ;;  %v1916_v20 = vmul.f32 0.5, %v1822_v38 }
 0x68e   : > { %v6035_v12 = vpop.eup %6034 }
 0x68f   : > { %1931 = vrot.lane.b32.xlu1 %v6035_v12, %s6329_s18  ;;  %6040 = vtanh.f32 %v1907_v60  ;;  %v1960_v12 = vmul.f32 0.5, %v1908_v9  ;;  %v1959_v58 = vmul.f32 0.5, %v1907_v60 }
 0x690   : > { %v6037_v19 = vpop.eup %6036  ;;  %6042 = vtanh.f32 %v1916_v20 }
 0x691   : > { %1929 = vrot.lane.b32.xlu0 %v6037_v19, %s6329_s18  ;;  %6044 = vtanh.f32 %v1915_v21 }
 0x692   : > { %6046 = vtanh.f32 %v1960_v12 }
 0x693   : > { %1719 = vrot.lane.b32.xlu1 %v6839_v27, %s6331_s19  ;;  %6048 = vtanh.f32 %v1959_v58 }
 0x695   : > { %1717 = vrot.lane.b32.xlu0 %v6843_v11, %s6331_s19 }
 0x69a   : > { %v6039_v56 = vpop.eup %6038 }
 0x69b   : > { %1983 = vrot.lane.b32.xlu1 %v6039_v56, %s6329_s18 }
 0x69c   : > { %v6041_v16 = vpop.eup %6040 }
 0x69d   : > { %1981 = vrot.lane.b32.xlu0 %v6041_v16, %s6329_s18  ;;  %v6043_v52 = vpop.eup %6042 }
 0x69e   : > { %v6045_v10 = vpop.eup %6044  ;;  %v1920_v27 = vmul.f32 0.5, %v6043_v52 }
 0x69f   : > { %v1919_v49 = vmul.f32 0.5, %v6045_v10  ;;  %v6047_v16 = vpop.eup %6046 }
 0x6a0   : > { %v1922_v15 = vadd.f32 0.5, %v1920_v27  ;;  %v6049_v9 = vpop.eup %6048  ;;  %v1964_v60 = vmul.f32 0.5, %v6047_v16 }
 0x6a1   : > { %v1921_v19 = vadd.f32 0.5, %v1919_v49  ;;  %v1963_v58 = vmul.f32 0.5, %v6049_v9 }
 0x6a2   : > { %v1966_v52 = vadd.f32 0.5, %v1964_v60 }
 0x6a3   : > { %v1965_v49 = vadd.f32 0.5, %v1963_v58 }
 0x701   : > { %v1932_v11 = vpop.permute.xlu1 %1931 }
 0x702   : > { %v1936_v4 = vmul.f32 %v1932_v11, %v1922_v15 }
 0x703   : > { %v1930_v56 = vpop.permute.xlu0 %1929 }
 0x704   : > { %1941 = vrot.lane.b32.xlu1 %v1936_v4, %s6330_s20  ;;  %v1935_v38 = vmul.f32 %v1930_v56, %v1921_v19  ;;  %v1926_v4 = vmul.f32 %v1922_v15, %v6830_v13 }
 0x705   : > { %v1720_v54 = vpop.permute.xlu1 %1719 }
 0x706   : > { %v1724_v20 = vmul.f32 %v6923_v62, %v1720_v54  ;;  %1939 = vrot.lane.b32.xlu0 %v1935_v38, %s6330_s20 }
 0x707   : > { %v1718_v21 = vpop.permute.xlu0 %1717 }
 0x708   : > { %1973 = vrot.lane.b32.xlu1 %v1724_v20, %s6330_s20  ;;  %v1723_v12 = vmul.f32 %v6919_v41, %v1718_v21  ;;  %v1925_v41 = vmul.f32 %v1921_v19, %v6835_v18 }
 0x70a   : > { %1971 = vrot.lane.b32.xlu0 %v1723_v12, %s6330_s20 }
 0x70d   : > { %v1984_v10 = vpop.permute.xlu1 %1983 }
 0x70e   : > { %v1988_v27 = vmul.f32 %v1984_v10, %v1966_v52 }
 0x70f   : > { %v1982_v11 = vpop.permute.xlu0 %1981 }
 0x710   : > { %1993 = vrot.lane.b32.xlu1 %v1988_v27, %s6330_s20  ;;  %v1987_v62 = vmul.f32 %v1982_v11, %v1965_v49 }
 0x712   : > { %1991 = vrot.lane.b32.xlu0 %v1987_v62, %s6330_s20 }
 0x776   : > { %v1942_v56 = vpop.permute.xlu1 %1941 }
 0x777   : > { %v7024_v16 = vadd.f32 %v1942_v56, %v1926_v4 }
 0x778   : > { %v1940_v38 = vpop.permute.xlu0 %1939 }
 0x779   : > { %6050 = vtanh.f32 %v7024_v16  ;;  %v7028_v54 = vadd.f32 %v1940_v38, %v1925_v41 }
 0x77a   : > { %v1974_v20 = vpop.permute.xlu1 %1973 }
 0x77b   : > { %6052 = vtanh.f32 %v7028_v54  ;;  %v1978_v9 = vmul.f32 %v1974_v20, %v1966_v52 }
 0x77c   : > { %v1972_v60 = vpop.permute.xlu0 %1971 }
 0x77d   : > { %v1977_v58 = vmul.f32 %v1972_v60, %v1965_v49 }
 0x782   : > { %v1994_v21 = vpop.permute.xlu1 %1993 }
 0x783   : > { %v7031_v12 = vadd.f32 %v1994_v21, %v1978_v9 }
 0x784   : > { %v1992_v13 = vpop.permute.xlu0 %1991 }
 0x785   : > { %6054 = vtanh.f32 %v7031_v12  ;;  %v7034_v27 = vadd.f32 %v1992_v13, %v1977_v58 }
 0x786   : > { %v6051_v10 = vpop.eup %6050 }
 0x787   : > { %1953 = vrot.lane.b32.xlu1 %v6051_v10, %s6329_s18  ;;  %6056 = vtanh.f32 %v7034_v27 }
 0x788   : > { %v6053_v18 = vpop.eup %6052 }
 0x789   : > { %1951 = vrot.lane.b32.xlu0 %v6053_v18, %s6329_s18  ;;  %v7072_v18 = vld [vmem:[%s6757_s26 + $0x90] sm:$0xff] }
 0x792   : > { %v6055_v11 = vpop.eup %6054 }
 0x793   : > { %2005 = vrot.lane.b32.xlu1 %v6055_v11, %s6329_s18 }
 0x794   : > { %v6057_v62 = vpop.eup %6056 }
 0x795   : > { %2003 = vrot.lane.b32.xlu0 %v6057_v62, %s6329_s18 }
 0x7f9   : > { %v1954_v4 = vpop.permute.xlu1 %1953 }
 0x7fa   : > { %v1958_v56 = vmul.f32 %v1954_v4, %v1922_v15  ;;  %v7056_v15 = vld [vmem:[%s8063_s7 + $0x18] sm:$0xff]  ;;  %v988_v4 = vadd.f32 %v6955_v34, %v6705_v22 }
 0x7fb   : > { %v1952_v41 = vpop.permute.xlu0 %1951 }
 0x7fc   : > { %2035 = vrot.lane.b32.xlu1 %v1958_v56, %s6330_s20  ;;  %v1957_v38 = vmul.f32 %v1952_v41, %v1921_v19  ;;  %v7063_v19 = vld [vmem:[%s6757_s26 + $0x98] sm:$0xff]  ;;  %v982_v41 = vadd.f32 %v6951_v33, %v6705_v22 }
 0x7fe   : > { %2033 = vrot.lane.b32.xlu0 %v1957_v38, %s6330_s20 }
 0x805   : > { %v2006_v20 = vpop.permute.xlu1 %2005 }
 0x806   : > { %v2010_v9 = vmul.f32 %v2006_v20, %v1966_v52 }
 0x807   : > { %v2004_v60 = vpop.permute.xlu0 %2003 }
 0x808   : > { %2015 = vrot.lane.b32.xlu1 %v2010_v9, %s6330_s20  ;;  %v2009_v21 = vmul.f32 %v2004_v60, %v1965_v49  ;;  %v1738_v49 = vadd.f32 %v6931_v25, %v6777_v55  ;;  %v7093_v25 = vld [vmem:[%s8062_s6 + $0x10] sm:$0xff]  ;;  %v1050_v60 = vadd.f32 %v6997_v2, %v6709_v32 }
 0x80a   : > { %2013 = vrot.lane.b32.xlu0 %v2009_v21, %s6330_s20 }
 0x86e   : > { %v7047_v13 = vpop.permute.xlu1 %2035 }
 0x870   : > { %v7045_v58 = vpop.permute.xlu0 %2033 }
 0x871   : > { %5675 = vmatprep.mubr.msk.f32.mxu1 %vm806_vm0, %v7045_v58 }
 0x872   : > { %5676 = vmatmul.mubr.msk.f32.vlgmr.msra.gmra.mxu1 %vm806_vm0, %v7047_v13 }
 0x873   : > { %5679 = vmatpush3.msra.mxu1 %v7056_v15 }
 0x874   : > { %5680 = vmatprep.subr.mxu1 %v6653_v6 }
 0x875   : > { %5681 = vmatpush3.msra.mxu1 %v6653_v6  ;;  %v7077_v6 = vld [vmem:[%s8062_s6 + $0x18] sm:$0xff] }
 0x876   : > { %5682 = vmatprep.subr.mxu1 %v6662_v7 }
 0x877   : > { %5683 = vmatpush3.msra.mxu1 %v6662_v7 }
 0x878   : > { %5684 = vmatprep.subr.mxu1 %v6671_v8 }
 0x879   : > { %5685 = vmatpush3.msra.mxu1 %v6671_v8  ;;  %v1737_v8 = vadd.f32 %v6928_v26, %v6765_v51  ;;  %v7100_v51 = vld [vmem:[%s8062_s6 + $0x8] sm:$0xff]  ;;  %v7107_v26 = vld [vmem:[%s8062_s6] sm:$0xff] }
 0x87a   : > { %v2016_v52 = vpop.permute.xlu1 %2015  ;;  %5689 = vmatprep.subr.mxu1 %v7077_v6 }
 0x87b   : > { %v2020_v10 = vmul.f32 %v7063_v19, %v2016_v52  ;;  %v1044_v52 = vadd.f32 %v6993_v59, %v6709_v32 }
 0x87c   : > { %v2014_v11 = vpop.permute.xlu0 %2013 }
 0x87d   : > { %v7080_v7 = vadd.f32 %v2020_v10, %v1738_v49  ;;  %v2019_v62 = vmul.f32 %v7072_v18, %v2014_v11 }
 0x87f   : > { %v7085_v55 = vadd.f32 %v2019_v62, %v1737_v8  ;;  %5686 = vmatprep.mubr.msk.f32.mxu1 %vm806_vm0, %v2019_v62 }
 0x880   : > { %5687 = vmatmul.mubr.msk.f32.vlgmr.msra.gmra.mxu1 %vm806_vm0, %v2020_v10 }
 0x881   : > { %5690 = vmatpush3.msra.mxu1 %v7077_v6 }
 0x882   : > { %5691 = vmatprep.subr.mxu1 %v7093_v25 }
 0x883   : > { %5692 = vmatpush3.msra.mxu1 %v7093_v25 }
 0x884   : > { %5693 = vmatprep.subr.mxu1 %v7100_v51 }
 0x885   : > { %5694 = vmatpush3.msra.mxu1 %v7100_v51 }
 0x886   : > { %5695 = vmatprep.subr.mxu1 %v7107_v26 }
 0x887   : > { %5696 = vmatpush3.msra.mxu1 %v7107_v26 }
 0x888   : > { %5700 = vmatprep.subr.mxu1 %v7056_v15 }
 0x932   : > { %v5677_v56 = vpop.f32.mrf.mxu1 }
 0x933   : > { %v2128_v38 = vadd.f32 %v5677_v56, %v988_v4 }
 0x934   : > { %v2118_v20 = vpop.f32.mrf.mxu1 }
 0x935   : > { %6058 = vtanh.f32 %v2128_v38  ;;  %v2127_v9 = vadd.f32 %v2118_v20, %v982_v41  ;;  %v2222_v8 = vmul.f32 0.5, %v2128_v38 }
 0x937   : > { %6060 = vtanh.f32 %v2127_v9  ;;  %v2221_v62 = vmul.f32 0.5, %v2127_v9 }
 0x940   : > { %v5688_v21 = vpop.f32.mrf.mxu1 }
 0x941   : > { %v2214_v49 = vadd.f32 %v5688_v21, %v1050_v60 }
 0x942   : > { %v6059_v10 = vpop.eup %6058  ;;  %v2204_v11 = vpop.f32.mrf.mxu1 }
 0x943   : > { %6062 = vtanh.f32 %v2214_v49  ;;  %v2213_v34 = vadd.f32 %v2204_v11, %v1044_v52  ;;  %2237 = vrot.lane.b32.xlu1 %v6059_v10, %s6329_s18  ;;  %v2266_v4 = vmul.f32 0.5, %v2214_v49 }
 0x944   : > { %v6061_v33 = vpop.eup %6060 }
 0x945   : > { %6064 = vtanh.f32 %v2213_v34  ;;  %2235 = vrot.lane.b32.xlu0 %v6061_v33, %s6329_s18  ;;  %v2265_v41 = vmul.f32 0.5, %v2213_v34 }
 0x946   : > { %6066 = vtanh.f32 %v2222_v8 }
 0x947   : > { %2025 = vrot.lane.b32.xlu1 %v7031_v12, %s6331_s19  ;;  %6068 = vtanh.f32 %v2221_v62 }
 0x948   : > { %6070 = vtanh.f32 %v2266_v4 }
 0x949   : > { %2023 = vrot.lane.b32.xlu0 %v7034_v27, %s6331_s19  ;;  %6072 = vtanh.f32 %v2265_v41 }
 0x950   : > { %v6063_v2 = vpop.eup %6062 }
 0x951   : > { %2289 = vrot.lane.b32.xlu1 %v6063_v2, %s6329_s18 }
 0x952   : > { %v6065_v59 = vpop.eup %6064 }
 0x953   : > { %2287 = vrot.lane.b32.xlu0 %v6065_v59, %s6329_s18  ;;  %v6067_v56 = vpop.eup %6066 }
 0x954   : > { %v6069_v20 = vpop.eup %6068  ;;  %v2226_v60 = vmul.f32 0.5, %v6067_v56 }
 0x955   : > { %v2225_v12 = vmul.f32 0.5, %v6069_v20  ;;  %v6071_v2 = vpop.eup %6070 }
 0x956   : > { %v2228_v21 = vadd.f32 0.5, %v2226_v60  ;;  %v6073_v59 = vpop.eup %6072  ;;  %v2270_v8 = vmul.f32 0.5, %v6071_v2 }
 0x957   : > { %v2227_v10 = vadd.f32 0.5, %v2225_v12  ;;  %v2269_v62 = vmul.f32 0.5, %v6073_v59 }
 0x958   : > { %v2272_v4 = vadd.f32 0.5, %v2270_v8  ;;  %v2232_v12 = vmul.f32 %v2228_v21, %v7024_v16 }
 0x959   : > { %v2271_v20 = vadd.f32 0.5, %v2269_v62 }
 0x9b5   : > { %v2238_v27 = vpop.permute.xlu1 %2237 }
 0x9b6   : > { %v2242_v52 = vmul.f32 %v2238_v27, %v2228_v21 }
 0x9b7   : > { %v2236_v11 = vpop.permute.xlu0 %2235 }
 0x9b8   : > { %2247 = vrot.lane.b32.xlu1 %v2242_v52, %s6330_s20  ;;  %v2241_v33 = vmul.f32 %v2236_v11, %v2227_v10 }
 0x9b9   : > { %v2026_v38 = vpop.permute.xlu1 %2025 }
 0x9ba   : > { %v2030_v9 = vmul.f32 %v7063_v19, %v2026_v38  ;;  %2245 = vrot.lane.b32.xlu0 %v2241_v33, %s6330_s20 }
 0x9bb   : > { %v2024_v49 = vpop.permute.xlu0 %2023 }
 0x9bc   : > { %2279 = vrot.lane.b32.xlu1 %v2030_v9, %s6330_s20  ;;  %v2029_v34 = vmul.f32 %v7072_v18, %v2024_v49  ;;  %v2231_v18 = vmul.f32 %v2227_v10, %v7028_v54 }
 0x9be   : > { %2277 = vrot.lane.b32.xlu0 %v2029_v34, %s6330_s20 }
 0x9c3   : > { %v2290_v56 = vpop.permute.xlu1 %2289 }
 0x9c4   : > { %v2294_v41 = vmul.f32 %v2290_v56, %v2272_v4 }
 0x9c5   : > { %v2288_v60 = vpop.permute.xlu0 %2287 }
 0x9c6   : > { %2299 = vrot.lane.b32.xlu1 %v2294_v41, %s6330_s20  ;;  %v2293_v19 = vmul.f32 %v2288_v60, %v2271_v20 }
 0x9c8   : > { %2297 = vrot.lane.b32.xlu0 %v2293_v19, %s6330_s20 }
 0xa2a   : > { %v2248_v27 = vpop.permute.xlu1 %2247 }
 0xa2b   : > { %v7137_v52 = vadd.f32 %v2248_v27, %v2232_v12 }
 0xa2c   : > { %v2246_v11 = vpop.permute.xlu0 %2245 }
 0xa2d   : > { %6074 = vtanh.f32 %v7137_v52  ;;  %v7141_v33 = vadd.f32 %v2246_v11, %v2231_v18 }
 0xa2e   : > { %v2280_v38 = vpop.permute.xlu1 %2279 }
 0xa2f   : > { %6076 = vtanh.f32 %v7141_v33  ;;  %v2284_v9 = vmul.f32 %v2280_v38, %v2272_v4 }
 0xa30   : > { %v2278_v2 = vpop.permute.xlu0 %2277 }
 0xa31   : > { %v2283_v16 = vmul.f32 %v2278_v2, %v2271_v20 }
 0xa38   : > { %v2300_v49 = vpop.permute.xlu1 %2299 }
 0xa39   : > { %v7144_v34 = vadd.f32 %v2300_v49, %v2284_v9 }
 0xa3a   : > { %v6075_v59 = vpop.eup %6074  ;;  %v2298_v8 = vpop.permute.xlu0 %2297 }
 0xa3b   : > { %6078 = vtanh.f32 %v7144_v34  ;;  %2259 = vrot.lane.b32.xlu1 %v6075_v59, %s6329_s18  ;;  %v7148_v54 = vadd.f32 %v2298_v8, %v2283_v16  ;;  %v7194_v8 = vld [vmem:[%s6757_s26 + $0x80] sm:$0xff] }
 0xa3c   : > { %v6077_v62 = vpop.eup %6076 }
 0xa3d   : > { %6080 = vtanh.f32 %v7148_v54  ;;  %2257 = vrot.lane.b32.xlu0 %v6077_v62, %s6329_s18 }
 0xa48   : > { %v6079_v56 = vpop.eup %6078 }
 0xa49   : > { %2311 = vrot.lane.b32.xlu1 %v6079_v56, %s6329_s18 }
 0xa4a   : > { %v6081_v41 = vpop.eup %6080 }
 0xa4b   : > { %2309 = vrot.lane.b32.xlu0 %v6081_v41, %s6329_s18 }
 0xaad   : > { %v2260_v60 = vpop.permute.xlu1 %2259 }
 0xaae   : > { %v2264_v19 = vmul.f32 %v2260_v60, %v2228_v21  ;;  %v7170_v21 = vld [vmem:[%s8063_s7 + $0x10] sm:$0xff] }
 0xaaf   : > { %v2258_v12 = vpop.permute.xlu0 %2257 }
 0xab0   : > { %2341 = vrot.lane.b32.xlu1 %v2264_v19, %s6330_s20  ;;  %v2263_v27 = vmul.f32 %v2258_v12, %v2227_v10  ;;  %v7177_v10 = vld [vmem:[%s8063_s7 + $0x8] sm:$0xff]  ;;  %v994_v19 = vadd.f32 %v6959_v35, %v6705_v22 }
 0xab2   : > { %2339 = vrot.lane.b32.xlu0 %v2263_v27, %s6330_s20 }
 0xabb   : > { %v2312_v18 = vpop.permute.xlu1 %2311 }
 0xabc   : > { %v2316_v11 = vmul.f32 %v2312_v18, %v2272_v4  ;;  %v7184_v4 = vld [vmem:[%s8063_s7] sm:$0xff] }
 0xabd   : > { %v2310_v38 = vpop.permute.xlu0 %2309 }
 0xabe   : > { %2321 = vrot.lane.b32.xlu1 %v2316_v11, %s6330_s20  ;;  %v2315_v9 = vmul.f32 %v2310_v38, %v2271_v20  ;;  %v7188_v20 = vld [vmem:[%s6757_s26 + $0x88] sm:$0xff]  ;;  %v1038_v11 = vadd.f32 %v6989_v53, %v6709_v32 }
 0xac0   : > { %2319 = vrot.lane.b32.xlu0 %v2315_v9, %s6330_s20 }
 0xb22   : > { %v7160_v49 = vpop.permute.xlu1 %2341 }
 0xb24   : > { %v7158_v2 = vpop.permute.xlu0 %2339 }
 0xb25   : > { %5697 = vmatprep.mubr.msk.f32.mxu1 %vm806_vm0, %v7158_v2 }
 0xb26   : > { %5698 = vmatmul.mubr.msk.f32.vlgmr.msra.gmra.mxu1 %vm806_vm0, %v7160_v49 }
 0xb27   : > { %5701 = vmatpush3.msra.mxu1 %v7056_v15 }
 0xb28   : > { %5702 = vmatprep.subr.mxu1 %v7170_v21 }
 0xb29   : > { %5703 = vmatpush3.msra.mxu1 %v7170_v21 }
 0xb2a   : > { %5704 = vmatprep.subr.mxu1 %v7177_v10 }
 0xb2b   : > { %5705 = vmatpush3.msra.mxu1 %v7177_v10 }
 0xb2c   : > { %5706 = vmatprep.subr.mxu1 %v7184_v4 }
 0xb2d   : > { %5707 = vmatpush3.msra.mxu1 %v7184_v4 }
 0xb2e   : > { %5711 = vmatprep.subr.mxu1 %v7077_v6 }
 0xb30   : > { %v2322_v59 = vpop.permute.xlu1 %2321 }
 0xb31   : > { %v2326_v16 = vmul.f32 %v7188_v20, %v2322_v59  ;;  %v1032_v59 = vadd.f32 %v6985_v46, %v6709_v32 }
 0xb32   : > { %v2320_v56 = vpop.permute.xlu0 %2319 }
 0xb33   : > { %v7197_v62 = vadd.f32 %v2326_v16, %v7080_v7  ;;  %v2325_v41 = vmul.f32 %v7194_v8, %v2320_v56  ;;  %v1000_v7 = vadd.f32 %v6963_v3, %v6705_v22 }
 0xb35   : > { %v7201_v60 = vadd.f32 %v2325_v41, %v7085_v55  ;;  %5708 = vmatprep.mubr.msk.f32.mxu1 %vm806_vm0, %v2325_v41 }
 0xb36   : > { %5709 = vmatmul.mubr.msk.f32.vlgmr.msra.gmra.mxu1 %vm806_vm0, %v2326_v16 }
 0xb37   : > { %5712 = vmatpush3.msra.mxu1 %v7077_v6 }
 0xb38   : > { %5713 = vmatprep.subr.mxu1 %v7093_v25 }
 0xb39   : > { %5714 = vmatpush3.msra.mxu1 %v7093_v25 }
 0xb3a   : > { %5715 = vmatprep.subr.mxu1 %v7100_v51 }
 0xb3b   : > { %5716 = vmatpush3.msra.mxu1 %v7100_v51 }
 0xb3c   : > { %5717 = vmatprep.subr.mxu1 %v7107_v26 }
 0xb3d   : > { %5718 = vmatpush3.msra.mxu1 %v7107_v26 }
 0xb3e   : > { %5722 = vmatprep.subr.mxu1 %v7056_v15 }
 0xbe6   : > { %v5699_v55 = vpop.f32.mrf.mxu1 }
 0xbe7   : > { %v2434_v12 = vadd.f32 %v5699_v55, %v1000_v7 }
 0xbe8   : > { %v2424_v27 = vpop.f32.mrf.mxu1 }
 0xbe9   : > { %6082 = vtanh.f32 %v2434_v12  ;;  %v2433_v18 = vadd.f32 %v2424_v27, %v994_v19  ;;  %v2528_v41 = vmul.f32 0.5, %v2434_v12 }
 0xbeb   : > { %6084 = vtanh.f32 %v2433_v18  ;;  %v2527_v7 = vmul.f32 0.5, %v2433_v18 }
 0xbf6   : > { %v6083_v38 = vpop.eup %6082  ;;  %v5710_v9 = vpop.f32.mrf.mxu1 }
 0xbf7   : > { %v2520_v16 = vadd.f32 %v5710_v9, %v1038_v11  ;;  %2543 = vrot.lane.b32.xlu1 %v6083_v38, %s6329_s18 }
 0xbf8   : > { %v2510_v3 = vpop.f32.mrf.mxu1  ;;  %v6085_v56 = vpop.eup %6084 }
 0xbf9   : > { %6086 = vtanh.f32 %v2520_v16  ;;  %v2519_v35 = vadd.f32 %v2510_v3, %v1032_v59  ;;  %2541 = vrot.lane.b32.xlu0 %v6085_v56, %s6329_s18  ;;  %v2572_v55 = vmul.f32 0.5, %v2520_v16 }
 0xbfb   : > { %2331 = vrot.lane.b32.xlu1 %v7144_v34, %s6331_s19  ;;  %6088 = vtanh.f32 %v2519_v35  ;;  %v2571_v27 = vmul.f32 0.5, %v2519_v35 }
 0xbfc   : > { %6090 = vtanh.f32 %v2528_v41 }
 0xbfd   : > { %2329 = vrot.lane.b32.xlu0 %v7148_v54, %s6331_s19  ;;  %6092 = vtanh.f32 %v2527_v7 }
 0xbfe   : > { %6094 = vtanh.f32 %v2572_v55 }
 0xbff   : > { %6096 = vtanh.f32 %v2571_v27 }
 0xc06   : > { %v6087_v53 = vpop.eup %6086 }
 0xc07   : > { %2595 = vrot.lane.b32.xlu1 %v6087_v53, %s6329_s18 }
 0xc08   : > { %v6089_v46 = vpop.eup %6088 }
 0xc09   : > { %2593 = vrot.lane.b32.xlu0 %v6089_v46, %s6329_s18  ;;  %v6091_v19 = vpop.eup %6090 }
 0xc0a   : > { %v6093_v11 = vpop.eup %6092  ;;  %v2532_v38 = vmul.f32 0.5, %v6091_v19 }
 0xc0b   : > { %v2531_v34 = vmul.f32 0.5, %v6093_v11  ;;  %v6095_v35 = vpop.eup %6094 }
 0xc0c   : > { %v2534_v9 = vadd.f32 0.5, %v2532_v38  ;;  %v6097_v41 = vpop.eup %6096  ;;  %v2576_v7 = vmul.f32 0.5, %v6095_v35 }
 0xc0d   : > { %v2533_v3 = vadd.f32 0.5, %v2531_v34  ;;  %v2575_v55 = vmul.f32 0.5, %v6097_v41 }
 0xc0e   : > { %v2578_v19 = vadd.f32 0.5, %v2576_v7 }
 0xc0f   : > { %v2577_v38 = vadd.f32 0.5, %v2575_v55 }
 0xc69   : > { %v2544_v54 = vpop.permute.xlu1 %2543 }
 0xc6a   : > { %v2548_v59 = vmul.f32 %v2544_v54, %v2534_v9  ;;  %v2538_v54 = vmul.f32 %v2534_v9, %v7137_v52 }
 0xc6b   : > { %v2542_v56 = vpop.permute.xlu0 %2541 }
 0xc6c   : > { %2553 = vrot.lane.b32.xlu1 %v2548_v59, %s6330_s20  ;;  %v2547_v53 = vmul.f32 %v2542_v56, %v2533_v3 }
 0xc6d   : > { %v2332_v12 = vpop.permute.xlu1 %2331 }
 0xc6e   : > { %v2336_v18 = vmul.f32 %v7188_v20, %v2332_v12  ;;  %2551 = vrot.lane.b32.xlu0 %v2547_v53, %s6330_s20 }
 0xc6f   : > { %v2330_v16 = vpop.permute.xlu0 %2329 }
 0xc70   : > { %2585 = vrot.lane.b32.xlu1 %v2336_v18, %s6330_s20  ;;  %v2335_v46 = vmul.f32 %v7194_v8, %v2330_v16  ;;  %v2537_v8 = vmul.f32 %v2533_v3, %v7141_v33 }
 0xc72   : > { %2583 = vrot.lane.b32.xlu0 %v2335_v46, %s6330_s20 }
 0xc79   : > { %v2596_v27 = vpop.permute.xlu1 %2595 }
 0xc7a   : > { %v2600_v11 = vmul.f32 %v2596_v27, %v2578_v19 }
 0xc7b   : > { %v2594_v34 = vpop.permute.xlu0 %2593 }
 0xc7c   : > { %2605 = vrot.lane.b32.xlu1 %v2600_v11, %s6330_s20  ;;  %v2599_v20 = vmul.f32 %v2594_v34, %v2577_v38 }
 0xc7e   : > { %2603 = vrot.lane.b32.xlu0 %v2599_v20, %s6330_s20 }
 0xcde   : > { %v2554_v59 = vpop.permute.xlu1 %2553 }
 0xcdf   : > { %v7238_v56 = vadd.f32 %v2554_v59, %v2538_v54 }
 0xce0   : > { %v2552_v53 = vpop.permute.xlu0 %2551 }
 0xce1   : > { %6098 = vtanh.f32 %v7238_v56  ;;  %v7242_v12 = vadd.f32 %v2552_v53, %v2537_v8 }
 0xce2   : > { %v2586_v18 = vpop.permute.xlu1 %2585 }
 0xce3   : > { %6100 = vtanh.f32 %v7242_v12  ;;  %v2590_v16 = vmul.f32 %v2586_v18, %v2578_v19 }
 0xce4   : > { %v2584_v35 = vpop.permute.xlu0 %2583 }
 0xce5   : > { %v2589_v52 = vmul.f32 %v2584_v35, %v2577_v38 }
 0xcee   : > { %v6099_v46 = vpop.eup %6098  ;;  %v2606_v41 = vpop.permute.xlu1 %2605 }
 0xcef   : > { %v2610_v7 = vadd.f32 %v2606_v41, %v2590_v16  ;;  %2565 = vrot.lane.b32.xlu1 %v6099_v46, %s6329_s18  ;;  %v5378_v41 = vld [vmem:[%s6757_s26 + $0x70] sm:$0xff] }
 0xcf0   : > { %v6101_v55 = vpop.eup %6100  ;;  %v2604_v27 = vpop.permute.xlu0 %2603 }
 0xcf1   : > { %6102 = vtanh.f32 %v2610_v7  ;;  %v2609_v33 = vadd.f32 %v2604_v27, %v2589_v52  ;;  %2563 = vrot.lane.b32.xlu0 %v6101_v55, %s6329_s18 }
 0xcf3   : > { %6104 = vtanh.f32 %v2609_v33 }
 0xcfe   : > { %v6103_v11 = vpop.eup %6102 }
 0xcff   : > { %2617 = vrot.lane.b32.xlu1 %v6103_v11, %s6329_s18 }
 0xd00   : > { %v6105_v34 = vpop.eup %6104 }
 0xd01   : > { %2615 = vrot.lane.b32.xlu0 %v6105_v34, %s6329_s18  ;;  %v1012_v34 = vadd.f32 %v6971_v28, %v6705_v22 }
 0xd61   : > { %v2566_v20 = vpop.permute.xlu1 %2565 }
 0xd62   : > { %v2570_v54 = vmul.f32 %v2566_v20, %v2534_v9  ;;  %v1020_v20 = vadd.f32 %v6977_v42, %v6709_v32 }
 0xd63   : > { %v2564_v59 = vpop.permute.xlu0 %2563 }
 0xd64   : > { %2647 = vrot.lane.b32.xlu1 %v2570_v54, %s6330_s20  ;;  %v2569_v8 = vmul.f32 %v2564_v59, %v2533_v3  ;;  %v5379_v3 = vld [vmem:[%s6757_s26 + $0x78] sm:$0xff] }
 0xd66   : > { %2645 = vrot.lane.b32.xlu0 %v2569_v8, %s6330_s20 }
 0xd71   : > { %v2618_v53 = vpop.permute.xlu1 %2617 }
 0xd72   : > { %v2622_v18 = vmul.f32 %v2618_v53, %v2578_v19 }
 0xd73   : > { %v2616_v16 = vpop.permute.xlu0 %2615 }
 0xd74   : > { %2627 = vrot.lane.b32.xlu1 %v2622_v18, %s6330_s20  ;;  %v2621_v35 = vmul.f32 %v2616_v16, %v2577_v38  ;;  %v1006_v18 = vadd.f32 %v6967_v31, %v6705_v22 }
 0xd76   : > { %2625 = vrot.lane.b32.xlu0 %v2621_v35, %s6330_s20 }
 0xd78   : > { %2637 = vrot.lane.b32.xlu1 %v2610_v7, %s6331_s19 }
 0xd7a   : > { %2635 = vrot.lane.b32.xlu0 %v2609_v33, %s6331_s19  ;;  %v1026_v33 = vadd.f32 %v6981_v44, %v6709_v32 }
 0xdd6   : > { %v7257_v46 = vpop.permute.xlu1 %2647 }
 0xdd8   : > { %v7255_v9 = vpop.permute.xlu0 %2645 }
 0xdd9   : > { %5719 = vmatprep.mubr.msk.f32.mxu1 %vm806_vm0, %v7255_v9 }
 0xdda   : > { %5720 = vmatmul.mubr.msk.f32.vlgmr.msra.gmra.mxu1 %vm806_vm0, %v7257_v46 }
 0xddb   : > { %5723 = vmatpush3.msra.mxu1 %v7056_v15 }
 0xddc   : > { %5724 = vmatprep.subr.mxu1 %v7170_v21 }
 0xddd   : > { %5725 = vmatpush3.msra.mxu1 %v7170_v21 }
 0xdde   : > { %5726 = vmatprep.subr.mxu1 %v7177_v10 }
 0xddf   : > { %5727 = vmatpush3.msra.mxu1 %v7177_v10 }
 0xde0   : > { %5728 = vmatprep.subr.mxu1 %v7184_v4 }
 0xde1   : > { %5729 = vmatpush3.msra.mxu1 %v7184_v4 }
 0xde2   : > { %5744 = vmatprep.subr.mxu1 %v7056_v15 }
 0xde6   : > { %v2628_v19 = vpop.permute.xlu1 %2627 }
 0xde7   : > { %v2632_v38 = vmul.f32 %v5379_v3, %v2628_v19 }
 0xde8   : > { %v2626_v52 = vpop.permute.xlu0 %2625 }
 0xde9   : > { %v7274_v7 = vadd.f32 %v2632_v38, %v7197_v62  ;;  %v2631_v55 = vmul.f32 %v5378_v41, %v2626_v52 }
 0xdea   : > { %v2638_v19 = vpop.permute.xlu1 %2637 }
 0xdeb   : > { %v7277_v27 = vadd.f32 %v2631_v55, %v7201_v60  ;;  %5730 = vmatprep.mubr.msk.f32.mxu1 %vm806_vm0, %v2631_v55 }
 0xdec   : > { %5731 = vmatmul.mubr.msk.f32.vlgmr.msra.gmra.mxu1 %vm806_vm0, %v2632_v38  ;;  %v2642_v38 = vmul.f32 %v5379_v3, %v2638_v19  ;;  %v2636_v52 = vpop.permute.xlu0 %2635 }
 0xded   : > { %5745 = vmatpush3.msra.mxu1 %v7056_v15  ;;  %v2641_v31 = vmul.f32 %v5378_v41, %v2636_v52 }
 0xdee   : > { %5746 = vmatprep.subr.mxu1 %v7170_v21 }
 0xdef   : > { %5747 = vmatpush3.msra.mxu1 %v7170_v21 }
 0xdf0   : > { %5748 = vmatprep.subr.mxu1 %v7177_v10 }
 0xdf1   : > { %5749 = vmatpush3.msra.mxu1 %v7177_v10 }
 0xdf2   : > { %5750 = vmatprep.subr.mxu1 %v7184_v4 }
 0xdf3   : > { %5751 = vmatpush3.msra.mxu1 %v7184_v4 }
 0xdf4   : > { %5766 = vmatprep.subr.mxu1 %v7056_v15 }
 0xe9a   : > { %v5721_v62 = vpop.f32.mrf.mxu1 }
 0xe9b   : > { %v2740_v8 = vadd.f32 %v5721_v62, %v1012_v34 }
 0xe9c   : > { %v2730_v60 = vpop.f32.mrf.mxu1 }
 0xe9d   : > { %v2739_v16 = vadd.f32 %v2730_v60, %v1006_v18  ;;  %v2834_v60 = vmul.f32 0.5, %v2740_v8 }
 0xeac   : > { %v5732_v11 = vpop.f32.mrf.mxu1 }
 0xead   : > { %v2826_v54 = vadd.f32 %v5732_v11, %v1026_v33  ;;  %v2833_v33 = vmul.f32 0.5, %v2739_v16 }
 0xeae   : > { %v2816_v59 = vpop.f32.mrf.mxu1 }
 0xeaf   : > { %6106 = vtanh.f32 %v2826_v54  ;;  %v2825_v53 = vadd.f32 %v2816_v59, %v1020_v20  ;;  %v2878_v55 = vmul.f32 0.5, %v2826_v54 }
 0xeb1   : > { %6108 = vtanh.f32 %v2825_v53  ;;  %v2877_v62 = vmul.f32 0.5, %v2825_v53 }
 0xeb2   : > { %6110 = vtanh.f32 %v2740_v8 }
 0xeb3   : > { %6112 = vtanh.f32 %v2739_v16 }
 0xeb4   : > { %6114 = vtanh.f32 %v2878_v55 }
 0xeb5   : > { %6116 = vtanh.f32 %v2877_v62 }
 0xeb6   : > { %6118 = vtanh.f32 %v2834_v60 }
 0xeb7   : > { %6120 = vtanh.f32 %v2833_v33 }
 0xebc   : > { %v6107_v44 = vpop.eup %6106 }
 0xebd   : > { %2901 = vrot.lane.b32.xlu1 %v6107_v44, %s6329_s18 }
 0xebe   : > { %v6109_v35 = vpop.eup %6108 }
 0xebf   : > { %v6111_v28 = vpop.eup %6110  ;;  %2899 = vrot.lane.b32.xlu0 %v6109_v35, %s6329_s18 }
 0xec0   : > { %v6113_v42 = vpop.eup %6112 }
 0xec1   : > { %2849 = vrot.lane.b32.xlu1 %v6111_v28, %s6329_s18  ;;  %v6115_v11 = vpop.eup %6114 }
 0xec2   : > { %v6117_v34 = vpop.eup %6116  ;;  %v2882_v20 = vmul.f32 0.5, %v6115_v11 }
 0xec3   : > { %2847 = vrot.lane.b32.xlu0 %v6113_v42, %s6329_s18  ;;  %v6119_v3 = vpop.eup %6118  ;;  %v2881_v59 = vmul.f32 0.5, %v6117_v34 }
 0xec4   : > { %v6121_v18 = vpop.eup %6120  ;;  %v2838_v44 = vmul.f32 0.5, %v6119_v3  ;;  %v2884_v35 = vadd.f32 0.5, %v2882_v20 }
 0xec5   : > { %2891 = vrot.lane.b32.xlu1 %v2642_v38, %s6330_s20  ;;  %v2837_v19 = vmul.f32 0.5, %v6121_v18  ;;  %v2883_v42 = vadd.f32 0.5, %v2881_v59 }
 0xec6   : > { %v2840_v8 = vadd.f32 0.5, %v2838_v44 }
 0xec7   : > { %2889 = vrot.lane.b32.xlu0 %v2641_v31, %s6330_s20  ;;  %v2839_v52 = vadd.f32 0.5, %v2837_v19 }
 0xec8   : > { %v2844_v59 = vmul.f32 %v2840_v8, %v7238_v56 }
 0xf2f   : > { %v2902_v28 = vpop.permute.xlu1 %2901 }
 0xf30   : > { %v2906_v41 = vmul.f32 %v2902_v28, %v2884_v35 }
 0xf31   : > { %v2900_v54 = vpop.permute.xlu0 %2899 }
 0xf32   : > { %2911 = vrot.lane.b32.xlu1 %v2906_v41, %s6330_s20  ;;  %v2905_v53 = vmul.f32 %v2900_v54, %v2883_v42  ;;  %v2843_v41 = vmul.f32 %v2839_v52, %v7242_v12 }
 0xf33   : > { %v2850_v16 = vpop.permute.xlu1 %2849 }
 0xf34   : > { %v2854_v38 = vmul.f32 %v2850_v16, %v2840_v8  ;;  %2909 = vrot.lane.b32.xlu0 %v2905_v53, %s6330_s20 }
 0xf35   : > { %v2848_v31 = vpop.permute.xlu0 %2847 }
 0xf36   : > { %2859 = vrot.lane.b32.xlu1 %v2854_v38, %s6330_s20  ;;  %v2853_v55 = vmul.f32 %v2848_v31, %v2839_v52 }
 0xf37   : > { %v2892_v62 = vpop.permute.xlu1 %2891 }
 0xf38   : > { %2857 = vrot.lane.b32.xlu0 %v2853_v55, %s6330_s20  ;;  %v2896_v60 = vmul.f32 %v2892_v62, %v2884_v35 }
 0xf39   : > { %v2890_v33 = vpop.permute.xlu0 %2889 }
 0xf3a   : > { %v2895_v20 = vmul.f32 %v2890_v33, %v2883_v42 }
 0xfa4   : > { %v2912_v11 = vpop.permute.xlu1 %2911 }
 0xfa5   : > { %v2916_v34 = vadd.f32 %v2912_v11, %v2896_v60 }
 0xfa6   : > { %v2910_v3 = vpop.permute.xlu0 %2909 }
 0xfa7   : > { %6122 = vtanh.f32 %v2916_v34  ;;  %v2915_v18 = vadd.f32 %v2910_v3, %v2895_v20 }
 0xfa8   : > { %v2860_v44 = vpop.permute.xlu1 %2859 }
 0xfa9   : > { %v7308_v28 = vadd.f32 %v2860_v44, %v2844_v59  ;;  %6124 = vtanh.f32 %v2915_v18 }
 0xfaa   : > { %v2858_v19 = vpop.permute.xlu0 %2857 }
 0xfab   : > { %6126 = vtanh.f32 %v7308_v28  ;;  %v7312_v54 = vadd.f32 %v2858_v19, %v2843_v41 }
 0xfad   : > { %6128 = vtanh.f32 %v7312_v54 }
 0xfb4   : > { %v6123_v53 = vpop.eup %6122 }
 0xfb5   : > { %2923 = vrot.lane.b32.xlu1 %v6123_v53, %s6329_s18 }
 0xfb6   : > { %v6125_v16 = vpop.eup %6124 }
 0xfb7   : > { %2921 = vrot.lane.b32.xlu0 %v6125_v16, %s6329_s18  ;;  %v1008_v16 = vadd.f32 %v6969_v37, %v6709_v32 }
 0xfb8   : > { %v6127_v38 = vpop.eup %6126 }
 0xfb9   : > { %2871 = vrot.lane.b32.xlu1 %v6127_v38, %s6329_s18 }
 0xfba   : > { %v6129_v56 = vpop.eup %6128 }
 0xfbb   : > { %2869 = vrot.lane.b32.xlu0 %v6129_v56, %s6329_s18 }
0x1027   : > { %v2924_v12 = vpop.permute.xlu1 %2923 }
0x1028   : > { %v2928_v31 = vmul.f32 %v2924_v12, %v2884_v35  ;;  %v7326_v35 = vld [vmem:[%s6757_s26 + $0x68] sm:$0xff] }
0x1029   : > { %v2922_v55 = vpop.permute.xlu0 %2921 }
0x102a   : > { %2933 = vrot.lane.b32.xlu1 %v2928_v31, %s6330_s20  ;;  %v2927_v62 = vmul.f32 %v2922_v55, %v2883_v42  ;;  %v7330_v42 = vld [vmem:[%s6757_s26 + $0x60] sm:$0xff] }
0x102b   : > { %v2872_v60 = vpop.permute.xlu1 %2871 }
0x102c   : > { %v2876_v33 = vmul.f32 %v2872_v60, %v2840_v8  ;;  %2931 = vrot.lane.b32.xlu0 %v2927_v62, %s6330_s20 }
0x102d   : > { %v2870_v11 = vpop.permute.xlu0 %2869 }
0x102e   : > { %2953 = vrot.lane.b32.xlu1 %v2876_v33, %s6330_s20  ;;  %v2875_v20 = vmul.f32 %v2870_v11, %v2839_v52 }
0x1030   : > { %2951 = vrot.lane.b32.xlu0 %v2875_v20, %s6330_s20 }
0x1032   : > { %2943 = vrot.lane.b32.xlu1 %v2916_v34, %s6331_s19 }
0x1034   : > { %2941 = vrot.lane.b32.xlu0 %v2915_v18, %s6331_s19 }
0x109c   : > { %v2934_v3 = vpop.permute.xlu1 %2933 }
0x109d   : > { %v2938_v59 = vmul.f32 %v7326_v35, %v2934_v3 }
0x109e   : > { %v2932_v44 = vpop.permute.xlu0 %2931 }
0x109f   : > { %v7333_v8 = vadd.f32 %v2938_v59, %v7274_v7  ;;  %v2937_v41 = vmul.f32 %v7330_v42, %v2932_v44 }
0x10a0   : > { %v7343_v18 = vpop.permute.xlu1 %2953 }
0x10a1   : > { %v7337_v52 = vadd.f32 %v2937_v41, %v7277_v27  ;;  %5752 = vmatprep.mubr.msk.f32.mxu1 %vm806_vm0, %v2937_v41  ;;  %v1024_v27 = vadd.f32 %v6979_v43, %v6705_v22 }
0x10a2   : > { %5753 = vmatmul.mubr.msk.f32.vlgmr.msra.gmra.mxu1 %vm806_vm0, %v2938_v59  ;;  %v7341_v34 = vpop.permute.xlu0 %2951 }
0x10a3   : > { %5741 = vmatprep.mubr.msk.f32.mxu0 %vm806_vm0, %v7341_v34  ;;  %5767 = vmatpush3.msra.mxu1 %v7056_v15 }
0x10a4   : > { %5742 = vmatmul.mubr.msk.f32.vlgmr.msra.gmra.mxu0 %vm806_vm0, %v7343_v18  ;;  %5768 = vmatprep.subr.mxu1 %v7170_v21  ;;  %v2944_v12 = vpop.permute.xlu1 %2943 }
0x10a5   : > { %5756 = vmatpush3.msra.mxu0 %v7077_v6  ;;  %5769 = vmatpush3.msra.mxu1 %v7170_v21  ;;  %v2948_v37 = vmul.f32 %v7326_v35, %v2944_v12 }
0x10a6   : > { %5757 = vmatprep.subr.mxu0 %v7093_v25  ;;  %5770 = vmatprep.subr.mxu1 %v7177_v10 }
0x10a7   : > { %5758 = vmatpush3.msra.mxu0 %v7093_v25  ;;  %5771 = vmatpush3.msra.mxu1 %v7177_v10  ;;  %v1014_v25 = vadd.f32 %v6973_v39, %v6709_v32 }
0x10a8   : > { %5759 = vmatprep.subr.mxu0 %v7100_v51  ;;  %5772 = vmatprep.subr.mxu1 %v7184_v4 }
0x10a9   : > { %5760 = vmatpush3.msra.mxu0 %v7100_v51  ;;  %5773 = vmatpush3.msra.mxu1 %v7184_v4 }
0x10aa   : > { %5761 = vmatprep.subr.mxu0 %v7107_v26  ;;  %5788 = vmatprep.subr.mxu1 %v7056_v15 }
0x10ab   : > { %5762 = vmatpush3.msra.mxu0 %v7107_v26 }
0x10ac   : > { %5777 = vmatprep.subr.mxu0 %v7077_v6  ;;  %v1018_v6 = vadd.f32 %v6975_v40, %v6705_v22  ;;  %v2942_v40 = vpop.permute.xlu0 %2941 }
0x10ad   : > { %v2947_v62 = vmul.f32 %v7330_v42, %v2942_v40 }
0x1162   : > { %v5754_v7 = vpop.f32.mrf.mxu1 }
0x1163   : > { %v3132_v19 = vadd.f32 %v5754_v7, %v1014_v25 }
0x1164   : > { %v5743_v53 = vpop.f32.mrf.mxu0  ;;  %v3122_v51 = vpop.f32.mrf.mxu1 }
0x1165   : > { %6130 = vtanh.f32 %v3132_v19  ;;  %v3046_v38 = vadd.f32 %v5743_v53, %v1024_v27  ;;  %v3131_v15 = vadd.f32 %v3122_v51, %v1008_v16  ;;  %v3178_v60 = vmul.f32 0.5, %v3132_v19 }
0x1166   : > { %v3036_v56 = vpop.f32.mrf.mxu0 }
0x1167   : > { %6132 = vtanh.f32 %v3046_v38  ;;  %v3045_v39 = vadd.f32 %v3036_v56, %v1018_v6  ;;  %v3134_v33 = vmul.f32 0.5, %v3046_v38  ;;  %v3177_v11 = vmul.f32 0.5, %v3131_v15 }
0x1168   : > { %6134 = vtanh.f32 %v3131_v15 }
0x1169   : > { %6136 = vtanh.f32 %v3045_v39  ;;  %v3133_v20 = vmul.f32 0.5, %v3045_v39 }
0x116a   : > { %6138 = vtanh.f32 %v3178_v60 }
0x116b   : > { %6140 = vtanh.f32 %v3134_v33 }
0x116c   : > { %6142 = vtanh.f32 %v3177_v11 }
0x116d   : > { %6144 = vtanh.f32 %v3133_v20 }
0x1172   : > { %v6131_v26 = vpop.eup %6130 }
0x1173   : > { %3201 = vrot.lane.b32.xlu1 %v6131_v26, %s6329_s18 }
0x1174   : > { %v6133_v43 = vpop.eup %6132 }
0x1175   : > { %v6135_v31 = vpop.eup %6134 }
0x1176   : > { %3199 = vrot.lane.b32.xlu0 %v6135_v31, %s6329_s18  ;;  %v6137_v55 = vpop.eup %6136 }
0x1177   : > { %3149 = vrot.lane.b32.xlu1 %v6133_v43, %s6329_s18  ;;  %v6139_v3 = vpop.eup %6138 }
0x1178   : > { %v3182_v59 = vmul.f32 0.5, %v6139_v3  ;;  %v6141_v44 = vpop.eup %6140 }
0x1179   : > { %v6143_v41 = vpop.eup %6142  ;;  %v3138_v25 = vmul.f32 0.5, %v6141_v44 }
0x117a   : > { %3147 = vrot.lane.b32.xlu0 %v6137_v55, %s6329_s18  ;;  %v3184_v7 = vadd.f32 0.5, %v3182_v59  ;;  %v3181_v53 = vmul.f32 0.5, %v6143_v41  ;;  %v6145_v16 = vpop.eup %6144 }
0x117b   : > { %3191 = vrot.lane.b32.xlu1 %v2948_v37, %s6330_s20  ;;  %v3140_v19 = vadd.f32 0.5, %v3138_v25  ;;  %v3137_v38 = vmul.f32 0.5, %v6145_v16 }
0x117c   : > { %v3183_v15 = vadd.f32 0.5, %v3181_v53 }
0x117d   : > { %v3139_v43 = vadd.f32 0.5, %v3137_v38  ;;  %v3144_v33 = vmul.f32 %v3140_v19, %v7308_v28 }
0x117e   : > { %3189 = vrot.lane.b32.xlu0 %v2947_v62, %s6330_s20 }
0x117f   : > { %v3143_v41 = vmul.f32 %v3139_v43, %v7312_v54 }
0x11e5   : > { %v3202_v27 = vpop.permute.xlu1 %3201 }
0x11e6   : > { %v3206_v51 = vmul.f32 %v3202_v27, %v3184_v7 }
0x11e8   : > { %3211 = vrot.lane.b32.xlu1 %v3206_v51, %s6330_s20  ;;  %v3200_v26 = vpop.permute.xlu0 %3199 }
0x11e9   : > { %v3150_v56 = vpop.permute.xlu1 %3149  ;;  %v3205_v39 = vmul.f32 %v3200_v26, %v3183_v15 }
0x11ea   : > { %v3154_v6 = vmul.f32 %v3150_v56, %v3140_v19 }
0x11eb   : > { %3209 = vrot.lane.b32.xlu0 %v3205_v39, %s6330_s20 }
0x11ec   : > { %3159 = vrot.lane.b32.xlu1 %v3154_v6, %s6330_s20  ;;  %v3148_v12 = vpop.permute.xlu0 %3147 }
0x11ed   : > { %v3153_v31 = vmul.f32 %v3148_v12, %v3139_v43  ;;  %v3192_v37 = vpop.permute.xlu1 %3191 }
0x11ee   : > { %v3196_v55 = vmul.f32 %v3192_v37, %v3184_v7 }
0x11ef   : > { %3157 = vrot.lane.b32.xlu0 %v3153_v31, %s6330_s20 }
0x11f0   : > { %v3190_v60 = vpop.permute.xlu0 %3189 }
0x11f1   : > { %v3195_v20 = vmul.f32 %v3190_v60, %v3183_v15 }
0x125a   : > { %v3212_v40 = vpop.permute.xlu1 %3211 }
0x125b   : > { %v3216_v62 = vadd.f32 %v3212_v40, %v3196_v55 }
0x125d   : > { %6146 = vtanh.f32 %v3216_v62  ;;  %v3210_v59 = vpop.permute.xlu0 %3209 }
0x125e   : > { %v3160_v11 = vpop.permute.xlu1 %3159  ;;  %v3215_v44 = vadd.f32 %v3210_v59, %v3195_v20  ;;  %v7453_v20 = vld [vmem:[%s8062_s6 + $0x8] sm:$0xff] }
0x125f   : > { %v7386_v3 = vadd.f32 %v3160_v11, %v3144_v33  ;;  %v7444_v11 = vld [vmem:[%s8062_s6 + $0x10] sm:$0xff] }
0x1261   : > { %6148 = vtanh.f32 %v7386_v3  ;;  %v3158_v25 = vpop.permute.xlu0 %3157 }
0x1262   : > { %6150 = vtanh.f32 %v3215_v44  ;;  %v7390_v27 = vadd.f32 %v3158_v25, %v3143_v41 }
0x1264   : > { %6152 = vtanh.f32 %v7390_v27 }
0x126a   : > { %v6147_v53 = vpop.eup %6146 }
0x126b   : > { %3223 = vrot.lane.b32.xlu1 %v6147_v53, %s6329_s18  ;;  %v996_v53 = vadd.f32 %v6961_v1, %v6709_v32 }
0x126e   : > { %v6149_v28 = vpop.eup %6148 }
0x126f   : > { %3171 = vrot.lane.b32.xlu1 %v6149_v28, %s6329_s18  ;;  %v6151_v51 = vpop.eup %6150 }
0x1270   : > { %3221 = vrot.lane.b32.xlu0 %v6151_v51, %s6329_s18 }
0x1271   : > { %v6153_v16 = vpop.eup %6152 }
0x1274   : > { %3169 = vrot.lane.b32.xlu0 %v6153_v16, %s6329_s18 }
0x12dd   : > { %v3224_v56 = vpop.permute.xlu1 %3223 }
0x12de   : > { %v3228_v54 = vmul.f32 %v3224_v56, %v3184_v7  ;;  %v7404_v7 = vld [vmem:[%s6757_s26 + $0x58] sm:$0xff]  ;;  %v1030_v56 = vadd.f32 %v6983_v45, %v6705_v22 }
0x12e0   : > { %3233 = vrot.lane.b32.xlu1 %v3228_v54, %s6330_s20 }
0x12e1   : > { %v3172_v38 = vpop.permute.xlu1 %3171 }
0x12e2   : > { %v3176_v6 = vmul.f32 %v3172_v38, %v3140_v19  ;;  %v3222_v26 = vpop.permute.xlu0 %3221 }
0x12e3   : > { %v3227_v39 = vmul.f32 %v3222_v26, %v3183_v15  ;;  %v7411_v15 = vld [vmem:[%s6757_s26 + $0x50] sm:$0xff] }
0x12e4   : > { %3253 = vrot.lane.b32.xlu1 %v3176_v6, %s6330_s20 }
0x12e5   : > { %3231 = vrot.lane.b32.xlu0 %v3227_v39, %s6330_s20 }
0x12e6   : > { %v3170_v12 = vpop.permute.xlu0 %3169 }
0x12e7   : > { %v3175_v31 = vmul.f32 %v3170_v12, %v3139_v43 }
0x12e8   : > { %3243 = vrot.lane.b32.xlu1 %v3216_v62, %s6331_s19 }
0x12e9   : > { %3251 = vrot.lane.b32.xlu0 %v3175_v31, %s6330_s20 }
0x12ed   : > { %3241 = vrot.lane.b32.xlu0 %v3215_v44, %s6331_s19 }
0x1352   : > { %v3234_v37 = vpop.permute.xlu1 %3233 }
0x1353   : > { %v3238_v55 = vmul.f32 %v7404_v7, %v3234_v37 }
0x1355   : > { %v7408_v19 = vadd.f32 %v3238_v55, %v7333_v8  ;;  %v7428_v8 = vld [vmem:[%s8063_s7 + $0x18] sm:$0xff] }
0x1356   : > { %v7421_v33 = vpop.permute.xlu1 %3253 }
0x1357   : > { %v3232_v40 = vpop.permute.xlu0 %3231 }
0x1358   : > { %v3237_v60 = vmul.f32 %v7411_v15, %v3232_v40 }
0x135a   : > { %v7415_v43 = vadd.f32 %v3237_v60, %v7337_v52  ;;  %5774 = vmatprep.mubr.msk.f32.mxu1 %vm806_vm0, %v3237_v60  ;;  %v7437_v52 = vld [vmem:[%s8062_s6 + $0x18] sm:$0xff]  ;;  %v3244_v38 = vpop.permute.xlu1 %3243 }
0x135b   : > { %5775 = vmatmul.mubr.msk.f32.vlgmr.msra.gmra.mxu1 %vm806_vm0, %v3238_v55  ;;  %v7419_v62 = vpop.permute.xlu0 %3251  ;;  %v3248_v1 = vmul.f32 %v7404_v7, %v3244_v38 }
0x135c   : > { %5763 = vmatprep.mubr.msk.f32.mxu0 %vm806_vm0, %v7419_v62  ;;  %5789 = vmatpush3.msra.mxu1 %v7428_v8 }
0x135d   : > { %5764 = vmatmul.mubr.msk.f32.vlgmr.msra.gmra.mxu0 %vm806_vm0, %v7421_v33  ;;  %5790 = vmatprep.subr.mxu1 %v7170_v21 }
0x135e   : > { %5778 = vmatpush3.msra.mxu0 %v7437_v52  ;;  %5791 = vmatpush3.msra.mxu1 %v7170_v21  ;;  %v7462_v21 = vld [vmem:[%s8062_s6] sm:$0xff] }
0x135f   : > { %5779 = vmatprep.subr.mxu0 %v7444_v11  ;;  %5792 = vmatprep.subr.mxu1 %v7177_v10  ;;  %v3242_v45 = vpop.permute.xlu0 %3241 }
0x1360   : > { %5780 = vmatpush3.msra.mxu0 %v7444_v11  ;;  %5793 = vmatpush3.msra.mxu1 %v7177_v10  ;;  %v1002_v10 = vadd.f32 %v6965_v36, %v6709_v32  ;;  %v3247_v39 = vmul.f32 %v7411_v15, %v3242_v45 }
0x1361   : > { %5781 = vmatprep.subr.mxu0 %v7453_v20  ;;  %5794 = vmatprep.subr.mxu1 %v7184_v4 }
0x1362   : > { %5782 = vmatpush3.msra.mxu0 %v7453_v20  ;;  %5795 = vmatpush3.msra.mxu1 %v7184_v4  ;;  %v1036_v4 = vadd.f32 %v6987_v50, %v6705_v22 }
0x1363   : > { %5783 = vmatprep.subr.mxu0 %v7462_v21  ;;  %5810 = vmatprep.subr.mxu1 %v7428_v8 }
0x1364   : > { %5784 = vmatpush3.msra.mxu0 %v7462_v21 }
0x1365   : > { %5799 = vmatprep.subr.mxu0 %v7437_v52 }
0x141b   : > { %v5776_v59 = vpop.f32.mrf.mxu1 }
0x141c   : > { %v3432_v44 = vadd.f32 %v5776_v59, %v1002_v10 }
0x141d   : > { %v5765_v41 = vpop.f32.mrf.mxu0  ;;  %v3422_v25 = vpop.f32.mrf.mxu1 }
0x141e   : > { %6154 = vtanh.f32 %v3432_v44  ;;  %v3346_v28 = vadd.f32 %v5765_v41, %v1036_v4  ;;  %v3431_v51 = vadd.f32 %v3422_v25, %v996_v53  ;;  %v3478_v12 = vmul.f32 0.5, %v3432_v44 }
0x141f   : > { %v3336_v16 = vpop.f32.mrf.mxu0 }
0x1420   : > { %6156 = vtanh.f32 %v3346_v28  ;;  %v3345_v36 = vadd.f32 %v3336_v16, %v1030_v56  ;;  %v3434_v31 = vmul.f32 0.5, %v3346_v28  ;;  %v3477_v37 = vmul.f32 0.5, %v3431_v51 }
0x1421   : > { %6158 = vtanh.f32 %v3431_v51 }
0x1422   : > { %6160 = vtanh.f32 %v3345_v36  ;;  %v3433_v55 = vmul.f32 0.5, %v3345_v36 }
0x1423   : > { %6162 = vtanh.f32 %v3478_v12 }
0x1424   : > { %6164 = vtanh.f32 %v3434_v31 }
0x1425   : > { %6166 = vtanh.f32 %v3477_v37 }
0x1426   : > { %6168 = vtanh.f32 %v3433_v55 }
0x142b   : > { %v6155_v54 = vpop.eup %6154 }
0x142c   : > { %3501 = vrot.lane.b32.xlu1 %v6155_v54, %s6329_s18 }
0x142d   : > { %v6157_v50 = vpop.eup %6156 }
0x142e   : > { %v6159_v6 = vpop.eup %6158 }
0x142f   : > { %3499 = vrot.lane.b32.xlu0 %v6159_v6, %s6329_s18  ;;  %v6161_v26 = vpop.eup %6160 }
0x1430   : > { %3449 = vrot.lane.b32.xlu1 %v6157_v50, %s6329_s18  ;;  %v6163_v40 = vpop.eup %6162 }
0x1431   : > { %v3482_v60 = vmul.f32 0.5, %v6163_v40  ;;  %v6165_v10 = vpop.eup %6164 }
0x1432   : > { %v6167_v59 = vpop.eup %6166  ;;  %v3438_v4 = vmul.f32 0.5, %v6165_v10 }
0x1433   : > { %3447 = vrot.lane.b32.xlu0 %v6161_v26, %s6329_s18  ;;  %v3484_v41 = vadd.f32 0.5, %v3482_v60  ;;  %v3481_v53 = vmul.f32 0.5, %v6167_v59  ;;  %v6169_v56 = vpop.eup %6168 }
0x1434   : > { %3491 = vrot.lane.b32.xlu1 %v3248_v1, %s6330_s20  ;;  %v3440_v44 = vadd.f32 0.5, %v3438_v4  ;;  %v3437_v28 = vmul.f32 0.5, %v6169_v56 }
0x1435   : > { %v3483_v51 = vadd.f32 0.5, %v3481_v53 }
0x1436   : > { %v3439_v6 = vadd.f32 0.5, %v3437_v28  ;;  %v3444_v55 = vmul.f32 %v3440_v44, %v7386_v3 }
0x1437   : > { %3489 = vrot.lane.b32.xlu0 %v3247_v39, %s6330_s20 }
0x149e   : > { %v3502_v25 = vpop.permute.xlu1 %3501 }
0x149f   : > { %v3506_v16 = vmul.f32 %v3502_v25, %v3484_v41  ;;  %v3443_v25 = vmul.f32 %v3439_v6, %v7390_v27 }
0x14a1   : > { %3511 = vrot.lane.b32.xlu1 %v3506_v16, %s6330_s20  ;;  %v3500_v38 = vpop.permute.xlu0 %3499 }
0x14a2   : > { %v3450_v54 = vpop.permute.xlu1 %3449  ;;  %v3505_v36 = vmul.f32 %v3500_v38, %v3483_v51 }
0x14a3   : > { %v3454_v50 = vmul.f32 %v3450_v54, %v3440_v44 }
0x14a4   : > { %3509 = vrot.lane.b32.xlu0 %v3505_v36, %s6330_s20 }
0x14a5   : > { %3459 = vrot.lane.b32.xlu1 %v3454_v50, %s6330_s20  ;;  %v3448_v1 = vpop.permute.xlu0 %3447 }
0x14a6   : > { %v3453_v26 = vmul.f32 %v3448_v1, %v3439_v6  ;;  %v3492_v45 = vpop.permute.xlu1 %3491 }
0x14a7   : > { %v3496_v39 = vmul.f32 %v3492_v45, %v3484_v41 }
0x14a8   : > { %3457 = vrot.lane.b32.xlu0 %v3453_v26, %s6330_s20 }
0x14a9   : > { %v3490_v37 = vpop.permute.xlu0 %3489 }
0x14aa   : > { %v3495_v60 = vmul.f32 %v3490_v37, %v3483_v51 }
0x1513   : > { %v3512_v12 = vpop.permute.xlu1 %3511 }
0x1514   : > { %v3516_v31 = vadd.f32 %v3512_v12, %v3496_v39 }
0x1516   : > { %6170 = vtanh.f32 %v3516_v31  ;;  %v3510_v59 = vpop.permute.xlu0 %3509 }
0x1517   : > { %v3460_v40 = vpop.permute.xlu1 %3459  ;;  %v3515_v4 = vadd.f32 %v3510_v59, %v3495_v60  ;;  %v7552_v59 = vld [vmem:[%s8063_s7] sm:$0xff] }
0x1518   : > { %v7489_v10 = vadd.f32 %v3460_v40, %v3444_v55 }
0x151a   : > { %6172 = vtanh.f32 %v7489_v10  ;;  %v3458_v53 = vpop.permute.xlu0 %3457 }
0x151b   : > { %6174 = vtanh.f32 %v3515_v4  ;;  %v7493_v16 = vadd.f32 %v3458_v53, %v3443_v25  ;;  %v1048_v53 = vadd.f32 %v6995_v0, %v6705_v22 }
0x151d   : > { %6176 = vtanh.f32 %v7493_v16 }
0x1523   : > { %v6171_v56 = vpop.eup %6170 }
0x1524   : > { %3523 = vrot.lane.b32.xlu1 %v6171_v56, %s6329_s18 }
0x1527   : > { %v6173_v3 = vpop.eup %6172 }
0x1528   : > { %3471 = vrot.lane.b32.xlu1 %v6173_v3, %s6329_s18  ;;  %v6175_v54 = vpop.eup %6174 }
0x1529   : > { %3521 = vrot.lane.b32.xlu0 %v6175_v54, %s6329_s18 }
0x152a   : > { %v6177_v28 = vpop.eup %6176 }
0x152d   : > { %3469 = vrot.lane.b32.xlu0 %v6177_v28, %s6329_s18  ;;  %v984_v28 = vadd.f32 %v6953_v61, %v6709_v32 }
0x1596   : > { %v3524_v50 = vpop.permute.xlu1 %3523 }
0x1597   : > { %v3528_v27 = vmul.f32 %v3524_v50, %v3484_v41  ;;  %v7507_v41 = vld [vmem:[%s6757_s26 + $0x48] sm:$0xff] }
0x1599   : > { %3533 = vrot.lane.b32.xlu1 %v3528_v27, %s6330_s20 }
0x159a   : > { %v3472_v38 = vpop.permute.xlu1 %3471 }
0x159b   : > { %v3476_v36 = vmul.f32 %v3472_v38, %v3440_v44  ;;  %v3522_v1 = vpop.permute.xlu0 %3521 }
0x159c   : > { %v3527_v26 = vmul.f32 %v3522_v1, %v3483_v51  ;;  %v7514_v51 = vld [vmem:[%s6757_s26 + $0x40] sm:$0xff] }
0x159d   : > { %3553 = vrot.lane.b32.xlu1 %v3476_v36, %s6330_s20  ;;  %v1042_v36 = vadd.f32 %v6991_v57, %v6705_v22 }
0x159e   : > { %3531 = vrot.lane.b32.xlu0 %v3527_v26, %s6330_s20 }
0x159f   : > { %v3470_v45 = vpop.permute.xlu0 %3469 }
0x15a0   : > { %v3475_v39 = vmul.f32 %v3470_v45, %v3439_v6 }
0x15a1   : > { %3543 = vrot.lane.b32.xlu1 %v3516_v31, %s6331_s19 }
0x15a2   : > { %3551 = vrot.lane.b32.xlu0 %v3475_v39, %s6330_s20 }
0x15a6   : > { %3541 = vrot.lane.b32.xlu0 %v3515_v4, %s6331_s19  ;;  %v990_v4 = vadd.f32 %v6957_v63, %v6709_v32 }
0x160b   : > { %v3534_v12 = vpop.permute.xlu1 %3533 }
0x160c   : > { %v3538_v37 = vmul.f32 %v7507_v41, %v3534_v12 }
0x160e   : > { %v7511_v44 = vadd.f32 %v3538_v37, %v7408_v19  ;;  %v7534_v19 = vld [vmem:[%s8063_s7 + $0x10] sm:$0xff] }
0x160f   : > { %v7524_v60 = vpop.permute.xlu1 %3553 }
0x1610   : > { %v3532_v55 = vpop.permute.xlu0 %3531 }
0x1611   : > { %v3537_v40 = vmul.f32 %v7514_v51, %v3532_v55 }
0x1613   : > { %v7518_v6 = vadd.f32 %v3537_v40, %v7415_v43  ;;  %5796 = vmatprep.mubr.msk.f32.mxu1 %vm806_vm0, %v3537_v40  ;;  %v7543_v43 = vld [vmem:[%s8063_s7 + $0x8] sm:$0xff]  ;;  %v3544_v26 = vpop.permute.xlu1 %3543 }
0x1614   : > { %5797 = vmatmul.mubr.msk.f32.vlgmr.msra.gmra.mxu1 %vm806_vm0, %v3538_v37  ;;  %v7522_v31 = vpop.permute.xlu0 %3551  ;;  %v3548_v61 = vmul.f32 %v7507_v41, %v3544_v26 }
0x1615   : > { %5785 = vmatprep.mubr.msk.f32.mxu0 %vm806_vm0, %v7522_v31  ;;  %5811 = vmatpush3.msra.mxu1 %v7428_v8 }
0x1616   : > { %5786 = vmatmul.mubr.msk.f32.vlgmr.msra.gmra.mxu0 %vm806_vm0, %v7524_v60  ;;  %5812 = vmatprep.subr.mxu1 %v7534_v19 }
0x1617   : > { %5800 = vmatpush3.msra.mxu0 %v7437_v52  ;;  %5813 = vmatpush3.msra.mxu1 %v7534_v19 }
0x1618   : > { %5801 = vmatprep.subr.mxu0 %v7444_v11  ;;  %5814 = vmatprep.subr.mxu1 %v7543_v43  ;;  %v3542_v57 = vpop.permute.xlu0 %3541 }
0x1619   : > { %5802 = vmatpush3.msra.mxu0 %v7444_v11  ;;  %5815 = vmatpush3.msra.mxu1 %v7543_v43  ;;  %v3547_v12 = vmul.f32 %v7514_v51, %v3542_v57 }
0x161a   : > { %5803 = vmatprep.subr.mxu0 %v7453_v20  ;;  %5816 = vmatprep.subr.mxu1 %v7552_v59 }
0x161b   : > { %5804 = vmatpush3.msra.mxu0 %v7453_v20  ;;  %5817 = vmatpush3.msra.mxu1 %v7552_v59 }
0x161c   : > { %5805 = vmatprep.subr.mxu0 %v7462_v21  ;;  %5832 = vmatprep.subr.mxu1 %v7428_v8 }
0x161d   : > { %5806 = vmatpush3.msra.mxu0 %v7462_v21 }
0x161e   : > { %5821 = vmatprep.subr.mxu0 %v7437_v52 }
0x16d4   : > { %v5798_v25 = vpop.f32.mrf.mxu1 }
0x16d5   : > { %v3732_v56 = vadd.f32 %v5798_v25, %v990_v4 }
0x16d6   : > { %v5787_v3 = vpop.f32.mrf.mxu0  ;;  %v3722_v54 = vpop.f32.mrf.mxu1 }
0x16d7   : > { %6178 = vtanh.f32 %v3732_v56  ;;  %v3646_v50 = vadd.f32 %v5787_v3, %v1048_v53  ;;  %v3731_v27 = vadd.f32 %v3722_v54, %v984_v28  ;;  %v3778_v37 = vmul.f32 0.5, %v3732_v56 }
0x16d8   : > { %v3636_v38 = vpop.f32.mrf.mxu0 }
0x16d9   : > { %6180 = vtanh.f32 %v3646_v50  ;;  %v3645_v63 = vadd.f32 %v3636_v38, %v1042_v36  ;;  %v3734_v55 = vmul.f32 0.5, %v3646_v50  ;;  %v3777_v40 = vmul.f32 0.5, %v3731_v27 }
0x16da   : > { %6182 = vtanh.f32 %v3731_v27 }
0x16db   : > { %6184 = vtanh.f32 %v3645_v63  ;;  %v3733_v4 = vmul.f32 0.5, %v3645_v63 }
0x16dc   : > { %6186 = vtanh.f32 %v3778_v37 }
0x16dd   : > { %6188 = vtanh.f32 %v3734_v55 }
0x16de   : > { %6190 = vtanh.f32 %v3777_v40 }
0x16df   : > { %6192 = vtanh.f32 %v3733_v4 }
0x16e4   : > { %v6179_v1 = vpop.eup %6178 }
0x16e5   : > { %3801 = vrot.lane.b32.xlu1 %v6179_v1, %s6329_s18 }
0x16e6   : > { %v6181_v0 = vpop.eup %6180 }
0x16e7   : > { %v6183_v45 = vpop.eup %6182 }
0x16e8   : > { %3799 = vrot.lane.b32.xlu0 %v6183_v45, %s6329_s18  ;;  %v6185_v39 = vpop.eup %6184 }
0x16e9   : > { %3749 = vrot.lane.b32.xlu1 %v6181_v0, %s6329_s18  ;;  %v6187_v25 = vpop.eup %6186 }
0x16ea   : > { %v3782_v53 = vmul.f32 0.5, %v6187_v25  ;;  %v6189_v3 = vpop.eup %6188 }
0x16eb   : > { %v6191_v54 = vpop.eup %6190  ;;  %v3738_v38 = vmul.f32 0.5, %v6189_v3 }
0x16ec   : > { %3747 = vrot.lane.b32.xlu0 %v6185_v39, %s6329_s18  ;;  %v3784_v28 = vadd.f32 0.5, %v3782_v53  ;;  %v3781_v0 = vmul.f32 0.5, %v6191_v54  ;;  %v6193_v26 = vpop.eup %6192 }
0x16ed   : > { %3791 = vrot.lane.b32.xlu1 %v3548_v61, %s6330_s20  ;;  %v3740_v56 = vadd.f32 0.5, %v3738_v38  ;;  %v3737_v61 = vmul.f32 0.5, %v6193_v26 }
0x16ee   : > { %v3783_v50 = vadd.f32 0.5, %v3781_v0 }
0x16ef   : > { %v3739_v57 = vadd.f32 0.5, %v3737_v61  ;;  %v3744_v3 = vmul.f32 %v3740_v56, %v7489_v10 }
0x16f0   : > { %3789 = vrot.lane.b32.xlu0 %v3547_v12, %s6330_s20 }
0x16f1   : > { %v3743_v26 = vmul.f32 %v3739_v57, %v7493_v16 }
0x1757   : > { %v3802_v36 = vpop.permute.xlu1 %3801 }
0x1758   : > { %v3806_v1 = vmul.f32 %v3802_v36, %v3784_v28 }
0x175a   : > { %3811 = vrot.lane.b32.xlu1 %v3806_v1, %s6330_s20  ;;  %v3800_v39 = vpop.permute.xlu0 %3799 }
0x175b   : > { %v3750_v45 = vpop.permute.xlu1 %3749  ;;  %v3805_v63 = vmul.f32 %v3800_v39, %v3783_v50 }
0x175c   : > { %v3754_v27 = vmul.f32 %v3750_v45, %v3740_v56 }
0x175d   : > { %3809 = vrot.lane.b32.xlu0 %v3805_v63, %s6330_s20 }
0x175e   : > { %3759 = vrot.lane.b32.xlu1 %v3754_v27, %s6330_s20  ;;  %v3748_v12 = vpop.permute.xlu0 %3747 }
0x175f   : > { %v3753_v37 = vmul.f32 %v3748_v12, %v3739_v57  ;;  %v3792_v55 = vpop.permute.xlu1 %3791 }
0x1760   : > { %v3796_v40 = vmul.f32 %v3792_v55, %v3784_v28 }
0x1761   : > { %3757 = vrot.lane.b32.xlu0 %v3753_v37, %s6330_s20 }
0x1762   : > { %v3790_v53 = vpop.permute.xlu0 %3789 }
0x1763   : > { %v3795_v38 = vmul.f32 %v3790_v53, %v3783_v50 }
0x17cc   : > { %v3812_v4 = vpop.permute.xlu1 %3811 }
0x17cd   : > { %v3816_v25 = vadd.f32 %v3812_v4, %v3796_v40 }
0x17cf   : > { %6194 = vtanh.f32 %v3816_v25  ;;  %v3810_v1 = vpop.permute.xlu0 %3809 }
0x17d0   : > { %v3760_v54 = vpop.permute.xlu1 %3759  ;;  %v3815_v0 = vadd.f32 %v3810_v1, %v3795_v38  ;;  %v7611_v38 = vld [vmem:[%s6757_s26 + $0x38] sm:$0xff] }
0x17d1   : > { %v7582_v36 = vadd.f32 %v3760_v54, %v3744_v3 }
0x17d3   : > { %6196 = vtanh.f32 %v7582_v36  ;;  %v3758_v45 = vpop.permute.xlu0 %3757 }
0x17d4   : > { %6198 = vtanh.f32 %v3815_v0  ;;  %v7586_v27 = vadd.f32 %v3758_v45, %v3743_v26  ;;  %v7623_v26 = vld [vmem:[%s6757_s26 + $0x20] sm:$0xff] }
0x17d5   : > { %v7626_v45 = vld [vmem:[%s6757_s26] sm:$0xff] }
0x17d6   : > { %6200 = vtanh.f32 %v7586_v27 }
0x17dc   : > { %v6195_v61 = vpop.eup %6194 }
0x17dd   : > { %3823 = vrot.lane.b32.xlu1 %v6195_v61, %s6329_s18 }
0x17e0   : > { %v6197_v10 = vpop.eup %6196 }
0x17e1   : > { %3771 = vrot.lane.b32.xlu1 %v6197_v10, %s6329_s18  ;;  %v6199_v39 = vpop.eup %6198 }
0x17e2   : > { %3821 = vrot.lane.b32.xlu0 %v6199_v39, %s6329_s18  ;;  %v7633_v39 = vld [vmem:[%s6757_s26 + $0x30] sm:$0xff] }
0x17e3   : > { %v6201_v63 = vpop.eup %6200 }
0x17e6   : > { %3769 = vrot.lane.b32.xlu0 %v6201_v63, %s6329_s18  ;;  %v2958_v63 = vmul.f32 %v7404_v7, %v7343_v18 }
0x184f   : > { %v3824_v16 = vpop.permute.xlu1 %3823 }
0x1850   : > { %v3828_v12 = vmul.f32 %v3824_v16, %v3784_v28  ;;  %v7600_v28 = vld [vmem:[%s6757_s26 + $0x18] sm:$0xff] }
0x1851   : > { %v1734_v54 = vmul.f32 %v7600_v28, %v6907_v23 }
0x1852   : > { %3833 = vrot.lane.b32.xlu1 %v3828_v12, %s6330_s20 }
0x1853   : > { %v3772_v37 = vpop.permute.xlu1 %3771 }
0x1854   : > { %v3776_v55 = vmul.f32 %v3772_v37, %v3740_v56  ;;  %v3822_v40 = vpop.permute.xlu0 %3821  ;;  %v7603_v56 = vld [vmem:[%s6757_s26 + $0x28] sm:$0xff] }
0x1855   : > { %v3827_v4 = vmul.f32 %v3822_v40, %v3783_v50  ;;  %v7606_v50 = vld [vmem:[%s6757_s26 + $0x8] sm:$0xff] }
0x1856   : > { %3853 = vrot.lane.b32.xlu1 %v3776_v55, %s6330_s20  ;;  %v1428_v1 = vmul.f32 %v6751_v48, %v7606_v50  ;;  %v2039_v48 = vmul.f32 %v7623_v26, %v7045_v58  ;;  %v2651_v58 = vmul.f32 %v7514_v51, %v7255_v9  ;;  %v6295_v9 = vld [vmem:[%s6757_s26 + $0x88] sm:$0xff] }
0x1857   : > { %3831 = vrot.lane.b32.xlu0 %v3827_v4, %s6330_s20 }
0x1858   : > { %v3770_v53 = vpop.permute.xlu0 %3769  ;;  %v1736_v61 = vadd.f32 %v1734_v54, %v1428_v1  ;;  %v6296_v1 = vld [vmem:[%s6757_s26 + $0x70] sm:$0xff] }
0x1859   : > { %v3775_v3 = vmul.f32 %v3770_v53, %v3739_v57  ;;  %v2040_v57 = vmul.f32 %v7603_v56, %v7047_v13  ;;  %v2652_v13 = vmul.f32 %v7507_v41, %v7257_v46  ;;  %v2345_v46 = vmul.f32 %v7633_v39, %v7158_v2 }
0x185a   : > { %3843 = vrot.lane.b32.xlu1 %v3816_v25, %s6331_s19  ;;  %v7616_v25 = vld [vmem:[%s6757_s26 + $0x10] sm:$0xff] }
0x185b   : > { %3851 = vrot.lane.b32.xlu0 %v3775_v3, %s6330_s20  ;;  %v1733_v23 = vmul.f32 %v7616_v25, %v6905_v17  ;;  %v2042_v10 = vadd.f32 %v2040_v57, %v1736_v61  ;;  %v3258_v17 = vmul.f32 %v7326_v35, %v7421_v33  ;;  %v2957_v35 = vmul.f32 %v7411_v15, %v7341_v34 }
0x185c   : > { %v3257_v3 = vmul.f32 %v7330_v42, %v7419_v62 }
0x185f   : > { %3841 = vrot.lane.b32.xlu0 %v3815_v0, %s6331_s19  ;;  %v2346_v0 = vmul.f32 %v7611_v38, %v7160_v49  ;;  %v1427_v49 = vmul.f32 %v6747_v47, %v7626_v45  ;;  %v6294_v47 = vld [vmem:[%s6757_s26 + $0x78] sm:$0xff] }
0x1860   : > { %v3558_v40 = vmul.f32 %v6294_v47, %v7524_v60 }
0x1861   : > { %v2348_v16 = vadd.f32 %v2346_v0, %v2042_v10  ;;  %v1735_v12 = vadd.f32 %v1733_v23, %v1427_v49  ;;  %v3557_v0 = vmul.f32 %v6296_v1, %v7522_v31  ;;  %v6297_v23 = vld [vmem:[%s6757_s26 + $0x80] sm:$0xff]  ;;  %v978_v10 = vadd.f32 %v6949_v30, %v6709_v32 }
0x1862   : > { %v1060_v49 = vadd.f32 %v7003_v24, %v6705_v22 }
0x1863   : > { %v2654_v41 = vadd.f32 %v2652_v13, %v2348_v16  ;;  %v2041_v55 = vadd.f32 %v2039_v48, %v1735_v12 }
0x1865   : > { %v2960_v7 = vadd.f32 %v2958_v63, %v2654_v41  ;;  %v2347_v2 = vadd.f32 %v2345_v46, %v2041_v55  ;;  %v1054_v55 = vadd.f32 %v6999_v5, %v6705_v22 }
0x1867   : > { %v3260_v4 = vadd.f32 %v3258_v17, %v2960_v7  ;;  %v2653_v54 = vadd.f32 %v2651_v58, %v2347_v2  ;;  %v972_v17 = vadd.f32 %v6947_v29, %v6709_v32 }
0x1869   : > { %v3560_v60 = vadd.f32 %v3558_v40, %v3260_v4  ;;  %v2959_v15 = vadd.f32 %v2957_v35, %v2653_v54 }
0x186b   : > { %v3259_v42 = vadd.f32 %v3257_v3, %v2959_v15 }
0x186d   : > { %v3559_v31 = vadd.f32 %v3557_v0, %v3259_v42 }
0x18c4   : > { %v3834_v37 = vpop.permute.xlu1 %3833 }
0x18c5   : > { %v3838_v18 = vmul.f32 %v7611_v38, %v3834_v37 }
0x18c7   : > { %v7653_v33 = vadd.f32 %v3838_v18, %v7511_v44 }
0x18c8   : > { %v3854_v53 = vpop.permute.xlu1 %3853 }
0x18c9   : > { %v3858_v51 = vmul.f32 %v6295_v9, %v3854_v53  ;;  %v3832_v57 = vpop.permute.xlu0 %3831 }
0x18ca   : > { %v3837_v34 = vmul.f32 %v7633_v39, %v3832_v57 }
0x18cb   : > { %v7661_v44 = vadd.f32 %v3858_v51, %v3560_v60 }
0x18cc   : > { %v7664_v61 = vadd.f32 %v3837_v34, %v7518_v6  ;;  %5818 = vmatprep.mubr.msk.f32.mxu1 %vm806_vm0, %v3837_v34  ;;  %v3844_v47 = vpop.permute.xlu1 %3843 }
0x18cd   : > { %5819 = vmatmul.mubr.msk.f32.vlgmr.msra.gmra.mxu1 %vm806_vm0, %v3838_v18  ;;  %v3852_v62 = vpop.permute.xlu0 %3851  ;;  %v3848_v29 = vmul.f32 %v7611_v38, %v3844_v47 }
0x18ce   : > { %v3857_v13 = vmul.f32 %v6297_v23, %v3852_v62  ;;  %5807 = vmatprep.mubr.msk.f32.mxu0 %vm806_vm0, %v3852_v62  ;;  %5833 = vmatpush3.msra.mxu1 %v7428_v8 }
0x18cf   : > { %5808 = vmatmul.mubr.msk.f32.vlgmr.msra.gmra.mxu0 %vm806_vm0, %v3854_v53  ;;  %5834 = vmatprep.subr.mxu1 %v7534_v19 }
0x18d0   : > { %5822 = vmatpush3.msra.mxu0 %v7437_v52  ;;  %5835 = vmatpush3.msra.mxu1 %v7534_v19  ;;  %v7675_v6 = vadd.f32 %v3857_v13, %v3559_v31 }
0x18d1   : > { %5823 = vmatprep.subr.mxu0 %v7444_v11  ;;  %5836 = vmatprep.subr.mxu1 %v7543_v43  ;;  %v3842_v5 = vpop.permute.xlu0 %3841 }
0x18d2   : > { %5824 = vmatpush3.msra.mxu0 %v7444_v11  ;;  %5837 = vmatpush3.msra.mxu1 %v7543_v43  ;;  %v3847_v7 = vmul.f32 %v7633_v39, %v3842_v5 }
0x18d3   : > { %5825 = vmatprep.subr.mxu0 %v7453_v20  ;;  %5838 = vmatprep.subr.mxu1 %v7552_v59 }
0x18d4   : > { %5826 = vmatpush3.msra.mxu0 %v7453_v20  ;;  %5839 = vmatpush3.msra.mxu1 %v7552_v59 }
0x18d5   : > { %5827 = vmatprep.subr.mxu0 %v7462_v21  ;;  %5854 = vmatprep.subr.mxu1 %v7428_v8 }
0x18d6   : > { %5828 = vmatpush3.msra.mxu0 %v7462_v21 }
0x18d7   : > { %5843 = vmatprep.subr.mxu0 %v7437_v52 }
0x198d   : > { %v5820_v48 = vpop.f32.mrf.mxu1 }
0x198e   : > { %v4032_v63 = vadd.f32 %v5820_v48, %v978_v10 }
0x198f   : > { %v5809_v16 = vpop.f32.mrf.mxu0  ;;  %v4022_v12 = vpop.f32.mrf.mxu1 }
0x1990   : > { %6202 = vtanh.f32 %v4032_v63  ;;  %v3946_v46 = vadd.f32 %v5809_v16, %v1060_v49  ;;  %v4031_v41 = vadd.f32 %v4022_v12, %v972_v17  ;;  %v4078_v35 = vmul.f32 0.5, %v4032_v63 }
0x1991   : > { %v3936_v37 = vpop.f32.mrf.mxu0 }
0x1992   : > { %6204 = vtanh.f32 %v3946_v46  ;;  %v3945_v30 = vadd.f32 %v3936_v37, %v1054_v55  ;;  %v4034_v2 = vmul.f32 0.5, %v3946_v46  ;;  %v4077_v4 = vmul.f32 0.5, %v4031_v41 }
0x1993   : > { %6206 = vtanh.f32 %v4031_v41 }
0x1994   : > { %6208 = vtanh.f32 %v3945_v30  ;;  %v4033_v53 = vmul.f32 0.5, %v3945_v30 }
0x1995   : > { %6210 = vtanh.f32 %v4078_v35 }
0x1996   : > { %6212 = vtanh.f32 %v4034_v2 }
0x1997   : > { %6214 = vtanh.f32 %v4077_v4 }
0x1998   : > { %6216 = vtanh.f32 %v4033_v53 }
0x199d   : > { %v6203_v58 = vpop.eup %6202 }
0x199e   : > { %4101 = vrot.lane.b32.xlu1 %v6203_v58, %s6329_s18 }
0x199f   : > { %v6205_v24 = vpop.eup %6204 }
0x19a0   : > { %v6207_v40 = vpop.eup %6206 }
0x19a1   : > { %4099 = vrot.lane.b32.xlu0 %v6207_v40, %s6329_s18  ;;  %v6209_v18 = vpop.eup %6208 }
0x19a2   : > { %4049 = vrot.lane.b32.xlu1 %v6205_v24, %s6329_s18  ;;  %v6211_v38 = vpop.eup %6210 }
0x19a3   : > { %v4082_v3 = vmul.f32 0.5, %v6211_v38  ;;  %v6213_v9 = vpop.eup %6212 }
0x19a4   : > { %v6215_v51 = vpop.eup %6214  ;;  %v4038_v60 = vmul.f32 0.5, %v6213_v9 }
0x19a5   : > { %4047 = vrot.lane.b32.xlu0 %v6209_v18, %s6329_s18  ;;  %v4084_v54 = vadd.f32 0.5, %v4082_v3  ;;  %v4081_v0 = vmul.f32 0.5, %v6215_v51  ;;  %v6217_v39 = vpop.eup %6216 }
0x19a6   : > { %4091 = vrot.lane.b32.xlu1 %v3848_v29, %s6330_s20  ;;  %v4040_v34 = vadd.f32 0.5, %v4038_v60  ;;  %v4037_v23 = vmul.f32 0.5, %v6217_v39 }
0x19a7   : > { %v4083_v42 = vadd.f32 0.5, %v4081_v0 }
0x19a8   : > { %v4039_v10 = vadd.f32 0.5, %v4037_v23  ;;  %v4044_v41 = vmul.f32 %v4040_v34, %v7582_v36  ;;  %v6299_v23 = vld [vmem:[%s6757_s26 + $0x90] sm:$0xff] }
0x19a9   : > { %4089 = vrot.lane.b32.xlu0 %v3847_v7, %s6330_s20 }
0x19aa   : > { %v4043_v47 = vmul.f32 %v4039_v10, %v7586_v27 }
0x1a10   : > { %v4102_v57 = vpop.permute.xlu1 %4101 }
0x1a11   : > { %v4106_v1 = vmul.f32 %v4102_v57, %v4084_v54 }
0x1a13   : > { %4111 = vrot.lane.b32.xlu1 %v4106_v1, %s6330_s20  ;;  %v4100_v13 = vpop.permute.xlu0 %4099  ;;  %v6298_v1 = vld [vmem:[%s6757_s26 + $0x98] sm:$0xff] }
0x1a14   : > { %v4050_v15 = vpop.permute.xlu1 %4049  ;;  %v4105_v31 = vmul.f32 %v4100_v13, %v4083_v42 }
0x1a15   : > { %v4054_v62 = vmul.f32 %v4050_v15, %v4040_v34 }
0x1a16   : > { %4109 = vrot.lane.b32.xlu0 %v4105_v31, %s6330_s20 }
0x1a17   : > { %4059 = vrot.lane.b32.xlu1 %v4054_v62, %s6330_s20  ;;  %v4048_v48 = vpop.permute.xlu0 %4047 }
0x1a18   : > { %v4053_v49 = vmul.f32 %v4048_v48, %v4039_v10  ;;  %v4092_v63 = vpop.permute.xlu1 %4091 }
0x1a19   : > { %v4096_v16 = vmul.f32 %v4092_v63, %v4084_v54 }
0x1a1a   : > { %4057 = vrot.lane.b32.xlu0 %v4053_v49, %s6330_s20 }
0x1a1b   : > { %v4090_v46 = vpop.permute.xlu0 %4089 }
0x1a1c   : > { %v4095_v55 = vmul.f32 %v4090_v46, %v4083_v42 }
0x1a85   : > { %v4112_v12 = vpop.permute.xlu1 %4111 }
0x1a86   : > { %v4116_v17 = vadd.f32 %v4112_v12, %v4096_v16 }
0x1a88   : > { %6218 = vtanh.f32 %v4116_v17  ;;  %v4110_v58 = vpop.permute.xlu0 %4109 }
0x1a89   : > { %v4060_v37 = vpop.permute.xlu1 %4059  ;;  %v4115_v24 = vadd.f32 %v4110_v58, %v4095_v55 }
0x1a8a   : > { %v7710_v30 = vadd.f32 %v4060_v37, %v4044_v41 }
0x1a8c   : > { %6220 = vtanh.f32 %v7710_v30  ;;  %v4058_v40 = vpop.permute.xlu0 %4057 }
0x1a8d   : > { %6222 = vtanh.f32 %v4115_v24  ;;  %v7714_v29 = vadd.f32 %v4058_v40, %v4043_v47 }
0x1a8f   : > { %6224 = vtanh.f32 %v7714_v29 }
0x1a95   : > { %v6219_v18 = vpop.eup %6218 }
0x1a96   : > { %4123 = vrot.lane.b32.xlu1 %v6219_v18, %s6329_s18 }
0x1a99   : > { %v6221_v36 = vpop.eup %6220 }
0x1a9a   : > { %4071 = vrot.lane.b32.xlu1 %v6221_v36, %s6329_s18  ;;  %v6223_v5 = vpop.eup %6222 }
0x1a9b   : > { %4121 = vrot.lane.b32.xlu0 %v6223_v5, %s6329_s18 }
0x1a9c   : > { %v6225_v7 = vpop.eup %6224 }
0x1a9f   : > { %4069 = vrot.lane.b32.xlu0 %v6225_v7, %s6329_s18 }
0x1b08   : > { %v4124_v35 = vpop.permute.xlu1 %4123 }
0x1b09   : > { %v4128_v2 = vmul.f32 %v4124_v35, %v4084_v54 }
0x1b0b   : > { %4133 = vrot.lane.b32.xlu1 %v4128_v2, %s6330_s20 }
0x1b0c   : > { %v4072_v27 = vpop.permute.xlu1 %4071 }
0x1b0d   : > { %v4076_v4 = vmul.f32 %v4072_v27, %v4040_v34  ;;  %v4122_v53 = vpop.permute.xlu0 %4121 }
0x1b0e   : > { %v4127_v38 = vmul.f32 %v4122_v53, %v4083_v42 }
0x1b0f   : > { %4153 = vrot.lane.b32.xlu1 %v4076_v4, %s6330_s20 }
0x1b10   : > { %4131 = vrot.lane.b32.xlu0 %v4127_v38, %s6330_s20 }
0x1b11   : > { %v4070_v3 = vpop.permute.xlu0 %4069 }
0x1b12   : > { %v4075_v9 = vmul.f32 %v4070_v3, %v4039_v10 }
0x1b13   : > { %4143 = vrot.lane.b32.xlu1 %v4116_v17, %s6331_s19 }
0x1b14   : > { %4151 = vrot.lane.b32.xlu0 %v4075_v9, %s6330_s20 }
0x1b18   : > { %4141 = vrot.lane.b32.xlu0 %v4115_v24, %s6331_s19 }
0x1b7d   : > { %v4134_v51 = vpop.permute.xlu1 %4133 }
0x1b7e   : > { %v4138_v54 = vmul.f32 %v7603_v56, %v4134_v51 }
0x1b80   : > { %v7729_v60 = vadd.f32 %v4138_v54, %v7653_v33 }
0x1b81   : > { %v4154_v57 = vpop.permute.xlu1 %4153 }
0x1b82   : > { %v4158_v0 = vmul.f32 %v6298_v1, %v4154_v57  ;;  %v4132_v39 = vpop.permute.xlu0 %4131 }
0x1b83   : > { %v4137_v34 = vmul.f32 %v7623_v26, %v4132_v39 }
0x1b84   : > { %v7734_v15 = vadd.f32 %v4158_v0, %v7661_v44 }
0x1b85   : > { %v7737_v42 = vadd.f32 %v4137_v34, %v7664_v61  ;;  %5840 = vmatprep.mubr.msk.f32.mxu1 %vm806_vm0, %v4137_v34  ;;  %v4144_v12 = vpop.permute.xlu1 %4143 }
0x1b86   : > { %5841 = vmatmul.mubr.msk.f32.vlgmr.msra.gmra.mxu1 %vm806_vm0, %v4138_v54  ;;  %v4152_v62 = vpop.permute.xlu0 %4151  ;;  %v4148_v46 = vmul.f32 %v7603_v56, %v4144_v12 }
0x1b87   : > { %v4157_v33 = vmul.f32 %v6299_v23, %v4152_v62  ;;  %5829 = vmatprep.mubr.msk.f32.mxu0 %vm806_vm0, %v4152_v62  ;;  %5855 = vmatpush3.msra.mxu1 %v7428_v8  ;;  %v8079_v8 = vmov 0.0  }
0x1b88   : > { %5830 = vmatmul.mubr.msk.f32.vlgmr.msra.gmra.mxu0 %vm806_vm0, %v4154_v57  ;;  %5856 = vmatprep.subr.mxu1 %v7534_v19 }
0x1b89   : > { %5844 = vmatpush3.msra.mxu0 %v7437_v52  ;;  %5857 = vmatpush3.msra.mxu1 %v7534_v19  ;;  %v7749_v44 = vadd.f32 %v4157_v33, %v7675_v6  ;;  %v966_v52 = vadd.f32 %v6945_v14, %v6709_v32  ;;  %v8080_v19 = vld [vmem:[#allocation8_spill] sm:$0xff] }
0x1b8a   : > { %5845 = vmatprep.subr.mxu0 %v7444_v11  ;;  %5858 = vmatprep.subr.mxu1 %v7543_v43  ;;  %v4142_v37 = vpop.permute.xlu0 %4141 }
0x1b8b   : > { %5846 = vmatpush3.msra.mxu0 %v7444_v11  ;;  %5859 = vmatpush3.msra.mxu1 %v7543_v43  ;;  %v1072_v43 = vadd.f32 %v8080_v19, %v6705_v22  ;;  %v4147_v55 = vmul.f32 %v7623_v26, %v4142_v37 }
0x1b8c   : > { %5847 = vmatprep.subr.mxu0 %v7453_v20  ;;  %5860 = vmatprep.subr.mxu1 %v7552_v59 }
0x1b8d   : > { %5848 = vmatpush3.msra.mxu0 %v7453_v20  ;;  %5861 = vmatpush3.msra.mxu1 %v7552_v59  ;;  %v8081_v59 = vld [vmem:[#allocation13_spill] sm:$0xff] }
0x1b8e   : > { %5849 = vmatprep.subr.mxu0 %v7462_v21  ;;  %5876 = vmatprep.subr.mxu1 %v8079_v8  ;;  %v960_v13 = vadd.f32 %v8081_v59, %v6709_v32 }
0x1b8f   : > { %5850 = vmatpush3.msra.mxu0 %v7462_v21  ;;  %v8082_v21 = vld [vmem:[#allocation7_spill] sm:$0xff] }
0x1b90   : > { %5865 = vmatprep.subr.mxu0 %v8079_v8  ;;  %v1066_v49 = vadd.f32 %v8082_v21, %v6705_v22 }
0x1c46   : > { %v5842_v11 = vpop.f32.mrf.mxu1 }
0x1c47   : > { %v4332_v61 = vadd.f32 %v5842_v11, %v966_v52 }
0x1c48   : > { %v5831_v6 = vpop.f32.mrf.mxu0  ;;  %v4322_v20 = vpop.f32.mrf.mxu1 }
0x1c49   : > { %6226 = vtanh.f32 %v4332_v61  ;;  %v4246_v31 = vadd.f32 %v5831_v6, %v1072_v43  ;;  %v4331_v10 = vadd.f32 %v4322_v20, %v960_v13  ;;  %v4378_v58 = vmul.f32 0.5, %v4332_v61 }
0x1c4a   : > { %v4236_v48 = vpop.f32.mrf.mxu0 }
0x1c4b   : > { %6228 = vtanh.f32 %v4246_v31  ;;  %v4245_v14 = vadd.f32 %v4236_v48, %v1066_v49  ;;  %v4334_v24 = vmul.f32 0.5, %v4246_v31  ;;  %v4377_v47 = vmul.f32 0.5, %v4331_v10 }
0x1c4c   : > { %6230 = vtanh.f32 %v4331_v10 }
0x1c4d   : > { %6232 = vtanh.f32 %v4245_v14  ;;  %v4333_v40 = vmul.f32 0.5, %v4245_v14 }
0x1c4e   : > { %6234 = vtanh.f32 %v4378_v58 }
0x1c4f   : > { %6236 = vtanh.f32 %v4334_v24 }
0x1c50   : > { %6238 = vtanh.f32 %v4377_v47 }
0x1c51   : > { %6240 = vtanh.f32 %v4333_v40 }
0x1c56   : > { %v6227_v63 = vpop.eup %6226 }
0x1c57   : > { %4401 = vrot.lane.b32.xlu1 %v6227_v63, %s6329_s18 }
0x1c58   : > { %v6229_v16 = vpop.eup %6228 }
0x1c59   : > { %v6231_v17 = vpop.eup %6230 }
0x1c5a   : > { %4399 = vrot.lane.b32.xlu0 %v6231_v17, %s6329_s18  ;;  %v6233_v41 = vpop.eup %6232 }
0x1c5b   : > { %4349 = vrot.lane.b32.xlu1 %v6229_v16, %s6329_s18  ;;  %v6235_v56 = vpop.eup %6234 }
0x1c5c   : > { %v4382_v18 = vmul.f32 0.5, %v6235_v56  ;;  %v6237_v36 = vpop.eup %6236 }
0x1c5d   : > { %v6239_v5 = vpop.eup %6238  ;;  %v4338_v35 = vmul.f32 0.5, %v6237_v36 }
0x1c5e   : > { %4347 = vrot.lane.b32.xlu0 %v6233_v41, %s6329_s18  ;;  %v4384_v7 = vadd.f32 0.5, %v4382_v18  ;;  %v4381_v4 = vmul.f32 0.5, %v6239_v5  ;;  %v6241_v26 = vpop.eup %6240  ;;  %v6300_v18 = vld [vmem:[%s6757_s26 + $0xa0] sm:$0xff] }
0x1c5f   : > { %4391 = vrot.lane.b32.xlu1 %v4148_v46, %s6330_s20  ;;  %v4340_v53 = vadd.f32 0.5, %v4338_v35  ;;  %v4337_v51 = vmul.f32 0.5, %v6241_v26  ;;  %v8083_v35 = vld [vmem:[#allocation10_spill] sm:$0xff] }
0x1c60   : > { %v4383_v3 = vadd.f32 0.5, %v4381_v4  ;;  %v8084_v4 = vld [vmem:[#allocation9_spill] sm:$0xff] }
0x1c61   : > { %v4339_v1 = vadd.f32 0.5, %v4337_v51  ;;  %v4344_v11 = vmul.f32 %v4340_v53, %v7710_v30  ;;  %v1078_v26 = vadd.f32 %v8084_v4, %v6705_v22  ;;  %v8086_v51 = vld [vmem:[#allocation12_spill] sm:$0xff] }
0x1c62   : > { %4389 = vrot.lane.b32.xlu0 %v4147_v55, %s6330_s20 }
0x1c63   : > { %v4343_v59 = vmul.f32 %v4339_v1, %v7714_v29 }
0x1cc9   : > { %v4402_v2 = vpop.permute.xlu1 %4401 }
0x1cca   : > { %v4406_v27 = vmul.f32 %v4402_v2, %v4384_v7  ;;  %v948_v2 = vadd.f32 %v8083_v35, %v6709_v32 }
0x1ccc   : > { %4411 = vrot.lane.b32.xlu1 %v4406_v27, %s6330_s20  ;;  %v4400_v54 = vpop.permute.xlu0 %4399 }
0x1ccd   : > { %v4350_v38 = vpop.permute.xlu1 %4349  ;;  %v4405_v57 = vmul.f32 %v4400_v54, %v4383_v3 }
0x1cce   : > { %v4354_v9 = vmul.f32 %v4350_v38, %v4340_v53 }
0x1ccf   : > { %4409 = vrot.lane.b32.xlu0 %v4405_v57, %s6330_s20 }
0x1cd0   : > { %4359 = vrot.lane.b32.xlu1 %v4354_v9, %s6330_s20  ;;  %v4348_v0 = vpop.permute.xlu0 %4347 }
0x1cd1   : > { %v4353_v39 = vmul.f32 %v4348_v0, %v4339_v1  ;;  %v4392_v34 = vpop.permute.xlu1 %4391 }
0x1cd2   : > { %v4396_v62 = vmul.f32 %v4392_v34, %v4384_v7 }
0x1cd3   : > { %4357 = vrot.lane.b32.xlu0 %v4353_v39, %s6330_s20 }
0x1cd4   : > { %v4390_v52 = vpop.permute.xlu0 %4389 }
0x1cd5   : > { %v4395_v43 = vmul.f32 %v4390_v52, %v4383_v3 }
0x1d3e   : > { %v4412_v23 = vpop.permute.xlu1 %4411 }
0x1d3f   : > { %v7783_v33 = vadd.f32 %v4412_v23, %v4396_v62 }
0x1d41   : > { %6242 = vtanh.f32 %v7783_v33  ;;  %v4410_v6 = vpop.permute.xlu0 %4409 }
0x1d42   : > { %v4360_v19 = vpop.permute.xlu1 %4359  ;;  %v4415_v20 = vadd.f32 %v4410_v6, %v4395_v43 }
0x1d43   : > { %v7787_v61 = vadd.f32 %v4360_v19, %v4344_v11 }
0x1d45   : > { %6244 = vtanh.f32 %v7787_v61  ;;  %v4358_v13 = vpop.permute.xlu0 %4357 }
0x1d46   : > { %6246 = vtanh.f32 %v4415_v20  ;;  %v7791_v31 = vadd.f32 %v4358_v13, %v4343_v59 }
0x1d48   : > { %6248 = vtanh.f32 %v7791_v31 }
0x1d4e   : > { %v6243_v10 = vpop.eup %6242 }
0x1d4f   : > { %4423 = vrot.lane.b32.xlu1 %v6243_v10, %s6329_s18 }
0x1d52   : > { %v6245_v30 = vpop.eup %6244 }
0x1d53   : > { %4371 = vrot.lane.b32.xlu1 %v6245_v30, %s6329_s18  ;;  %v6247_v48 = vpop.eup %6246 }
0x1d54   : > { %4421 = vrot.lane.b32.xlu0 %v6247_v48, %s6329_s18 }
0x1d55   : > { %v6249_v21 = vpop.eup %6248 }
0x1d58   : > { %4369 = vrot.lane.b32.xlu0 %v6249_v21, %s6329_s18 }
0x1dc1   : > { %v4424_v49 = vpop.permute.xlu1 %4423 }
0x1dc2   : > { %v4428_v14 = vmul.f32 %v4424_v49, %v4384_v7 }
0x1dc4   : > { %4433 = vrot.lane.b32.xlu1 %v4428_v14, %s6330_s20 }
0x1dc5   : > { %v4372_v29 = vpop.permute.xlu1 %4371 }
0x1dc6   : > { %v4376_v63 = vmul.f32 %v4372_v29, %v4340_v53  ;;  %v4422_v16 = vpop.permute.xlu0 %4421 }
0x1dc7   : > { %v4427_v12 = vmul.f32 %v4422_v16, %v4383_v3  ;;  %v8085_v3 = vld [vmem:[#allocation11_spill] sm:$0xff] }
0x1dc8   : > { %4453 = vrot.lane.b32.xlu1 %v4376_v63, %s6330_s20  ;;  %v1084_v9 = vadd.f32 %v8085_v3, %v6705_v22 }
0x1dc9   : > { %4431 = vrot.lane.b32.xlu0 %v4427_v12, %s6330_s20 }
0x1dca   : > { %v4370_v17 = vpop.permute.xlu0 %4369 }
0x1dcb   : > { %v4375_v46 = vmul.f32 %v4370_v17, %v4339_v1 }
0x1dcd   : > { %4451 = vrot.lane.b32.xlu0 %v4375_v46, %s6330_s20 }
0x1dd1   : > { %4441 = vrot.lane.b32.xlu0 %v4415_v20, %s6331_s19 }
0x1e36   : > { %v4434_v41 = vpop.permute.xlu1 %4433 }
0x1e37   : > { %v4438_v37 = vmul.f32 %v7600_v28, %v4434_v41 }
0x1e39   : > { %v7805_v55 = vadd.f32 %v4438_v37, %v7729_v60 }
0x1e3a   : > { %v7813_v56 = vpop.permute.xlu1 %4453 }
0x1e3b   : > { %v4432_v58 = vpop.permute.xlu0 %4431 }
0x1e3c   : > { %v4437_v24 = vmul.f32 %v7616_v25, %v4432_v58  ;;  %v6332_v58 = vmov 0  }
0x1e3d   : > { %5985 = vset.pattern.permute.xlu0 %v6332_v58  ;;  %v5002_v58 = vld [vmem:[%s8064_s8 + $0x70] sm:$0xff] }
0x1e3e   : > { %v7809_v47 = vadd.f32 %v4437_v24, %v7737_v42  ;;  %5862 = vmatprep.mubr.msk.f32.mxu1 %vm806_vm0, %v4437_v24 }
0x1e3f   : > { %5863 = vmatmul.mubr.msk.f32.vlgmr.msra.gmra.mxu1 %vm806_vm0, %v4438_v37  ;;  %v4452_v40 = vpop.permute.xlu0 %4451 }
0x1e40   : > { %v4457_v36 = vmul.f32 %v6300_v18, %v4452_v40  ;;  %5851 = vmatprep.mubr.msk.f32.mxu0 %vm806_vm0, %v4452_v40  ;;  %5884 = vmatprep.mubr.msk.f32.mxu1 %vm6333_vm1, %v8079_v8 }
0x1e41   : > { %5852 = vmatmul.mubr.msk.f32.vlgmr.msra.gmra.mxu0 %vm806_vm0, %v7813_v56 }
0x1e42   : > { %v7820_v60 = vadd.f32 %v4457_v36, %v7749_v44  ;;  %v954_v44 = vadd.f32 %v8086_v51, %v6709_v32  ;;  %5873 = vmatprep.mubr.msk.f32.mxu0 %vm6333_vm1, %v8079_v8 }
0x1e43   : > { %v4442_v22 = vpop.permute.xlu0 %4441 }
0x1e44   : > { %v4447_v32 = vmul.f32 %v7616_v25, %v4442_v22  ;;  %v4769_v22 = vld [vmem:[%s8064_s8 + $0x8] sm:$0xff] }
0x1eff   : > { %v5864_v5 = vpop.f32.mrf.mxu1 }
0x1f00   : > { %v4631_v57 = vadd.f32 %v5864_v5, %v954_v44  ;;  %v4753_v44 = vld [vmem:[%s704_s15 + $0x8] sm:$0xff] }
0x1f01   : > { %v5853_v42 = vpop.f32.mrf.mxu0  ;;  %v4621_v7 = vpop.f32.mrf.mxu1 }
0x1f02   : > { %v4630_v53 = vadd.f32 %v4621_v7, %v948_v2  ;;  %v4546_v54 = vadd.f32 %v5853_v42, %v1084_v9  ;;  %v4677_v11 = vmul.f32 0.5, %v4631_v57  ;;  %v4752_v9 = vld [vmem:[%s704_s15] sm:$0xff] }
0x1f03   : > { %v4536_v27 = vpop.f32.mrf.mxu0 }
0x1f04   : > { %v4545_v38 = vadd.f32 %v4536_v27, %v1078_v26  ;;  %6250 = vtanh.f32 %v4630_v53  ;;  %v4676_v62 = vmul.f32 0.5, %v4630_v53  ;;  %v4633_v52 = vmul.f32 0.5, %v4546_v54 }
0x1f06   : > { %6252 = vtanh.f32 %v4545_v38  ;;  %v4632_v23 = vmul.f32 0.5, %v4545_v38 }
0x1f07   : > { %6254 = vtanh.f32 %v4546_v54  ;;  %v4774_v54 = vld [vmem:[%s8064_s8 + $0x30] sm:$0xff] }
0x1f08   : > { %6256 = vtanh.f32 %v4631_v57  ;;  %v4771_v57 = vld [vmem:[%s8064_s8 + $0x18] sm:$0xff] }
0x1f09   : > { %6258 = vtanh.f32 %v4676_v62  ;;  %5877 = vmatpush3.msra.mxu1 %v4771_v57 }
0x1f0a   : > { %6260 = vtanh.f32 %v4632_v23  ;;  %5878 = vmatprep.subr.mxu1 %v8079_v8 }
0x1f0b   : > { %6262 = vtanh.f32 %v4633_v52 }
0x1f0c   : > { %6264 = vtanh.f32 %v4677_v11 }
0x1f11   : > { %v6251_v1 = vpop.eup %6250 }
0x1f12   : > { %4698 = vrot.lane.b32.xlu1 %v6251_v1, %s6329_s18  ;;  %v4773_v1 = vld [vmem:[%s8064_s8 + $0x28] sm:$0xff] }
0x1f13   : > { %v6253_v0 = vpop.eup %6252 }
0x1f14   : > { %4646 = vrot.lane.b32.xlu0 %v6253_v0, %s6329_s18  ;;  %v6255_v39 = vpop.eup %6254  ;;  %v4770_v0 = vld [vmem:[%s8064_s8 + $0x10] sm:$0xff] }
0x1f15   : > { %v6257_v34 = vpop.eup %6256  ;;  %5879 = vmatpush3.msra.mxu1 %v4770_v0 }
0x1f16   : > { %4443 = vrot.lane.b32.xlu1 %v7783_v33, %s6331_s19  ;;  %v6259_v33 = vpop.eup %6258  ;;  %5880 = vmatprep.subr.mxu1 %v8079_v8 }
0x1f17   : > { %v6261_v19 = vpop.eup %6260  ;;  %v4680_v43 = vmul.f32 0.5, %v6259_v33  ;;  %5881 = vmatpush3.msra.mxu1 %v4769_v22 }
0x1f18   : > { %4648 = vrot.lane.b32.xlu0 %v6255_v39, %s6329_s18  ;;  %v4636_v6 = vmul.f32 0.5, %v6261_v19  ;;  %v6263_v20 = vpop.eup %6262  ;;  %v4772_v39 = vld [vmem:[%s8064_s8 + $0x20] sm:$0xff]  ;;  %5882 = vmatprep.subr.mxu1 %v8079_v8 }
0x1f19   : > { %v7838_v59 = vadd.f32 0.5, %v4680_v43  ;;  %v4637_v30 = vmul.f32 0.5, %v6263_v20  ;;  %v6265_v48 = vpop.eup %6264 }
0x1f1a   : > { %4700 = vrot.lane.b32.xlu1 %v6257_v34, %s6329_s18  ;;  %v7841_v10 = vadd.f32 0.5, %v4636_v6  ;;  %v4681_v63 = vmul.f32 0.5, %v6265_v48  ;;  %v4768_v34 = vld [vmem:[%s8064_s8] sm:$0xff] }
0x1f1b   : > { %v7846_v29 = vadd.f32 0.5, %v4637_v30  ;;  %5883 = vmatpush3.msra.mxu1 %v4768_v34 }
0x1f1c   : > { %4688 = vrot.lane.b32.xlu0 %v4447_v32, %s6330_s20  ;;  %v7850_v41 = vadd.f32 0.5, %v4681_v63  ;;  %v4642_v36 = vmul.f32 %v7841_v10, %v7791_v31  ;;  %v4775_v31 = vld [vmem:[%s8064_s8 + $0x38] sm:$0xff]  ;;  %5898 = vmatprep.subr.mxu1 %v8079_v8 }
0x1f1d   : > { %v4643_v7 = vmul.f32 %v7846_v29, %v7787_v61  ;;  %5866 = vmatpush3.msra.mxu0 %v4775_v31  ;;  %v5091_v31 = vld [vmem:[%s8066_s10 + $0x20] sm:$0xff] }
0x1f1e   : > { %5867 = vmatprep.subr.mxu0 %v8079_v8 }
0x1f1f   : > { %5868 = vmatpush3.msra.mxu0 %v4774_v54 }
0x1f20   : > { %5869 = vmatprep.subr.mxu0 %v8079_v8 }
0x1f21   : > { %5870 = vmatpush3.msra.mxu0 %v4773_v1 }
0x1f22   : > { %5871 = vmatprep.subr.mxu0 %v8079_v8 }
0x1f23   : > { %5872 = vmatpush3.msra.mxu0 %v4772_v39 }
0x1f24   : > { %5887 = vmatprep.subr.mxu0 %v8079_v8 }
0x1f84   : > { %v4699_v25 = vpop.permute.xlu1 %4698 }
0x1f85   : > { %v4704_v13 = vmul.f32 %v4699_v25, %v7838_v59 }
0x1f86   : > { %v4647_v21 = vpop.permute.xlu0 %4646 }
0x1f87   : > { %v4652_v49 = vmul.f32 %v4647_v21, %v7841_v10  ;;  %4708 = vrot.lane.b32.xlu1 %v4704_v13, %s6330_s20  ;;  %v6302_v21 = vld [vmem:[%s6757_s26 + $0xb0] sm:$0xff] }
0x1f88   : > { %v4444_v14 = vpop.permute.xlu1 %4443 }
0x1f89   : > { %4656 = vrot.lane.b32.xlu0 %v4652_v49, %s6330_s20  ;;  %v4448_v12 = vmul.f32 %v7600_v28, %v4444_v14  ;;  %v4925_v14 = vld [vmem:[%s8064_s8 + $0x58] sm:$0xff] }
0x1f8a   : > { %v4649_v16 = vpop.permute.xlu0 %4648 }
0x1f8b   : > { %v4653_v17 = vmul.f32 %v4649_v16, %v7846_v29  ;;  %v6303_v16 = vld [vmem:[%s6757_s26 + $0xb8] sm:$0xff] }
0x1f8c   : > { %v4701_v46 = vpop.permute.xlu1 %4700 }
0x1f8d   : > { %4690 = vrot.lane.b32.xlu0 %v4448_v12, %s6330_s20  ;;  %4658 = vrot.lane.b32.xlu1 %v4653_v17, %s6330_s20  ;;  %v4705_v37 = vmul.f32 %v4701_v46, %v7850_v41  ;;  %v4923_v17 = vld [vmem:[%s8064_s8 + $0x48] sm:$0xff] }
0x1f8e   : > { %v4689_v24 = vpop.permute.xlu0 %4688 }
0x1f8f   : > { %v4694_v40 = vmul.f32 %v4689_v24, %v7838_v59  ;;  %v4922_v24 = vld [vmem:[%s8064_s8 + $0x40] sm:$0xff] }
0x1f91   : > { %4710 = vrot.lane.b32.xlu1 %v4705_v37, %s6330_s20 }
0x1ff9   : > { %v4709_v18 = vpop.permute.xlu1 %4708 }
0x1ffa   : > { %v4714_v28 = vadd.f32 %v4709_v18, %v4694_v40  ;;  %v5001_v18 = vld [vmem:[%s8064_s8 + $0x68] sm:$0xff] }
0x1ffb   : > { %v4657_v5 = vpop.permute.xlu0 %4656 }
0x1ffc   : > { %6266 = vtanh.f32 %v4714_v28  ;;  %v4662_v42 = vadd.f32 %v4657_v5, %v4642_v36  ;;  %v5102_v36 = vld [vmem:[%s8066_s10 + $0x78] sm:$0xff]  ;;  %v5101_v5 = vld [vmem:[%s8066_s10 + $0x70] sm:$0xff] }
0x1ffe   : > { %6268 = vtanh.f32 %v4662_v42  ;;  %v5100_v42 = vld [vmem:[%s8066_s10 + $0x68] sm:$0xff] }
0x1fff   : > { %v4659_v35 = vpop.permute.xlu1 %4658  ;;  %v4691_v2 = vpop.permute.xlu0 %4690 }
0x2000   : > { %v4663_v27 = vadd.f32 %v4659_v35, %v4643_v7  ;;  %v4695_v4 = vmul.f32 %v4691_v2, %v7850_v41  ;;  %v5099_v7 = vld [vmem:[%s8066_s10 + $0x60] sm:$0xff]  ;;  %v5098_v35 = vld [vmem:[%s8066_s10 + $0x58] sm:$0xff]  ;;  %v5097_v2 = vld [vmem:[%s8066_s10 + $0x50] sm:$0xff] }
0x2002   : > { %6270 = vtanh.f32 %v4663_v27  ;;  %v5096_v27 = vld [vmem:[%s8066_s10 + $0x48] sm:$0xff] }
0x2003   : > { %v4711_v26 = vpop.permute.xlu1 %4710 }
0x2004   : > { %v4715_v53 = vadd.f32 %v4711_v26, %v4695_v4  ;;  %v5095_v4 = vld [vmem:[%s8066_s10 + $0x40] sm:$0xff]  ;;  %v5094_v26 = vld [vmem:[%s8066_s10 + $0x38] sm:$0xff] }
0x2006   : > { %6272 = vtanh.f32 %v4715_v53  ;;  %v5093_v53 = vld [vmem:[%s8066_s10 + $0x30] sm:$0xff] }
0x2009   : > { %v6267_v38 = vpop.eup %6266 }
0x200a   : > { %4720 = vrot.lane.b32.xlu0 %v6267_v38, %s6329_s18  ;;  %v5092_v38 = vld [vmem:[%s8066_s10 + $0x28] sm:$0xff] }
0x200b   : > { %v6269_v3 = vpop.eup %6268 }
0x200c   : > { %4668 = vrot.lane.b32.xlu1 %v6269_v3, %s6329_s18  ;;  %v5090_v3 = vld [vmem:[%s8066_s10 + $0x18] sm:$0xff] }
0x200f   : > { %v6271_v61 = vpop.eup %6270 }
0x2010   : > { %4670 = vrot.lane.b32.xlu0 %v6271_v61, %s6329_s18  ;;  %v5089_v61 = vld [vmem:[%s8066_s10 + $0x10] sm:$0xff] }
0x2013   : > { %v6273_v51 = vpop.eup %6272 }
0x2014   : > { %4722 = vrot.lane.b32.xlu1 %v6273_v51, %s6329_s18  ;;  %4756 = vperm.xlu0 %5985, %v4752_v9   ;;  %v5088_v9 = vld [vmem:[%s8066_s10 + $0x8] sm:$0xff]  ;;  %v5087_v51 = vld [vmem:[%s8066_s10] sm:$0xff]  ;;  %s761_s18 = scalar_lea.vmem %s8068_s12, %s5320_s16 }
0x2018   : > { %4761 = vperm.xlu0 %5985, %v4753_v44  }
0x207c   : > { %v4721_v32 = vpop.permute.xlu0 %4720 }
0x207d   : > { %v4726_v62 = vmul.f32 %v4721_v32, %v7838_v59 }
0x207e   : > { %v4669_v23 = vpop.permute.xlu1 %4668 }
0x207f   : > { %4730 = vrot.lane.b32.xlu1 %v4726_v62, %s6330_s20  ;;  %v4674_v52 = vmul.f32 %v4669_v23, %v7841_v10  ;;  %v6301_v10 = vld [vmem:[%s6757_s26 + $0xa8] sm:$0xff]  ;;  %v5416_v62 = vld [vmem:[%s8065_s9] ss:$0 sm:$0xff] }
0x2080   : > { %v4458_v30 = vmul.f32 %v6301_v10, %v7813_v56  ;;  %v5193_v10 = vld [vmem:[%s757_s30] sm:$0xff] }
0x2082   : > { %v4671_v11 = vpop.permute.xlu0 %4670  ;;  %v4460_v46 = vadd.f32 %v4458_v30, %v7734_v15 }
0x2083   : > { %4740 = vrot.lane.b32.xlu1 %v4674_v52, %s6330_s20  ;;  %v4675_v33 = vmul.f32 %v4671_v11, %v7846_v29 }
0x2086   : > { %v4723_v19 = vpop.permute.xlu1 %4722 }
0x2087   : > { %v4727_v43 = vmul.f32 %v4723_v19, %v7850_v41  ;;  %4742 = vrot.lane.b32.xlu1 %v4675_v33, %s6330_s20  ;;  %v5417_v33 = vld [vmem:[%s8067_s11] ss:$0 sm:$0xff] }
0x2089   : > { %4732 = vrot.lane.b32.xlu0 %v4727_v43, %s6330_s20 }
0x208f   : > { %v4757_v20 = vpop.permute.xlu0 %4756 }
0x2093   : > { %v4762_v29 = vpop.permute.xlu0 %4761 }
0x20f1   : > { %v4731_v6 = vpop.permute.xlu1 %4730 }
0x20f2   : > { %v4736_v59 = vmul.f32 %v4731_v6, %v7626_v45  ;;  %v4924_v45 = vld [vmem:[%s8064_s8 + $0x50] sm:$0xff] }
0x20f4   : > { %v4750_v25 = vadd.f32 %v4736_v59, %v7809_v47 }
0x20f5   : > { %v4741_v13 = vpop.permute.xlu1 %4740 }
0x20f6   : > { %v4766_v48 = vmul.f32 %v4757_v20, %v4750_v25  ;;  %v4746_v49 = vmul.f32 %v6302_v21, %v4741_v13 }
0x20f8   : > { %v4748_v63 = vadd.f32 %v4746_v49, %v7820_v60  ;;  %5874 = vmatmul.mubr.msk.f32.vlgmr.msra.gmra.mxu0 %vm806_vm0, %v4766_v48  ;;  %v5003_v60 = vld [vmem:[%s8064_s8 + $0x78] sm:$0xff] }
0x20f9   : > { %v4743_v47 = vpop.permute.xlu1 %4742  ;;  %5888 = vmatpush3.msra.mxu0 %v4925_v14  ;;  %5895 = vmatprep.mubr.msk.f32.mxu0 %vm6333_vm1, %v8079_v8 }
0x20fa   : > { %v4764_v56 = vmul.f32 %v4757_v20, %v4748_v63  ;;  %v4747_v12 = vmul.f32 %v6303_v16, %v4743_v47  ;;  %5889 = vmatprep.subr.mxu0 %v8079_v8 }
0x20fb   : > { %5890 = vmatpush3.msra.mxu0 %v4924_v45  ;;  %v4733_v41 = vpop.permute.xlu0 %4732 }
0x20fc   : > { %v4737_v37 = vmul.f32 %v4733_v41, %v7606_v50  ;;  %5885 = vmatmul.mubr.msk.f32.vlgmr.msra.gmra.mxu1 %vm806_vm0, %v4764_v56  ;;  %5891 = vmatprep.subr.mxu0 %v8079_v8  ;;  %v4749_v40 = vadd.f32 %v4747_v12, %v4460_v46 }
0x20fd   : > { %5899 = vmatpush3.msra.mxu1 %v5003_v60  ;;  %5892 = vmatpush3.msra.mxu0 %v4923_v17 }
0x20fe   : > { %v4751_v15 = vadd.f32 %v4737_v37, %v7805_v55  ;;  %5900 = vmatprep.subr.mxu1 %v8079_v8  ;;  %5893 = vmatprep.subr.mxu0 %v8079_v8  ;;  %v4765_v50 = vmul.f32 %v4762_v29, %v4749_v40  ;;  %v5000_v55 = vld [vmem:[%s8064_s8 + $0x60] sm:$0xff] }
0x20ff   : > { %5901 = vmatpush3.msra.mxu1 %v5002_v58  ;;  %5894 = vmatpush3.msra.mxu0 %v4922_v24 }
0x2100   : > { %v4767_v28 = vmul.f32 %v4762_v29, %v4751_v15  ;;  %5902 = vmatprep.subr.mxu1 %v8079_v8  ;;  %5896 = vmatmul.mubr.msk.f32.vlgmr.msra.gmra.mxu0 %vm806_vm0, %v4765_v50 }
0x2101   : > { %5903 = vmatpush3.msra.mxu1 %v5001_v18  ;;  %5906 = vmatprep.mubr.msk.f32.mxu1 %vm6333_vm1, %v8079_v8 }
0x2102   : > { %5904 = vmatprep.subr.mxu1 %v8079_v8  ;;  %5909 = vmatprep.subr.mxu0 %v8079_v8 }
0x2103   : > { %5905 = vmatpush3.msra.mxu1 %v5000_v55  ;;  %5910 = vmatpush3.msra.mxu0 %v5102_v36 }
0x2104   : > { %5907 = vmatmul.mubr.msk.f32.vlgmr.msra.gmra.mxu1 %vm806_vm0, %v4767_v28  ;;  %5911 = vmatprep.subr.mxu0 %v8079_v8 }
0x2105   : > { %5912 = vmatpush3.msra.mxu0 %v5101_v5  ;;  %5941 = vmatprep.mubr.msk.f32.mxu0 %vm6333_vm1, %v8079_v8 }
0x2106   : > { %5913 = vmatprep.subr.mxu0 %v8079_v8 }
0x2107   : > { %5914 = vmatpush3.msra.mxu0 %v5100_v42 }
0x2108   : > { %5915 = vmatprep.subr.mxu0 %v8079_v8 }
0x2109   : > { %5916 = vmatpush3.msra.mxu0 %v5099_v7 }
0x210a   : > { %5917 = vmatprep.subr.mxu0 %v8079_v8 }
0x210b   : > { %5918 = vmatpush3.msra.mxu0 %v5098_v35 }
0x210c   : > { %5919 = vmatprep.subr.mxu0 %v8079_v8 }
0x210d   : > { %5920 = vmatpush3.msra.mxu0 %v5097_v2 }
0x210e   : > { %5921 = vmatprep.subr.mxu0 %v8079_v8 }
0x210f   : > { %5922 = vmatpush3.msra.mxu0 %v5096_v27 }
0x2110   : > { %5923 = vmatprep.subr.mxu0 %v8079_v8 }
0x2111   : > { %5924 = vmatpush3.msra.mxu0 %v5095_v4 }
0x2112   : > { %5925 = vmatprep.subr.mxu0 %v8079_v8 }
0x2113   : > { %5926 = vmatpush3.msra.mxu0 %v5094_v26 }
0x2114   : > { %5927 = vmatprep.subr.mxu0 %v8079_v8 }
0x2115   : > { %5928 = vmatpush3.msra.mxu0 %v5093_v53 }
0x2116   : > { %5929 = vmatprep.subr.mxu0 %v8079_v8 }
0x2117   : > { %5930 = vmatpush3.msra.mxu0 %v5092_v38 }
0x2118   : > { %5931 = vmatprep.subr.mxu0 %v8079_v8 }
0x2119   : > { %5932 = vmatpush3.msra.mxu0 %v5091_v31 }
0x211a   : > { %5933 = vmatprep.subr.mxu0 %v8079_v8 }
0x211b   : > { %5934 = vmatpush3.msra.mxu0 %v5090_v3 }
0x211c   : > { %5935 = vmatprep.subr.mxu0 %v8079_v8 }
0x211d   : > { %5936 = vmatpush3.msra.mxu0 %v5089_v61 }
0x211e   : > { %5937 = vmatprep.subr.mxu0 %v8079_v8 }
0x211f   : > { %5938 = vmatpush3.msra.mxu0 %v5088_v9 }
0x2120   : > { %5939 = vmatprep.subr.mxu0 %v8079_v8 }
0x2121   : > { %5940 = vmatpush3.msra.mxu0 %v5087_v51 }
0x21b8   : > { %v4845_v44 = vpop.f32.mrf.mxu0 }
0x21ba   : > { %v5875_v54 = vpop.f32.mrf.mxu0 }
0x21bc   : > { %v4918_v57 = vpop.f32.mrf.mxu1 }
0x21bd   : > { %v4919_v0 = vadd.f32 %v4918_v57, %v4845_v44 }
0x21be   : > { %v5886_v1 = vpop.f32.mrf.mxu1 }
0x21c0   : > { %v4995_v39 = vpop.f32.mrf.mxu0 }
0x21c1   : > { %v4999_v22 = vadd.f32 %v4995_v39, %v4919_v0 }
0x21c2   : > { %v5897_v34 = vpop.f32.mrf.mxu0 }
0x21c4   : > { %v5073_v32 = vpop.f32.mrf.mxu1 }
0x21c5   : > { %v5077_v8 = vadd.f32 %v5073_v32, %v4999_v22 }
0x21c6   : > { %v5908_v23 = vpop.f32.mrf.mxu1 }
0x21c7   : > { %v5085_v52 = vadd.f32 %v5416_v62, %v5077_v8 }
0x21c9   : > { %v5086_v11 = vmax.f32 %v5085_v52, 0.0 }
0x21cb   : > { %5942 = vmatmul.mubr.f32.vlgmr.msra.gmra.mxu0 %v5086_v11 }
0x228b   : > { %v5176_v19 = vpop.f32.mrf.mxu0 }
0x228c   : > { %v5177_v43 = vadd.f32 %v5417_v33, %v5176_v19 }
0x228d   : > { %v5943_v6 = vpop.f32.mrf.mxu0 }
0x228e   : > { %v5181_v20 = vsel %vm5180_vm2, %v5177_v43, -inf  ;;  %v5194_v21 = vmul.f32 %v5193_v10, %v5177_v43 }
0x228f   : > { %5182 = vmax.xlane.f32.xlu1 %v5181_v20 }
0x2290   : > { %v5195_v49 = vsel %vm5180_vm2, %v5194_v21, 0.0 }
0x2318   : > { %v5183_v59 = vpop.xlane.xlu1 %5182 }
0x2319   : > { %v5184_v25 = vsub.f32 %v5177_v43, %v5183_v59 }
0x231b   : > { %v5185_v13 = vmul.f32 1.442695, %v5184_v25 }
0x231d   : > { %6274 = vpow2.f32 %v5185_v13 }
0x232a   : > { %v6275_v30 = vpop.eup %6274 }
0x232b   : > { %v5187_v48 = vsel %vm5180_vm2, %v6275_v30, 0.0 }
0x232c   : > { %5188 = vadd.xlane.f32.xlu0 %v5187_v48 }
0x2330   : > { %5196 = vadd.xlane.f32.xlu0 %v5195_v49 }
0x23b5   : > { %v5189_v14 = vpop.xlane.xlu0 %5188 }
0x23b6   : > { %6276 = vlog2.f32 %v5189_v14 }
0x23b9   : > { %v5197_v47 = vpop.xlane.xlu0 %5196 }
0x23c3   : > { %v6277_v29 = vpop.eup %6276 }
0x23c4   : > { %v5191_v63 = vmul.f32 0.6931472, %v6277_v29 }
0x23c6   : > { %v5192_v45 = vadd.f32 %v5191_v63, %v5183_v59 }
0x23c8   : > { %v5198_v56 = vsub.f32 %v5192_v45, %v5197_v47 }
0x23ca   : > { %v5199_v16 = vsel %vm5180_vm2, %v5177_v43, %v5198_v56 }
0x23cb   : > { %v5201_v12 = vsel %vm5200_vm3, %v5199_v16, 0.0 }
0x23cc   : > { %5202 = vst [vmem:[%s761_s18] sm:$0xff] %v5201_v12 }
0x23cd PF: > { %p19_p9 = scmp.ge.s32.totalorder %s6416_s25, 4   ;;  %s8087_s21 = smov %s6322_s22 }
0x23ce   : > { %s8088_s22 = smov %s6425_s28  ;;  %s8089_s23 = smov %s6416_s25 }
0x23cf   :  { %21 = sbr.rel (!%p19_p9) target bundleno = 2 (0x2), region = 269 }

</bundles_post_ra>
